<compile_context>
chip_gen: v6e
topology: v6e:2x2x1
jax: 0.10.0
libtpu: 0.0.40
codegen_flags: <defaults>
</compile_context>

<pallas_src>
import numpy as np
import jax
import jax.numpy as jnp
from jax import lax
from jax.experimental import pallas as pl
from jax.experimental.pallas import tpu as pltpu

# ----------------------------- configuration -------------------------------
HIDDEN      = 32          # transformer.d_model
NHEAD       = 2
HEAD_DIM    = HIDDEN // NHEAD
DIM_FF      = 64
LATENT      = 32          # self.latent_dim
STATE_DIM   = 14
NUM_QUERIES = 8
NUM_CAMS    = 2
IMG_H = IMG_W = 16
PATCH       = 4           # synthetic backbone: 4x4 patchify conv
NUM_CH      = 8           # backbone.num_channels
VAE_ENC_LAYERS = 1
ENC_LAYERS  = 1
DEC_LAYERS  = 1

HP, WP   = IMG_H // PATCH, IMG_W // PATCH
S_TOKENS = HP * NUM_CAMS * WP            # image tokens fed to the transformer
L_FULL   = 2 + S_TOKENS                  # [latent, proprio] + image tokens
L_VAE    = 1 + 1 + NUM_QUERIES           # [cls, qpos] + action tokens
PATCH_IN = 3 * PATCH * PATCH


# ----------------------------- BlockSpec helpers ----------------------------
def _batched_spec(shape):
    """Block (1, *trailing-full-dims) indexed along the leading (grid) axis."""
    blk = (1,) + tuple(shape[1:])
    nrest = len(shape) - 1
    return pl.BlockSpec(blk, lambda b, _n=nrest: (b,) + (0,) * _n)


def _full_spec(shape):
    """Whole array, resident across all grid steps (block index is constant)."""
    nd = len(shape)
    return pl.BlockSpec(tuple(shape), lambda b, _n=nd: (0,) * _n)


def _fused_call(kernel, ins, n_batched, grid, out_shape, scratch_shapes=(), cost=None):
    in_specs = ([_batched_spec(x.shape) for x in ins[:n_batched]]
                + [_full_spec(x.shape) for x in ins[n_batched:]])
    return pl.pallas_call(
        kernel,
        out_shape=jax.ShapeDtypeStruct(out_shape, jnp.float32),
        grid=grid,
        in_specs=in_specs,
        out_specs=_batched_spec(out_shape),
        scratch_shapes=list(scratch_shapes),
        compiler_params=pltpu.CompilerParams(dimension_semantics=("parallel",)),
        cost_estimate=cost,
    )(*ins)


# ----------------------------- in-kernel math -------------------------------
def _layer_norm(x, ln):
    """x: (L, D); ln: (2, D) with gamma in row 0, beta in row 1."""
    g = ln[0:1, :]
    b = ln[1:2, :]
    mean = jnp.mean(x, axis=-1, keepdims=True)
    xc = x - mean
    var = jnp.mean(xc * xc, axis=-1, keepdims=True)
    return xc * lax.rsqrt(var + 1e-5) * g + b


def _mha(q_in, k_in, v_in, w_ref, b_ref, wo_ref, bo_ref, l, bias=None):
    """Multi-head attention for one sample; heads handled in-kernel.

    w_ref:(NL,3,D,D) q/k/v proj, b_ref:(NL,3,1,D), wo_ref:(NL,NHEAD,dh,D), bo_ref:(NL,1,D).
    bias: optional (1, Lk) additive key-padding bias.
    """
    q = jnp.dot(q_in, w_ref[l, 0], preferred_element_type=jnp.float32) + b_ref[l, 0]
    k = jnp.dot(k_in, w_ref[l, 1], preferred_element_type=jnp.float32) + b_ref[l, 1]
    v = jnp.dot(v_in, w_ref[l, 2], preferred_element_type=jnp.float32) + b_ref[l, 2]
    scale = 1.0 / float(np.sqrt(HEAD_DIM))
    out = bo_ref[l]                                   # (1, D) -> broadcasts on first add
    for h in range(NHEAD):
        sl = slice(h * HEAD_DIM, (h + 1) * HEAD_DIM)
        s = lax.dot_general(q[:, sl], k[:, sl], (((1,), (1,)), ((), ())),
                            preferred_element_type=jnp.float32) * scale
        if bias is not None:
            s = s + bias
        s = s - jnp.max(s, axis=-1, keepdims=True)
        p = jnp.exp(s)
        p = p / jnp.sum(p, axis=-1, keepdims=True)
        o_h = jnp.dot(p, v[:, sl], preferred_element_type=jnp.float32)       # (Lq, dh)
        out = out + jnp.dot(o_h, wo_ref[l, h], preferred_element_type=jnp.float32)
    return out


def _encoder_layer(x, pos, refs, l, bias=None):
    """DETR post-norm encoder layer; x, pos: (L, D)."""
    (w, b, wo, bo, ln1, wff1, bff1, wff2, bff2, ln2) = refs
    qk = x + pos
    attn = _mha(qk, qk, x, w, b, wo, bo, l, bias=bias)
    x = _layer_norm(x + attn, ln1[l])
    ff = jnp.maximum(jnp.dot(x, wff1[l], preferred_element_type=jnp.float32) + bff1[l], 0.0)
    ff = jnp.dot(ff, wff2[l], preferred_element_type=jnp.float32) + bff2[l]
    return _layer_norm(x + ff, ln2[l])


def _decoder_layer(tgt, memory, pos, query_pos, refs, l):
    (sa_w, sa_b, sa_wo, sa_bo, ca_w, ca_b, ca_wo, ca_bo,
     ln1, ln2, ln3, wff1, bff1, wff2, bff2) = refs
    q = tgt + query_pos
    attn = _mha(q, q, tgt, sa_w, sa_b, sa_wo, sa_bo, l)
    tgt = _layer_norm(tgt + attn, ln1[l])
    attn = _mha(tgt + query_pos, memory + pos, memory, ca_w, ca_b, ca_wo, ca_bo, l)
    tgt = _layer_norm(tgt + attn, ln2[l])
    ff = jnp.maximum(jnp.dot(tgt, wff1[l], preferred_element_type=jnp.float32) + bff1[l], 0.0)
    ff = jnp.dot(ff, wff2[l], preferred_element_type=jnp.float32) + bff2[l]
    return _layer_norm(tgt + ff, ln3[l])


# ----------------------------- fused kernels --------------------------------
def _vae_encoder_kernel(actions_ref, qpos_ref, bias_ref, cls_ref, pos_ref,
                        w_act_ref, b_act_ref, w_joint_ref, b_joint_ref,
                        e_w, e_b, e_wo, e_bo, e_ln1, e_wff1, e_bff1, e_wff2, e_bff2, e_ln2,
                        w_lat_ref, b_lat_ref, out_ref, asm_ref):
    a_emb = jnp.dot(actions_ref[0], w_act_ref[...],
                    preferred_element_type=jnp.float32) + b_act_ref[...]
    q_emb = jnp.dot(qpos_ref[0], w_joint_ref[...],
                    preferred_element_type=jnp.float32) + b_joint_ref[...]
    # token assembly [cls, qpos, actions] via VMEM scratch (no HBM round trip)
    asm_ref[0:1, :] = cls_ref[...]
    asm_ref[1:2, :] = q_emb
    asm_ref[2:, :] = a_emb
    x = asm_ref[...]
    pos = pos_ref[...]
    bias = bias_ref[0]                                 # (1, L_VAE) key-padding bias
    enc_refs = (e_w, e_b, e_wo, e_bo, e_ln1, e_wff1, e_bff1, e_wff2, e_bff2, e_ln2)
    for l in range(VAE_ENC_LAYERS):
        x = _encoder_layer(x, pos, enc_refs, l, bias=bias)
    cls_out = x[0:1, :]
    out_ref[0] = (jnp.dot(cls_out, w_lat_ref[...], preferred_element_type=jnp.float32)
                  + b_lat_ref[...]).astype(out_ref.dtype)


def _backbone_kernel(patch_ref, w_patch_ref, b_patch_ref, w_proj_ref, b_proj_ref, out_ref):
    x = patch_ref[0]                                   # (B*HP*WP, 3*P*P)
    h = jnp.maximum(jnp.dot(x, w_patch_ref[0], preferred_element_type=jnp.float32)
                    + b_patch_ref[0], 0.0)
    y = jnp.dot(h, w_proj_ref[...], preferred_element_type=jnp.float32) + b_proj_ref[...]
    out_ref[0] = y.astype(out_ref.dtype)


def _transformer_kernel(src_ref, lat_ref, qp_ref, pos_ref, qe_ref,
                        w_lat_ref, b_lat_ref, w_rob_ref, b_rob_ref,
                        e_w, e_b, e_wo, e_bo, e_ln1, e_wff1, e_bff1, e_wff2, e_bff2, e_ln2,
                        d_sa_w, d_sa_b, d_sa_wo, d_sa_bo,
                        d_ca_w, d_ca_b, d_ca_wo, d_ca_bo,
                        d_ln1, d_ln2, d_ln3, d_wff1, d_bff1, d_wff2, d_bff2,
                        dn_ref, w_head_ref, b_head_ref,
                        out_ref, asm_ref):
    pos = pos_ref[...]                                 # (L_FULL, D)
    latent_tok = jnp.dot(lat_ref[0], w_lat_ref[...],
                         preferred_element_type=jnp.float32) + b_lat_ref[...]
    proprio_tok = jnp.dot(qp_ref[0], w_rob_ref[...],
                          preferred_element_type=jnp.float32) + b_rob_ref[...]
    # token assembly [latent, proprio, image tokens]
    asm_ref[0:1, :] = latent_tok
    asm_ref[1:2, :] = proprio_tok
    asm_ref[2:, :] = src_ref[0]
    x = asm_ref[...]

    enc_refs = (e_w, e_b, e_wo, e_bo, e_ln1, e_wff1, e_bff1, e_wff2, e_bff2, e_ln2)
    for l in range(ENC_LAYERS):
        x = _encoder_layer(x, pos, enc_refs, l)
    memory = x

    query_pos = qe_ref[...]                            # (Nq, D)
    tgt = jnp.zeros((NUM_QUERIES, HIDDEN), jnp.float32)
    dec_refs = (d_sa_w, d_sa_b, d_sa_wo, d_sa_bo, d_ca_w, d_ca_b, d_ca_wo, d_ca_bo,
                d_ln1, d_ln2, d_ln3, d_wff1, d_bff1, d_wff2, d_bff2)
    for l in range(DEC_LAYERS):
        tgt = _decoder_layer(tgt, memory, pos, query_pos, dec_refs, l)

    tgt = _layer_norm(tgt, dn_ref[...])
    head = jnp.dot(tgt, w_head_ref[...], preferred_element_type=jnp.float32) + b_head_ref[...]
    out_ref[0] = head.astype(out_ref.dtype)            # (Nq, 15) = [a_hat | is_pad_hat]


# ----------------------------- cost estimates --------------------------------
def _attn_flops(lq, lk):
    D = HIDDEN
    return 2 * D * D * (lq + 2 * lk) + 4 * lq * lk * D + 2 * lq * D * D


def _enc_layer_flops(L):
    return _attn_flops(L, L) + 4 * L * HIDDEN * DIM_FF


def _dec_layer_flops(lq, lk):
    return _attn_flops(lq, lq) + _attn_flops(lq, lk) + 4 * lq * HIDDEN * DIM_FF


def _cost(ins, out_shape, flops, transcendentals):
    bytes_accessed = 4 * (sum(int(np.prod(x.shape)) for x in ins) + int(np.prod(out_shape)))
    return pl.CostEstimate(flops=int(flops), transcendentals=int(transcendentals),
                           bytes_accessed=int(bytes_accessed))


# ----------------------------- kernel wrappers --------------------------------
def vae_encode_p(params, actions, qpos, mask_bias):
    """Returns latent_info (B, 2*LATENT) = latent_proj(encoder(cls|qpos|actions)[cls])."""
    B = actions.shape[0]
    p = params['vae']
    e = p['enc']
    ins = [actions, qpos[:, None, :], mask_bias,
           p['cls_embed'], p['pos_table'],
           p['w_act'], p['b_act'], p['w_joint'], p['b_joint'],
           e['w_qkv'], e['b_qkv'], e['w_o'], e['b_o'], e['ln1'],
           e['w_ff1'], e['b_ff1'], e['w_ff2'], e['b_ff2'], e['ln2'],
           p['w_latent'], p['b_latent']]
    flops = B * (VAE_ENC_LAYERS * _enc_layer_flops(L_VAE)
                 + 2 * NUM_QUERIES * 14 * HIDDEN + 2 * 14 * HIDDEN + 2 * HIDDEN * 2 * LATENT)
    trans = B * VAE_ENC_LAYERS * NHEAD * L_VAE * L_VAE
    out_shape = (B, 1, 2 * LATENT)
    out = _fused_call(_vae_encoder_kernel, ins, n_batched=3, grid=(B,),
                      out_shape=out_shape,
                      scratch_shapes=[pltpu.VMEM((L_VAE, HIDDEN), jnp.float32)],
                      cost=_cost(ins, out_shape, flops, trans))
    return out[:, 0, :]


def backbone_project_p(params, image):
    """Fused per-camera patch projection + shared 1x1 input_proj -> (B, S_TOKENS, D)."""
    B = image.shape[0]
    x = image.transpose(1, 0, 2, 3, 4).reshape(NUM_CAMS, B, 3, HP, PATCH, WP, PATCH)
    x = x.transpose(0, 1, 3, 5, 2, 4, 6).reshape(NUM_CAMS, B * HP * WP, PATCH_IN)
    bp = params['backbone']
    ins = [x, bp['w_patch'], bp['b_patch'], bp['w_proj'], bp['b_proj']]
    M = B * HP * WP
    flops = NUM_CAMS * (2 * M * PATCH_IN * NUM_CH + 2 * M * NUM_CH * HIDDEN)
    out_shape = (NUM_CAMS, M, HIDDEN)
    out = _fused_call(_backbone_kernel, ins, n_batched=3, grid=(NUM_CAMS,),
                      out_shape=out_shape, cost=_cost(ins, out_shape, flops, 0))
    # "concat along W" token ordering used by DETR (flatten(2): h-major, then cam, then w)
    feat = out.reshape(NUM_CAMS, B, HP, WP, HIDDEN).transpose(1, 2, 0, 3, 4)
    return feat.reshape(B, S_TOKENS, HIDDEN)


def transformer_forward_p(params, src_tokens, latent_sample, qpos, pos_full):
    """Full ACT transformer + heads in one kernel -> (B, Nq, STATE_DIM + 1)."""
    B = src_tokens.shape[0]
    tp = params['transformer']
    e, d = tp['enc'], tp['dec']
    ins = [src_tokens, latent_sample[:, None, :], qpos[:, None, :], pos_full,
           tp['query_embed'],
           tp['w_latent_out'], tp['b_latent_out'], tp['w_robot'], tp['b_robot'],
           e['w_qkv'], e['b_qkv'], e['w_o'], e['b_o'], e['ln1'],
           e['w_ff1'], e['b_ff1'], e['w_ff2'], e['b_ff2'], e['ln2'],
           d['sa_w_qkv'], d['sa_b_qkv'], d['sa_w_o'], d['sa_b_o'],
           d['ca_w_qkv'], d['ca_b_qkv'], d['ca_w_o'], d['ca_b_o'],
           d['ln1'], d['ln2'], d['ln3'],
           d['w_ff1'], d['b_ff1'], d['w_ff2'], d['b_ff2'],
           tp['dec_norm'], tp['w_head'], tp['b_head']]
    flops = B * (ENC_LAYERS * _enc_layer_flops(L_FULL)
                 + DEC_LAYERS * _dec_layer_flops(NUM_QUERIES, L_FULL)
                 + 2 * (LATENT + 14) * HIDDEN
                 + 2 * NUM_QUERIES * HIDDEN * (STATE_DIM + 1))
    trans = B * (ENC_LAYERS * NHEAD * L_FULL * L_FULL
                 + DEC_LAYERS * NHEAD * (NUM_QUERIES * NUM_QUERIES + NUM_QUERIES * L_FULL))
    out_shape = (B, NUM_QUERIES, STATE_DIM + 1)
    return _fused_call(_transformer_kernel, ins, n_batched=3, grid=(B,),
                       out_shape=out_shape,
                       scratch_shapes=[pltpu.VMEM((L_FULL, HIDDEN), jnp.float32)],
                       cost=_cost(ins, out_shape, flops, trans))


# ----------------------------- fixed tables ---------------------------------
def sinusoid_table_np(n_position, d_hid):
    def angle_vec(pos):
        return [pos / np.power(10000, 2 * (j // 2) / d_hid) for j in range(d_hid)]
    tab = np.array([angle_vec(p) for p in range(n_position)], dtype=np.float64)
    tab[:, 0::2] = np.sin(tab[:, 0::2])
    tab[:, 1::2] = np.cos(tab[:, 1::2])
    return tab.astype(np.float32)


def pos2d_embed(hp, wp, d):
    half = d // 2
    ty = sinusoid_table_np(hp, half)
    tx = sinusoid_table_np(wp, half)
    pos = np.concatenate([
        np.broadcast_to(ty[:, None, :], (hp, wp, half)),
        np.broadcast_to(tx[None, :, :], (hp, wp, half)),
    ], axis=-1)
    return jnp.asarray(pos, jnp.float32)                                       # (hp, wp, d)


# ----------------------------- parameter init -------------------------------
def init_params(key):
    D, F = HIDDEN, DIM_FF
    keys = iter(jax.random.split(key, 64))
    rnd = lambda shape: jax.random.normal(next(keys), shape, jnp.float32) * 0.02

    def ln_stack(n):
        return jnp.concatenate([jnp.ones((n, 1, D), jnp.float32),
                                jnp.zeros((n, 1, D), jnp.float32)], axis=1)    # (n, 2, D)

    def enc_stack(n):
        return {'w_qkv': rnd((n, 3, D, D)),
                'b_qkv': jnp.zeros((n, 3, 1, D), jnp.float32),
                'w_o': rnd((n, NHEAD, HEAD_DIM, D)),
                'b_o': jnp.zeros((n, 1, D), jnp.float32),
                'ln1': ln_stack(n),
                'w_ff1': rnd((n, D, F)), 'b_ff1': jnp.zeros((n, 1, F), jnp.float32),
                'w_ff2': rnd((n, F, D)), 'b_ff2': jnp.zeros((n, 1, D), jnp.float32),
                'ln2': ln_stack(n)}

    def dec_stack(n):
        return {'sa_w_qkv': rnd((n, 3, D, D)),
                'sa_b_qkv': jnp.zeros((n, 3, 1, D), jnp.float32),
                'sa_w_o': rnd((n, NHEAD, HEAD_DIM, D)),
                'sa_b_o': jnp.zeros((n, 1, D), jnp.float32),
                'ca_w_qkv': rnd((n, 3, D, D)),
                'ca_b_qkv': jnp.zeros((n, 3, 1, D), jnp.float32),
                'ca_w_o': rnd((n, NHEAD, HEAD_DIM, D)),
                'ca_b_o': jnp.zeros((n, 1, D), jnp.float32),
                'ln1': ln_stack(n), 'ln2': ln_stack(n), 'ln3': ln_stack(n),
                'w_ff1': rnd((n, D, F)), 'b_ff1': jnp.zeros((n, 1, F), jnp.float32),
                'w_ff2': rnd((n, F, D)), 'b_ff2': jnp.zeros((n, 1, D), jnp.float32)}

    # Constant position tokens, hoisted out of the forward (no per-call broadcasts).
    pos2d = pos2d_embed(HP, WP, D)                                   # (HP, WP, D)
    pos_img = jnp.concatenate([pos2d] * NUM_CAMS, axis=1)            # (HP, NUM_CAMS*WP, D)
    pos_img = pos_img.reshape(S_TOKENS, D)

    return {
        'vae': {
            'cls_embed': rnd((1, D)),
            'pos_table': jnp.asarray(sinusoid_table_np(L_VAE, D)),
            'w_act': rnd((14, D)), 'b_act': jnp.zeros((1, D), jnp.float32),
            'w_joint': rnd((14, D)), 'b_joint': jnp.zeros((1, D), jnp.float32),
            'enc': enc_stack(VAE_ENC_LAYERS),
            'w_latent': rnd((D, 2 * LATENT)),
            'b_latent': jnp.zeros((1, 2 * LATENT), jnp.float32),
        },
        'backbone': {
            'w_patch': rnd((NUM_CAMS, PATCH_IN, NUM_CH)),            # per-camera backbone
            'b_patch': jnp.zeros((NUM_CAMS, 1, NUM_CH), jnp.float32),
            'w_proj': rnd((NUM_CH, D)),                              # 1x1 conv as matmul
            'b_proj': jnp.zeros((1, D), jnp.float32),
        },
        'pos_img': pos_img,
        'additional_pos_embed': rnd((2, D)),
        'transformer': {
            'query_embed': rnd((NUM_QUERIES, D)),
            'w_latent_out': rnd((LATENT, D)), 'b_latent_out': jnp.zeros((1, D), jnp.float32),
            'w_robot': rnd((14, D)), 'b_robot': jnp.zeros((1, D), jnp.float32),
            'enc': enc_stack(ENC_LAYERS),
            'dec': dec_stack(DEC_LAYERS),
            'dec_norm': jnp.concatenate([jnp.ones((1, D), jnp.float32),
                                         jnp.zeros((1, D), jnp.float32)], axis=0),
            'w_head': rnd((D, STATE_DIM + 1)),                       # [action_head | is_pad_head]
            'b_head': jnp.zeros((1, STATE_DIM + 1), jnp.float32),
        },
    }


# ----------------------------- DETRVAE forward ------------------------------
def detrvae_forward(params, qpos, image, env_state=None, actions=None, is_pad=None,
                    eps_key=None):
    bs = qpos.shape[0]
    is_training = actions is not None

    if is_training:
        if is_pad is not None:
            full_mask = jnp.concatenate([jnp.zeros((bs, 2), dtype=bool), is_pad], axis=1)
        else:
            full_mask = jnp.zeros((bs, L_VAE), dtype=bool)
        mask_bias = jnp.where(full_mask, -1e9, 0.0).astype(jnp.float32)[:, None, :]
        latent_info = vae_encode_p(params, actions, qpos, mask_bias)           # (B, 2*latent)
        mu = latent_info[:, :LATENT]
        logvar = latent_info[:, LATENT:]
        std = jnp.exp(logvar / 2.0)
        if eps_key is None:
            eps_key = jax.random.PRNGKey(0)
        eps = jax.random.normal(eps_key, std.shape, std.dtype)                 # reparametrize
        latent_sample = mu + std * eps
    else:
        mu = logvar = None
        latent_sample = jnp.zeros((bs, LATENT), jnp.float32)

    # backbone path (self.backbones is not None)
    src_tokens = backbone_project_p(params, image)                             # (B, S, D)
    pos_full = jnp.concatenate([params['additional_pos_embed'], params['pos_img']], axis=0)
    # TODO(synk): audio branch (use_audio/audio_backbone) and backbones=None branch not exercised.

    out = transformer_forward_p(params, src_tokens, latent_sample, qpos, pos_full)
    a_hat = out[..., :STATE_DIM]                                               # (B, nq, 14)
    is_pad_hat = out[..., STATE_DIM:]                                          # (B, nq, 1)
    return a_hat, is_pad_hat, (mu, logvar)


# ----------------------------- main -----------------------------------------
if __name__ == "__main__":
    key = jax.random.PRNGKey(0)
    k_qpos, k_img, k_act, k_param, k_eps = jax.random.split(key, 5)
    B = 2
    qpos = jax.random.normal(k_qpos, (B, 14), jnp.float32)
    image = jax.random.normal(k_img, (B, NUM_CAMS, 3, IMG_H, IMG_W), jnp.float32)
    actions = jax.random.normal(k_act, (B, NUM_QUERIES, 14), jnp.float32)
    is_pad = jnp.zeros((B, NUM_QUERIES), dtype=bool).at[:, -2:].set(True)

    params = init_params(k_param)

    fwd = jax.jit(lambda p, q, im, a, ip, k: detrvae_forward(p, q, im, None, a, ip, k))
    a_hat, is_pad_hat, (mu, logvar) = fwd(params, qpos, image, actions, is_pad, k_eps)
    jax.block_until_ready((a_hat, is_pad_hat, mu, logvar))

    assert a_hat.shape == (B, NUM_QUERIES, STATE_DIM)
    assert is_pad_hat.shape == (B, NUM_QUERIES, 1)
    assert mu.shape == (B, LATENT) and logvar.shape == (B, LATENT)
    assert bool(jnp.all(jnp.isfinite(a_hat)))
    assert bool(jnp.all(jnp.isfinite(is_pad_hat)))
    print("KERNEL_OK")
</pallas_src>

<mosaic_0001>
module attributes {stable_mosaic.version = 11 : i64} {
  func.func @_backbone_kernel(%arg0: i32, %arg1: memref<1x32x48xf32, #tpu.memory_space<vmem>>, %arg2: memref<1x48x8xf32, #tpu.memory_space<vmem>>, %arg3: memref<1x1x8xf32, #tpu.memory_space<vmem>>, %arg4: memref<8x32xf32, #tpu.memory_space<vmem>>, %arg5: memref<1x32xf32, #tpu.memory_space<vmem>>, %arg6: memref<1x32x32xf32, #tpu.memory_space<vmem>>) attributes {dimension_semantics = [#tpu.dimension_semantics<parallel>], iteration_bounds = array<i64: 2>, scalar_prefetch = 0 : i64, scratch_operands = 0 : i64, tpu.core_type = #tpu.core_type<tc>, window_params = [{transform_indices = @transform_0, window_bounds = array<i64: 1, 32, 48>}, {transform_indices = @transform_1, window_bounds = array<i64: 1, 48, 8>}, {transform_indices = @transform_2, window_bounds = array<i64: 1, 1, 8>}, {pipeline_mode = #tpu.pipeline_mode<synchronous>, transform_indices = @transform_3, window_bounds = array<i64: 8, 32>}, {pipeline_mode = #tpu.pipeline_mode<synchronous>, transform_indices = @transform_4, window_bounds = array<i64: 1, 32>}, {transform_indices = @transform_5, window_bounds = array<i64: 1, 32, 32>}]} {
    %c0 = arith.constant 0 : index
    %c0_0 = arith.constant 0 : index
    %c0_1 = arith.constant 0 : index
    %0 = vector.load %arg1[%c0, %c0_0, %c0_1] : memref<1x32x48xf32, #tpu.memory_space<vmem>>, vector<1x32x48xf32>
    %1 = vector.shape_cast %0 : vector<1x32x48xf32> to vector<32x48xf32>
    %c0_2 = arith.constant 0 : index
    %c0_3 = arith.constant 0 : index
    %c0_4 = arith.constant 0 : index
    %2 = vector.load %arg2[%c0_2, %c0_3, %c0_4] : memref<1x48x8xf32, #tpu.memory_space<vmem>>, vector<1x48x8xf32>
    %3 = vector.shape_cast %2 : vector<1x48x8xf32> to vector<48x8xf32>
    %cst = arith.constant dense<0.000000e+00> : vector<32x8xf32>
    %4 = tpu.matmul %1, %3, %cst {dimension_numbers = #tpu.dot_dimension_numbers<[1], [0], [0], [1], [0, 0, 1, 1], [], []>} : vector<32x48xf32>, vector<48x8xf32>, vector<32x8xf32> -> vector<32x8xf32>
    %c0_5 = arith.constant 0 : index
    %c0_6 = arith.constant 0 : index
    %c0_7 = arith.constant 0 : index
    %5 = vector.load %arg3[%c0_5, %c0_6, %c0_7] : memref<1x1x8xf32, #tpu.memory_space<vmem>>, vector<1x1x8xf32>
    %6 = vector.shape_cast %5 : vector<1x1x8xf32> to vector<1x8xf32>
    %7 = vector.broadcast %6 : vector<1x8xf32> to vector<32x8xf32>
    %8 = arith.addf %4, %7 : vector<32x8xf32>
    %cst_8 = arith.constant 0.000000e+00 : f32
    %9 = vector.broadcast %cst_8 : f32 to vector<32x8xf32>
    %10 = arith.maximumf %8, %9 : vector<32x8xf32>
    %c0_9 = arith.constant 0 : index
    %c0_10 = arith.constant 0 : index
    %11 = vector.load %arg4[%c0_9, %c0_10] : memref<8x32xf32, #tpu.memory_space<vmem>>, vector<8x32xf32>
    %cst_11 = arith.constant dense<0.000000e+00> : vector<32x32xf32>
    %12 = tpu.matmul %10, %11, %cst_11 {dimension_numbers = #tpu.dot_dimension_numbers<[1], [0], [0], [1], [0, 0, 1, 1], [], []>} : vector<32x8xf32>, vector<8x32xf32>, vector<32x32xf32> -> vector<32x32xf32>
    %c0_12 = arith.constant 0 : index
    %c0_13 = arith.constant 0 : index
    %13 = vector.load %arg5[%c0_12, %c0_13] : memref<1x32xf32, #tpu.memory_space<vmem>>, vector<1x32xf32>
    %14 = vector.broadcast %13 : vector<1x32xf32> to vector<32x32xf32>
    %15 = arith.addf %12, %14 : vector<32x32xf32>
    %c0_14 = arith.constant 0 : index
    %c0_15 = arith.constant 0 : index
    %c0_16 = arith.constant 0 : index
    %16 = vector.load %arg6[%c0_14, %c0_15, %c0_16] : memref<1x32x32xf32, #tpu.memory_space<vmem>>, vector<1x32x32xf32>
    %17 = vector.shape_cast %16 : vector<1x32x32xf32> to vector<32x32xf32>
    %18 = vector.shape_cast %15 : vector<32x32xf32> to vector<1x32x32xf32>
    tpu.vector_store %arg6[%c0_14, %c0_15, %c0_16], %18 {strides = array<i32>} : memref<1x32x32xf32, #tpu.memory_space<vmem>>, vector<1x32x32xf32>,
    return
  }
  func.func @transform_0(%arg0: i32) -> (i32, i32, i32) {
    %c0_i32 = arith.constant 0 : i32
    %c0_i32_0 = arith.constant 0 : i32
    %c0_i32_1 = arith.constant 0 : i32
    return %arg0, %c0_i32, %c0_i32_0 : i32, i32, i32
  }
  func.func @transform_1(%arg0: i32) -> (i32, i32, i32) {
    %c0_i32 = arith.constant 0 : i32
    %c0_i32_0 = arith.constant 0 : i32
    %c0_i32_1 = arith.constant 0 : i32
    return %arg0, %c0_i32, %c0_i32_0 : i32, i32, i32
  }
  func.func @transform_2(%arg0: i32) -> (i32, i32, i32) {
    %c0_i32 = arith.constant 0 : i32
    %c0_i32_0 = arith.constant 0 : i32
    %c0_i32_1 = arith.constant 0 : i32
    return %arg0, %c0_i32, %c0_i32_0 : i32, i32, i32
  }
  func.func @transform_3(%arg0: i32) -> (i32, i32) {
    %c0_i32 = arith.constant 0 : i32
    %c0_i32_0 = arith.constant 0 : i32
    %c0_i32_1 = arith.constant 0 : i32
    return %c0_i32, %c0_i32_0 : i32, i32
  }
  func.func @transform_4(%arg0: i32) -> (i32, i32) {
    %c0_i32 = arith.constant 0 : i32
    %c0_i32_0 = arith.constant 0 : i32
    %c0_i32_1 = arith.constant 0 : i32
    return %c0_i32, %c0_i32_0 : i32, i32
  }
  func.func @transform_5(%arg0: i32) -> (i32, i32, i32) {
    %c0_i32 = arith.constant 0 : i32
    %c0_i32_0 = arith.constant 0 : i32
    %c0_i32_1 = arith.constant 0 : i32
    return %arg0, %c0_i32, %c0_i32_0 : i32, i32, i32
  }
}

module attributes {stable_mosaic.version = 11 : i64} {
  func.func @_vae_encoder_kernel(%arg0: i32, %arg1: memref<1x8x14xf32, #tpu.memory_space<vmem>>, %arg2: memref<1x1x14xf32, #tpu.memory_space<vmem>>, %arg3: memref<1x1x10xf32, #tpu.memory_space<vmem>>, %arg4: memref<1x32xf32, #tpu.memory_space<vmem>>, %arg5: memref<10x32xf32, #tpu.memory_space<vmem>>, %arg6: memref<14x32xf32, #tpu.memory_space<vmem>>, %arg7: memref<1x32xf32, #tpu.memory_space<vmem>>, %arg8: memref<14x32xf32, #tpu.memory_space<vmem>>, %arg9: memref<1x32xf32, #tpu.memory_space<vmem>>, %arg10: memref<1x3x32x32xf32, #tpu.memory_space<vmem>>, %arg11: memref<1x3x1x32xf32, #tpu.memory_space<vmem>>, %arg12: memref<1x2x16x32xf32, #tpu.memory_space<vmem>>, %arg13: memref<1x1x32xf32, #tpu.memory_space<vmem>>, %arg14: memref<1x2x32xf32, #tpu.memory_space<vmem>>, %arg15: memref<1x32x64xf32, #tpu.memory_space<vmem>>, %arg16: memref<1x1x64xf32, #tpu.memory_space<vmem>>, %arg17: memref<1x64x32xf32, #tpu.memory_space<vmem>>, %arg18: memref<1x1x32xf32, #tpu.memory_space<vmem>>, %arg19: memref<1x2x32xf32, #tpu.memory_space<vmem>>, %arg20: memref<32x64xf32, #tpu.memory_space<vmem>>, %arg21: memref<1x64xf32, #tpu.memory_space<vmem>>, %arg22: memref<1x1x64xf32, #tpu.memory_space<vmem>>, %arg23: memref<10x32xf32, #tpu.memory_space<vmem>>) attributes {dimension_semantics = [#tpu.dimension_semantics<parallel>], iteration_bounds = array<i64: 2>, scalar_prefetch = 0 : i64, scratch_operands = 1 : i64, tpu.core_type = #tpu.core_type<tc>, window_params = [{transform_indices = @transform_0, window_bounds = array<i64: 1, 8, 14>}, {transform_indices = @transform_1, window_bounds = array<i64: 1, 1, 14>}, {transform_indices = @transform_2, window_bounds = array<i64: 1, 1, 10>}, {pipeline_mode = #tpu.pipeline_mode<synchronous>, transform_indices = @transform_3, window_bounds = array<i64: 1, 32>}, {pipeline_mode = #tpu.pipeline_mode<synchronous>, transform_indices = @transform_4, window_bounds = array<i64: 10, 32>}, {pipeline_mode = #tpu.pipeline_mode<synchronous>, transform_indices = @transform_5, window_bounds = array<i64: 14, 32>}, {pipeline_mode = #tpu.pipeline_mode<synchronous>, transform_indices = @transform_6, window_bounds = array<i64: 1, 32>}, {pipeline_mode = #tpu.pipeline_mode<synchronous>, transform_indices = @transform_7, window_bounds = array<i64: 14, 32>}, {pipeline_mode = #tpu.pipeline_mode<synchronous>, transform_indices = @transform_8, window_bounds = array<i64: 1, 32>}, {pipeline_mode = #tpu.pipeline_mode<synchronous>, transform_indices = @transform_9, window_bounds = array<i64: 1, 3, 32, 32>}, {pipeline_mode = #tpu.pipeline_mode<synchronous>, transform_indices = @transform_10, window_bounds = array<i64: 1, 3, 1, 32>}, {pipeline_mode = #tpu.pipeline_mode<synchronous>, transform_indices = @transform_11, window_bounds = array<i64: 1, 2, 16, 32>}, {pipeline_mode = #tpu.pipeline_mode<synchronous>, transform_indices = @transform_12, window_bounds = array<i64: 1, 1, 32>}, {pipeline_mode = #tpu.pipeline_mode<synchronous>, transform_indices = @transform_13, window_bounds = array<i64: 1, 2, 32>}, {pipeline_mode = #tpu.pipeline_mode<synchronous>, transform_indices = @transform_14, window_bounds = array<i64: 1, 32, 64>}, {pipeline_mode = #tpu.pipeline_mode<synchronous>, transform_indices = @transform_15, window_bounds = array<i64: 1, 1, 64>}, {pipeline_mode = #tpu.pipeline_mode<synchronous>, transform_indices = @transform_16, window_bounds = array<i64: 1, 64, 32>}, {pipeline_mode = #tpu.pipeline_mode<synchronous>, transform_indices = @transform_17, window_bounds = array<i64: 1, 1, 32>}, {pipeline_mode = #tpu.pipeline_mode<synchronous>, transform_indices = @transform_18, window_bounds = array<i64: 1, 2, 32>}, {pipeline_mode = #tpu.pipeline_mode<synchronous>, transform_indices = @transform_19, window_bounds = array<i64: 32, 64>}, {pipeline_mode = #tpu.pipeline_mode<synchronous>, transform_indices = @transform_20, window_bounds = array<i64: 1, 64>}, {transform_indices = @transform_21, window_bounds = array<i64: 1, 1, 64>}]} {
    %c0 = arith.constant 0 : index
    %c0_0 = arith.constant 0 : index
    %c0_1 = arith.constant 0 : index
    %0 = vector.load %arg1[%c0, %c0_0, %c0_1] : memref<1x8x14xf32, #tpu.memory_space<vmem>>, vector<1x8x14xf32>
    %1 = vector.shape_cast %0 : vector<1x8x14xf32> to vector<8x14xf32>
    %c0_2 = arith.constant 0 : index
    %c0_3 = arith.constant 0 : index
    %2 = vector.load %arg6[%c0_2, %c0_3] : memref<14x32xf32, #tpu.memory_space<vmem>>, vector<14x32xf32>
    %cst = arith.constant dense<0.000000e+00> : vector<8x32xf32>
    %3 = tpu.matmul %1, %2, %cst {dimension_numbers = #tpu.dot_dimension_numbers<[1], [0], [0], [1], [0, 0, 1, 1], [], []>} : vector<8x14xf32>, vector<14x32xf32>, vector<8x32xf32> -> vector<8x32xf32>
    %c0_4 = arith.constant 0 : index
    %c0_5 = arith.constant 0 : index
    %4 = vector.load %arg7[%c0_4, %c0_5] : memref<1x32xf32, #tpu.memory_space<vmem>>, vector<1x32xf32>
    %5 = vector.broadcast %4 : vector<1x32xf32> to vector<8x32xf32>
    %6 = arith.addf %3, %5 : vector<8x32xf32>
    %c0_6 = arith.constant 0 : index
    %c0_7 = arith.constant 0 : index
    %c0_8 = arith.constant 0 : index
    %7 = vector.load %arg2[%c0_6, %c0_7, %c0_8] : memref<1x1x14xf32, #tpu.memory_space<vmem>>, vector<1x1x14xf32>
    %8 = vector.shape_cast %7 : vector<1x1x14xf32> to vector<1x14xf32>
    %c0_9 = arith.constant 0 : index
    %c0_10 = arith.constant 0 : index
    %9 = vector.load %arg8[%c0_9, %c0_10] : memref<14x32xf32, #tpu.memory_space<vmem>>, vector<14x32xf32>
    %cst_11 = arith.constant dense<0.000000e+00> : vector<1x32xf32>
    %10 = tpu.matmul %8, %9, %cst_11 {dimension_numbers = #tpu.dot_dimension_numbers<[1], [0], [0], [1], [0, 0, 1, 1], [], []>} : vector<1x14xf32>, vector<14x32xf32>, vector<1x32xf32> -> vector<1x32xf32>
    %c0_12 = arith.constant 0 : index
    %c0_13 = arith.constant 0 : index
    %11 = vector.load %arg9[%c0_12, %c0_13] : memref<1x32xf32, #tpu.memory_space<vmem>>, vector<1x32xf32>
    %12 = arith.addf %10, %11 : vector<1x32xf32>
    %c0_14 = arith.constant 0 : index
    %c0_15 = arith.constant 0 : index
    %13 = vector.load %arg4[%c0_14, %c0_15] : memref<1x32xf32, #tpu.memory_space<vmem>>, vector<1x32xf32>
    %c0_16 = arith.constant 0 : index
    %c0_17 = arith.constant 0 : index
    %14 = vector.load %arg23[%c0_16, %c0_17] : memref<10x32xf32, #tpu.memory_space<vmem>>, vector<1x32xf32>
    tpu.vector_store %arg23[%c0_16, %c0_17], %13 {strides = array<i32>} : memref<10x32xf32, #tpu.memory_space<vmem>>, vector<1x32xf32>,
    %c1 = arith.constant 1 : index
    %c0_18 = arith.constant 0 : index
    %15 = vector.load %arg23[%c1, %c0_18] : memref<10x32xf32, #tpu.memory_space<vmem>>, vector<1x32xf32>
    tpu.vector_store %arg23[%c1, %c0_18], %12 {strides = array<i32>} : memref<10x32xf32, #tpu.memory_space<vmem>>, vector<1x32xf32>,
    %c2 = arith.constant 2 : index
    %c0_19 = arith.constant 0 : index
    %16 = vector.load %arg23[%c2, %c0_19] : memref<10x32xf32, #tpu.memory_space<vmem>>, vector<8x32xf32>
    tpu.vector_store %arg23[%c2, %c0_19], %6 {strides = array<i32>} : memref<10x32xf32, #tpu.memory_space<vmem>>, vector<8x32xf32>,
    %c0_20 = arith.constant 0 : index
    %c0_21 = arith.constant 0 : index
    %17 = vector.load %arg23[%c0_20, %c0_21] : memref<10x32xf32, #tpu.memory_space<vmem>>, vector<10x32xf32>
    %c0_22 = arith.constant 0 : index
    %c0_23 = arith.constant 0 : index
    %18 = vector.load %arg5[%c0_22, %c0_23] : memref<10x32xf32, #tpu.memory_space<vmem>>, vector<10x32xf32>
    %c0_24 = arith.constant 0 : index
    %c0_25 = arith.constant 0 : index
    %c0_26 = arith.constant 0 : index
    %19 = vector.load %arg3[%c0_24, %c0_25, %c0_26] : memref<1x1x10xf32, #tpu.memory_space<vmem>>, vector<1x1x10xf32>
    %20 = vector.shape_cast %19 : vector<1x1x10xf32> to vector<1x10xf32>
    %21 = arith.addf %17, %18 : vector<10x32xf32>
    %c0_27 = arith.constant 0 : index
    %c0_28 = arith.constant 0 : index
    %c0_29 = arith.constant 0 : index
    %c0_30 = arith.constant 0 : index
    %22 = vector.load %arg10[%c0_27, %c0_28, %c0_29, %c0_30] : memref<1x3x32x32xf32, #tpu.memory_space<vmem>>, vector<1x1x32x32xf32>
    %23 = vector.shape_cast %22 : vector<1x1x32x32xf32> to vector<32x32xf32>
    %cst_31 = arith.constant dense<0.000000e+00> : vector<10x32xf32>
    %24 = tpu.matmul %21, %23, %cst_31 {dimension_numbers = #tpu.dot_dimension_numbers<[1], [0], [0], [1], [0, 0, 1, 1], [], []>} : vector<10x32xf32>, vector<32x32xf32>, vector<10x32xf32> -> vector<10x32xf32>
    %c0_32 = arith.constant 0 : index
    %c0_33 = arith.constant 0 : index
    %c0_34 = arith.constant 0 : index
    %c0_35 = arith.constant 0 : index
    %25 = vector.load %arg11[%c0_32, %c0_33, %c0_34, %c0_35] : memref<1x3x1x32xf32, #tpu.memory_space<vmem>>, vector<1x1x1x32xf32>
    %26 = vector.shape_cast %25 : vector<1x1x1x32xf32> to vector<1x32xf32>
    %27 = vector.broadcast %26 : vector<1x32xf32> to vector<10x32xf32>
    %28 = arith.addf %24, %27 : vector<10x32xf32>
    %c0_36 = arith.constant 0 : index
    %c1_37 = arith.constant 1 : index
    %c0_38 = arith.constant 0 : index
    %c0_39 = arith.constant 0 : index
    %29 = vector.load %arg10[%c0_36, %c1_37, %c0_38, %c0_39] : memref<1x3x32x32xf32, #tpu.memory_space<vmem>>, vector<1x1x32x32xf32>
    %30 = vector.shape_cast %29 : vector<1x1x32x32xf32> to vector<32x32xf32>
    %cst_40 = arith.constant dense<0.000000e+00> : vector<10x32xf32>
    %31 = tpu.matmul %21, %30, %cst_40 {dimension_numbers = #tpu.dot_dimension_numbers<[1], [0], [0], [1], [0, 0, 1, 1], [], []>} : vector<10x32xf32>, vector<32x32xf32>, vector<10x32xf32> -> vector<10x32xf32>
    %c0_41 = arith.constant 0 : index
    %c1_42 = arith.constant 1 : index
    %c0_43 = arith.constant 0 : index
    %c0_44 = arith.constant 0 : index
    %32 = vector.load %arg11[%c0_41, %c1_42, %c0_43, %c0_44] : memref<1x3x1x32xf32, #tpu.memory_space<vmem>>, vector<1x1x1x32xf32>
    %33 = vector.shape_cast %32 : vector<1x1x1x32xf32> to vector<1x32xf32>
    %34 = vector.broadcast %33 : vector<1x32xf32> to vector<10x32xf32>
    %35 = arith.addf %31, %34 : vector<10x32xf32>
    %c0_45 = arith.constant 0 : index
    %c2_46 = arith.constant 2 : index
    %c0_47 = arith.constant 0 : index
    %c0_48 = arith.constant 0 : index
    %36 = vector.load %arg10[%c0_45, %c2_46, %c0_47, %c0_48] : memref<1x3x32x32xf32, #tpu.memory_space<vmem>>, vector<1x1x32x32xf32>
    %37 = vector.shape_cast %36 : vector<1x1x32x32xf32> to vector<32x32xf32>
    %cst_49 = arith.constant dense<0.000000e+00> : vector<10x32xf32>
    %38 = tpu.matmul %17, %37, %cst_49 {dimension_numbers = #tpu.dot_dimension_numbers<[1], [0], [0], [1], [0, 0, 1, 1], [], []>} : vector<10x32xf32>, vector<32x32xf32>, vector<10x32xf32> -> vector<10x32xf32>
    %c0_50 = arith.constant 0 : index
    %c2_51 = arith.constant 2 : index
    %c0_52 = arith.constant 0 : index
    %c0_53 = arith.constant 0 : index
    %39 = vector.load %arg11[%c0_50, %c2_51, %c0_52, %c0_53] : memref<1x3x1x32xf32, #tpu.memory_space<vmem>>, vector<1x1x1x32xf32>
    %40 = vector.shape_cast %39 : vector<1x1x1x32xf32> to vector<1x32xf32>
    %41 = vector.broadcast %40 : vector<1x32xf32> to vector<10x32xf32>
    %42 = arith.addf %38, %41 : vector<10x32xf32>
    %c0_54 = arith.constant 0 : index
    %c0_55 = arith.constant 0 : index
    %c0_56 = arith.constant 0 : index
    %43 = vector.load %arg13[%c0_54, %c0_55, %c0_56] : memref<1x1x32xf32, #tpu.memory_space<vmem>>, vector<1x1x32xf32>
    %44 = vector.shape_cast %43 : vector<1x1x32xf32> to vector<1x32xf32>
    %45 = vector.extract_strided_slice %28 {offsets = [0, 0], sizes = [10, 16], strides = [1, 1]} : vector<10x32xf32> to vector<10x16xf32>
    %46 = vector.extract_strided_slice %35 {offsets = [0, 0], sizes = [10, 16], strides = [1, 1]} : vector<10x32xf32> to vector<10x16xf32>
    %cst_57 = arith.constant dense<0.000000e+00> : vector<10x10xf32>
    %47 = tpu.matmul %45, %46, %cst_57 {dimension_numbers = #tpu.dot_dimension_numbers<[1], [1], [0], [0], [0, 0, 1, 0], [], []>} : vector<10x16xf32>, vector<10x16xf32>, vector<10x10xf32> -> vector<10x10xf32>
    %cst_58 = arith.constant 2.500000e-01 : f32
    %48 = vector.broadcast %cst_58 : f32 to vector<10x10xf32>
    %49 = arith.mulf %47, %48 : vector<10x10xf32>
    %50 = vector.broadcast %20 : vector<1x10xf32> to vector<10x10xf32>
    %51 = arith.addf %49, %50 : vector<10x10xf32>
    %cst_59 = arith.constant dense<0xFF800000> : vector<10xf32>
    %52 = vector.multi_reduction <maximumf>, %51, %cst_59 [1] : vector<10x10xf32> to vector<10xf32>
    %53 = vector.shape_cast %52 : vector<10xf32> to vector<10x1xf32>
    %54 = vector.broadcast %53 : vector<10x1xf32> to vector<10x10xf32>
    %55 = arith.subf %51, %54 : vector<10x10xf32>
    %56 = math.exp %55 : vector<10x10xf32>
    %cst_60 = arith.constant dense<0.000000e+00> : vector<10xf32>
    %57 = vector.multi_reduction <add>, %56, %cst_60 [1] : vector<10x10xf32> to vector<10xf32>
    %58 = vector.shape_cast %57 : vector<10xf32> to vector<10x1xf32>
    %59 = vector.broadcast %58 : vector<10x1xf32> to vector<10x10xf32>
    %60 = arith.divf %56, %59 : vector<10x10xf32>
    %61 = vector.extract_strided_slice %42 {offsets = [0, 0], sizes = [10, 16], strides = [1, 1]} : vector<10x32xf32> to vector<10x16xf32>
    %cst_61 = arith.constant dense<0.000000e+00> : vector<10x16xf32>
    %62 = tpu.matmul %60, %61, %cst_61 {dimension_numbers = #tpu.dot_dimension_numbers<[1], [0], [0], [1], [0, 0, 1, 1], [], []>} : vector<10x10xf32>, vector<10x16xf32>, vector<10x16xf32> -> vector<10x16xf32>
    %c0_62 = arith.constant 0 : index
    %c0_63 = arith.constant 0 : index
    %c0_64 = arith.constant 0 : index
    %c0_65 = arith.constant 0 : index
    %63 = vector.load %arg12[%c0_62, %c0_63, %c0_64, %c0_65] : memref<1x2x16x32xf32, #tpu.memory_space<vmem>>, vector<1x1x16x32xf32>
    %64 = vector.shape_cast %63 : vector<1x1x16x32xf32> to vector<16x32xf32>
    %cst_66 = arith.constant dense<0.000000e+00> : vector<10x32xf32>
    %65 = tpu.matmul %62, %64, %cst_66 {dimension_numbers = #tpu.dot_dimension_numbers<[1], [0], [0], [1], [0, 0, 1, 1], [], []>} : vector<10x16xf32>, vector<16x32xf32>, vector<10x32xf32> -> vector<10x32xf32>
    %66 = vector.broadcast %44 : vector<1x32xf32> to vector<10x32xf32>
    %67 = arith.addf %66, %65 : vector<10x32xf32>
    %68 = vector.extract_strided_slice %28 {offsets = [0, 16], sizes = [10, 16], strides = [1, 1]} : vector<10x32xf32> to vector<10x16xf32>
    %69 = vector.extract_strided_slice %35 {offsets = [0, 16], sizes = [10, 16], strides = [1, 1]} : vector<10x32xf32> to vector<10x16xf32>
    %cst_67 = arith.constant dense<0.000000e+00> : vector<10x10xf32>
    %70 = tpu.matmul %68, %69, %cst_67 {dimension_numbers = #tpu.dot_dimension_numbers<[1], [1], [0], [0], [0, 0, 1, 0], [], []>} : vector<10x16xf32>, vector<10x16xf32>, vector<10x10xf32> -> vector<10x10xf32>
    %cst_68 = arith.constant 2.500000e-01 : f32
    %71 = vector.broadcast %cst_68 : f32 to vector<10x10xf32>
    %72 = arith.mulf %70, %71 : vector<10x10xf32>
    %73 = vector.broadcast %20 : vector<1x10xf32> to vector<10x10xf32>
    %74 = arith.addf %72, %73 : vector<10x10xf32>
    %cst_69 = arith.constant dense<0xFF800000> : vector<10xf32>
    %75 = vector.multi_reduction <maximumf>, %74, %cst_69 [1] : vector<10x10xf32> to vector<10xf32>
    %76 = vector.shape_cast %75 : vector<10xf32> to vector<10x1xf32>
    %77 = vector.broadcast %76 : vector<10x1xf32> to vector<10x10xf32>
    %78 = arith.subf %74, %77 : vector<10x10xf32>
    %79 = math.exp %78 : vector<10x10xf32>
    %cst_70 = arith.constant dense<0.000000e+00> : vector<10xf32>
    %80 = vector.multi_reduction <add>, %79, %cst_70 [1] : vector<10x10xf32> to vector<10xf32>
    %81 = vector.shape_cast %80 : vector<10xf32> to vector<10x1xf32>
    %82 = vector.broadcast %81 : vector<10x1xf32> to vector<10x10xf32>
    %83 = arith.divf %79, %82 : vector<10x10xf32>
    %84 = vector.extract_strided_slice %42 {offsets = [0, 16], sizes = [10, 16], strides = [1, 1]} : vector<10x32xf32> to vector<10x16xf32>
    %cst_71 = arith.constant dense<0.000000e+00> : vector<10x16xf32>
    %85 = tpu.matmul %83, %84, %cst_71 {dimension_numbers = #tpu.dot_dimension_numbers<[1], [0], [0], [1], [0, 0, 1, 1], [], []>} : vector<10x10xf32>, vector<10x16xf32>, vector<10x16xf32> -> vector<10x16xf32>
    %c0_72 = arith.constant 0 : index
    %c1_73 = arith.constant 1 : index
    %c0_74 = arith.constant 0 : index
    %c0_75 = arith.constant 0 : index
    %86 = vector.load %arg12[%c0_72, %c1_73, %c0_74, %c0_75] : memref<1x2x16x32xf32, #tpu.memory_space<vmem>>, vector<1x1x16x32xf32>
    %87 = vector.shape_cast %86 : vector<1x1x16x32xf32> to vector<16x32xf32>
    %cst_76 = arith.constant dense<0.000000e+00> : vector<10x32xf32>
    %88 = tpu.matmul %85, %87, %cst_76 {dimension_numbers = #tpu.dot_dimension_numbers<[1], [0], [0], [1], [0, 0, 1, 1], [], []>} : vector<10x16xf32>, vector<16x32xf32>, vector<10x32xf32> -> vector<10x32xf32>
    %89 = arith.addf %67, %88 : vector<10x32xf32>
    %90 = arith.addf %17, %89 : vector<10x32xf32>
    %c0_77 = arith.constant 0 : index
    %c0_78 = arith.constant 0 : index
    %c0_79 = arith.constant 0 : index
    %91 = vector.load %arg14[%c0_77, %c0_78, %c0_79] : memref<1x2x32xf32, #tpu.memory_space<vmem>>, vector<1x2x32xf32>
    %92 = vector.shape_cast %91 : vector<1x2x32xf32> to vector<2x32xf32>
    %93 = vector.extract_strided_slice %92 {offsets = [0, 0], sizes = [1, 32], strides = [1, 1]} : vector<2x32xf32> to vector<1x32xf32>
    %94 = vector.extract_strided_slice %92 {offsets = [1, 0], sizes = [1, 32], strides = [1, 1]} : vector<2x32xf32> to vector<1x32xf32>
    %cst_80 = arith.constant dense<0.000000e+00> : vector<10xf32>
    %95 = vector.multi_reduction <add>, %90, %cst_80 [1] : vector<10x32xf32> to vector<10xf32>
    %96 = vector.shape_cast %95 : vector<10xf32> to vector<10x1xf32>
    %cst_81 = arith.constant 3.200000e+01 : f32
    %97 = vector.broadcast %cst_81 : f32 to vector<10x1xf32>
    %98 = arith.divf %96, %97 : vector<10x1xf32>
    %99 = vector.broadcast %98 : vector<10x1xf32> to vector<10x32xf32>
    %100 = arith.subf %90, %99 : vector<10x32xf32>
    %101 = arith.mulf %100, %100 : vector<10x32xf32>
    %cst_82 = arith.constant dense<0.000000e+00> : vector<10xf32>
    %102 = vector.multi_reduction <add>, %101, %cst_82 [1] : vector<10x32xf32> to vector<10xf32>
    %103 = vector.shape_cast %102 : vector<10xf32> to vector<10x1xf32>
    %cst_83 = arith.constant 3.200000e+01 : f32
    %104 = vector.broadcast %cst_83 : f32 to vector<10x1xf32>
    %105 = arith.divf %103, %104 : vector<10x1xf32>
    %cst_84 = arith.constant 9.99999974E-6 : f32
    %106 = vector.broadcast %cst_84 : f32 to vector<10x1xf32>
    %107 = arith.addf %105, %106 : vector<10x1xf32>
    %108 = math.rsqrt %107 : vector<10x1xf32>
    %109 = vector.broadcast %108 : vector<10x1xf32> to vector<10x32xf32>
    %110 = arith.mulf %100, %109 : vector<10x32xf32>
    %111 = vector.broadcast %93 : vector<1x32xf32> to vector<10x32xf32>
    %112 = arith.mulf %110, %111 : vector<10x32xf32>
    %113 = vector.broadcast %94 : vector<1x32xf32> to vector<10x32xf32>
    %114 = arith.addf %112, %113 : vector<10x32xf32>
    %c0_85 = arith.constant 0 : index
    %c0_86 = arith.constant 0 : index
    %c0_87 = arith.constant 0 : index
    %115 = vector.load %arg15[%c0_85, %c0_86, %c0_87] : memref<1x32x64xf32, #tpu.memory_space<vmem>>, vector<1x32x64xf32>
    %116 = vector.shape_cast %115 : vector<1x32x64xf32> to vector<32x64xf32>
    %cst_88 = arith.constant dense<0.000000e+00> : vector<10x64xf32>
    %117 = tpu.matmul %114, %116, %cst_88 {dimension_numbers = #tpu.dot_dimension_numbers<[1], [0], [0], [1], [0, 0, 1, 1], [], []>} : vector<10x32xf32>, vector<32x64xf32>, vector<10x64xf32> -> vector<10x64xf32>
    %c0_89 = arith.constant 0 : index
    %c0_90 = arith.constant 0 : index
    %c0_91 = arith.constant 0 : index
    %118 = vector.load %arg16[%c0_89, %c0_90, %c0_91] : memref<1x1x64xf32, #tpu.memory_space<vmem>>, vector<1x1x64xf32>
    %119 = vector.shape_cast %118 : vector<1x1x64xf32> to vector<1x64xf32>
    %120 = vector.broadcast %119 : vector<1x64xf32> to vector<10x64xf32>
    %121 = arith.addf %117, %120 : vector<10x64xf32>
    %cst_92 = arith.constant 0.000000e+00 : f32
    %122 = vector.broadcast %cst_92 : f32 to vector<10x64xf32>
    %123 = arith.maximumf %121, %122 : vector<10x64xf32>
    %c0_93 = arith.constant 0 : index
    %c0_94 = arith.constant 0 : index
    %c0_95 = arith.constant 0 : index
    %124 = vector.load %arg17[%c0_93, %c0_94, %c0_95] : memref<1x64x32xf32, #tpu.memory_space<vmem>>, vector<1x64x32xf32>
    %125 = vector.shape_cast %124 : vector<1x64x32xf32> to vector<64x32xf32>
    %cst_96 = arith.constant dense<0.000000e+00> : vector<10x32xf32>
    %126 = tpu.matmul %123, %125, %cst_96 {dimension_numbers = #tpu.dot_dimension_numbers<[1], [0], [0], [1], [0, 0, 1, 1], [], []>} : vector<10x64xf32>, vector<64x32xf32>, vector<10x32xf32> -> vector<10x32xf32>
    %c0_97 = arith.constant 0 : index
    %c0_98 = arith.constant 0 : index
    %c0_99 = arith.constant 0 : index
    %127 = vector.load %arg18[%c0_97, %c0_98, %c0_99] : memref<1x1x32xf32, #tpu.memory_space<vmem>>, vector<1x1x32xf32>
    %128 = vector.shape_cast %127 : vector<1x1x32xf32> to vector<1x32xf32>
    %129 = vector.broadcast %128 : vector<1x32xf32> to vector<10x32xf32>
    %130 = arith.addf %126, %129 : vector<10x32xf32>
    %131 = arith.addf %114, %130 : vector<10x32xf32>
    %c0_100 = arith.constant 0 : index
    %c0_101 = arith.constant 0 : index
    %c0_102 = arith.constant 0 : index
    %132 = vector.load %arg19[%c0_100, %c0_101, %c0_102] : memref<1x2x32xf32, #tpu.memory_space<vmem>>, vector<1x2x32xf32>
    %133 = vector.shape_cast %132 : vector<1x2x32xf32> to vector<2x32xf32>
    %134 = vector.extract_strided_slice %133 {offsets = [0, 0], sizes = [1, 32], strides = [1, 1]} : vector<2x32xf32> to vector<1x32xf32>
    %135 = vector.extract_strided_slice %133 {offsets = [1, 0], sizes = [1, 32], strides = [1, 1]} : vector<2x32xf32> to vector<1x32xf32>
    %cst_103 = arith.constant dense<0.000000e+00> : vector<10xf32>
    %136 = vector.multi_reduction <add>, %131, %cst_103 [1] : vector<10x32xf32> to vector<10xf32>
    %137 = vector.shape_cast %136 : vector<10xf32> to vector<10x1xf32>
    %cst_104 = arith.constant 3.200000e+01 : f32
    %138 = vector.broadcast %cst_104 : f32 to vector<10x1xf32>
    %139 = arith.divf %137, %138 : vector<10x1xf32>
    %140 = vector.broadcast %139 : vector<10x1xf32> to vector<10x32xf32>
    %141 = arith.subf %131, %140 : vector<10x32xf32>
    %142 = arith.mulf %141, %141 : vector<10x32xf32>
    %cst_105 = arith.constant dense<0.000000e+00> : vector<10xf32>
    %143 = vector.multi_reduction <add>, %142, %cst_105 [1] : vector<10x32xf32> to vector<10xf32>
    %144 = vector.shape_cast %143 : vector<10xf32> to vector<10x1xf32>
    %cst_106 = arith.constant 3.200000e+01 : f32
    %145 = vector.broadcast %cst_106 : f32 to vector<10x1xf32>
    %146 = arith.divf %144, %145 : vector<10x1xf32>
    %cst_107 = arith.constant 9.99999974E-6 : f32
    %147 = vector.broadcast %cst_107 : f32 to vector<10x1xf32>
    %148 = arith.addf %146, %147 : vector<10x1xf32>
    %149 = math.rsqrt %148 : vector<10x1xf32>
    %150 = vector.broadcast %149 : vector<10x1xf32> to vector<10x32xf32>
    %151 = arith.mulf %141, %150 : vector<10x32xf32>
    %152 = vector.broadcast %134 : vector<1x32xf32> to vector<10x32xf32>
    %153 = arith.mulf %151, %152 : vector<10x32xf32>
    %154 = vector.broadcast %135 : vector<1x32xf32> to vector<10x32xf32>
    %155 = arith.addf %153, %154 : vector<10x32xf32>
    %156 = vector.extract_strided_slice %155 {offsets = [0, 0], sizes = [1, 32], strides = [1, 1]} : vector<10x32xf32> to vector<1x32xf32>
    %c0_108 = arith.constant 0 : index
    %c0_109 = arith.constant 0 : index
    %157 = vector.load %arg20[%c0_108, %c0_109] : memref<32x64xf32, #tpu.memory_space<vmem>>, vector<32x64xf32>
    %cst_110 = arith.constant dense<0.000000e+00> : vector<1x64xf32>
    %158 = tpu.matmul %156, %157, %cst_110 {dimension_numbers = #tpu.dot_dimension_numbers<[1], [0], [0], [1], [0, 0, 1, 1], [], []>} : vector<1x32xf32>, vector<32x64xf32>, vector<1x64xf32> -> vector<1x64xf32>
    %c0_111 = arith.constant 0 : index
    %c0_112 = arith.constant 0 : index
    %159 = vector.load %arg21[%c0_111, %c0_112] : memref<1x64xf32, #tpu.memory_space<vmem>>, vector<1x64xf32>
    %160 = arith.addf %158, %159 : vector<1x64xf32>
    %c0_113 = arith.constant 0 : index
    %c0_114 = arith.constant 0 : index
    %c0_115 = arith.constant 0 : index
    %161 = vector.load %arg22[%c0_113, %c0_114, %c0_115] : memref<1x1x64xf32, #tpu.memory_space<vmem>>, vector<1x1x64xf32>
    %162 = vector.shape_cast %161 : vector<1x1x64xf32> to vector<1x64xf32>
    %163 = vector.shape_cast %160 : vector<1x64xf32> to vector<1x1x64xf32>
    tpu.vector_store %arg22[%c0_113, %c0_114, %c0_115], %163 {strides = array<i32>} : memref<1x1x64xf32, #tpu.memory_space<vmem>>, vector<1x1x64xf32>,
    return
  }
  func.func @transform_0(%arg0: i32) -> (i32, i32, i32) {
    %c0_i32 = arith.constant 0 : i32
    %c0_i32_0 = arith.constant 0 : i32
    %c0_i32_1 = arith.constant 0 : i32
    return %arg0, %c0_i32, %c0_i32_0 : i32, i32, i32
  }
  func.func @transform_1(%arg0: i32) -> (i32, i32, i32) {
    %c0_i32 = arith.constant 0 : i32
    %c0_i32_0 = arith.constant 0 : i32
    %c0_i32_1 = arith.constant 0 : i32
    return %arg0, %c0_i32, %c0_i32_0 : i32, i32, i32
  }
  func.func @transform_2(%arg0: i32) -> (i32, i32, i32) {
    %c0_i32 = arith.constant 0 : i32
    %c0_i32_0 = arith.constant 0 : i32
    %c0_i32_1 = arith.constant 0 : i32
    return %arg0, %c0_i32, %c0_i32_0 : i32, i32, i32
  }
  func.func @transform_3(%arg0: i32) -> (i32, i32) {
    %c0_i32 = arith.constant 0 : i32
    %c0_i32_0 = arith.constant 0 : i32
    %c0_i32_1 = arith.constant 0 : i32
    return %c0_i32, %c0_i32_0 : i32, i32
  }
  func.func @transform_4(%arg0: i32) -> (i32, i32) {
    %c0_i32 = arith.constant 0 : i32
    %c0_i32_0 = arith.constant 0 : i32
    %c0_i32_1 = arith.constant 0 : i32
    return %c0_i32, %c0_i32_0 : i32, i32
  }
  func.func @transform_5(%arg0: i32) -> (i32, i32) {
    %c0_i32 = arith.constant 0 : i32
    %c0_i32_0 = arith.constant 0 : i32
    %c0_i32_1 = arith.constant 0 : i32
    return %c0_i32, %c0_i32_0 : i32, i32
  }
  func.func @transform_6(%arg0: i32) -> (i32, i32) {
    %c0_i32 = arith.constant 0 : i32
    %c0_i32_0 = arith.constant 0 : i32
    %c0_i32_1 = arith.constant 0 : i32
    return %c0_i32, %c0_i32_0 : i32, i32
  }
  func.func @transform_7(%arg0: i32) -> (i32, i32) {
    %c0_i32 = arith.constant 0 : i32
    %c0_i32_0 = arith.constant 0 : i32
    %c0_i32_1 = arith.constant 0 : i32
    return %c0_i32, %c0_i32_0 : i32, i32
  }
  func.func @transform_8(%arg0: i32) -> (i32, i32) {
    %c0_i32 = arith.constant 0 : i32
    %c0_i32_0 = arith.constant 0 : i32
    %c0_i32_1 = arith.constant 0 : i32
    return %c0_i32, %c0_i32_0 : i32, i32
  }
  func.func @transform_9(%arg0: i32) -> (i32, i32, i32, i32) {
    %c0_i32 = arith.constant 0 : i32
    %c0_i32_0 = arith.constant 0 : i32
    %c0_i32_1 = arith.constant 0 : i32
    %c0_i32_2 = arith.constant 0 : i32
    %c0_i32_3 = arith.constant 0 : i32
    return %c0_i32, %c0_i32_0, %c0_i32_1, %c0_i32_2 : i32, i32, i32, i32
  }
  func.func @transform_10(%arg0: i32) -> (i32, i32, i32, i32) {
    %c0_i32 = arith.constant 0 : i32
    %c0_i32_0 = arith.constant 0 : i32
    %c0_i32_1 = arith.constant 0 : i32
    %c0_i32_2 = arith.constant 0 : i32
    %c0_i32_3 = arith.constant 0 : i32
    return %c0_i32, %c0_i32_0, %c0_i32_1, %c0_i32_2 : i32, i32, i32, i32
  }
  func.func @transform_11(%arg0: i32) -> (i32, i32, i32, i32) {
    %c0_i32 = arith.constant 0 : i32
    %c0_i32_0 = arith.constant 0 : i32
    %c0_i32_1 = arith.constant 0 : i32
    %c0_i32_2 = arith.constant 0 : i32
    %c0_i32_3 = arith.constant 0 : i32
    return %c0_i32, %c0_i32_0, %c0_i32_1, %c0_i32_2 : i32, i32, i32, i32
  }
  func.func @transform_12(%arg0: i32) -> (i32, i32, i32) {
    %c0_i32 = arith.constant 0 : i32
    %c0_i32_0 = arith.constant 0 : i32
    %c0_i32_1 = arith.constant 0 : i32
    %c0_i32_2 = arith.constant 0 : i32
    return %c0_i32, %c0_i32_0, %c0_i32_1 : i32, i32, i32
  }
  func.func @transform_13(%arg0: i32) -> (i32, i32, i32) {
    %c0_i32 = arith.constant 0 : i32
    %c0_i32_0 = arith.constant 0 : i32
    %c0_i32_1 = arith.constant 0 : i32
    %c0_i32_2 = arith.constant 0 : i32
    return %c0_i32, %c0_i32_0, %c0_i32_1 : i32, i32, i32
  }
  func.func @transform_14(%arg0: i32) -> (i32, i32, i32) {
    %c0_i32 = arith.constant 0 : i32
    %c0_i32_0 = arith.constant 0 : i32
    %c0_i32_1 = arith.constant 0 : i32
    %c0_i32_2 = arith.constant 0 : i32
    return %c0_i32, %c0_i32_0, %c0_i32_1 : i32, i32, i32
  }
  func.func @transform_15(%arg0: i32) -> (i32, i32, i32) {
    %c0_i32 = arith.constant 0 : i32
    %c0_i32_0 = arith.constant 0 : i32
    %c0_i32_1 = arith.constant 0 : i32
    %c0_i32_2 = arith.constant 0 : i32
    return %c0_i32, %c0_i32_0, %c0_i32_1 : i32, i32, i32
  }
  func.func @transform_16(%arg0: i32) -> (i32, i32, i32) {
    %c0_i32 = arith.constant 0 : i32
    %c0_i32_0 = arith.constant 0 : i32
    %c0_i32_1 = arith.constant 0 : i32
    %c0_i32_2 = arith.constant 0 : i32
    return %c0_i32, %c0_i32_0, %c0_i32_1 : i32, i32, i32
  }
  func.func @transform_17(%arg0: i32) -> (i32, i32, i32) {
    %c0_i32 = arith.constant 0 : i32
    %c0_i32_0 = arith.constant 0 : i32
    %c0_i32_1 = arith.constant 0 : i32
    %c0_i32_2 = arith.constant 0 : i32
    return %c0_i32, %c0_i32_0, %c0_i32_1 : i32, i32, i32
  }
  func.func @transform_18(%arg0: i32) -> (i32, i32, i32) {
    %c0_i32 = arith.constant 0 : i32
    %c0_i32_0 = arith.constant 0 : i32
    %c0_i32_1 = arith.constant 0 : i32
    %c0_i32_2 = arith.constant 0 : i32
    return %c0_i32, %c0_i32_0, %c0_i32_1 : i32, i32, i32
  }
  func.func @transform_19(%arg0: i32) -> (i32, i32) {
    %c0_i32 = arith.constant 0 : i32
    %c0_i32_0 = arith.constant 0 : i32
    %c0_i32_1 = arith.constant 0 : i32
    return %c0_i32, %c0_i32_0 : i32, i32
  }
  func.func @transform_20(%arg0: i32) -> (i32, i32) {
    %c0_i32 = arith.constant 0 : i32
    %c0_i32_0 = arith.constant 0 : i32
    %c0_i32_1 = arith.constant 0 : i32
    return %c0_i32, %c0_i32_0 : i32, i32
  }
  func.func @transform_21(%arg0: i32) -> (i32, i32, i32) {
    %c0_i32 = arith.constant 0 : i32
    %c0_i32_0 = arith.constant 0 : i32
    %c0_i32_1 = arith.constant 0 : i32
    return %arg0, %c0_i32, %c0_i32_0 : i32, i32, i32
  }
}

module attributes {stable_mosaic.version = 11 : i64} {
  func.func @_transformer_kernel(%arg0: i32, %arg1: memref<1x32x32xf32, #tpu.memory_space<vmem>>, %arg2: memref<1x1x32xf32, #tpu.memory_space<vmem>>, %arg3: memref<1x1x14xf32, #tpu.memory_space<vmem>>, %arg4: memref<34x32xf32, #tpu.memory_space<vmem>>, %arg5: memref<8x32xf32, #tpu.memory_space<vmem>>, %arg6: memref<32x32xf32, #tpu.memory_space<vmem>>, %arg7: memref<1x32xf32, #tpu.memory_space<vmem>>, %arg8: memref<14x32xf32, #tpu.memory_space<vmem>>, %arg9: memref<1x32xf32, #tpu.memory_space<vmem>>, %arg10: memref<1x3x32x32xf32, #tpu.memory_space<vmem>>, %arg11: memref<1x3x1x32xf32, #tpu.memory_space<vmem>>, %arg12: memref<1x2x16x32xf32, #tpu.memory_space<vmem>>, %arg13: memref<1x1x32xf32, #tpu.memory_space<vmem>>, %arg14: memref<1x2x32xf32, #tpu.memory_space<vmem>>, %arg15: memref<1x32x64xf32, #tpu.memory_space<vmem>>, %arg16: memref<1x1x64xf32, #tpu.memory_space<vmem>>, %arg17: memref<1x64x32xf32, #tpu.memory_space<vmem>>, %arg18: memref<1x1x32xf32, #tpu.memory_space<vmem>>, %arg19: memref<1x2x32xf32, #tpu.memory_space<vmem>>, %arg20: memref<1x3x32x32xf32, #tpu.memory_space<vmem>>, %arg21: memref<1x3x1x32xf32, #tpu.memory_space<vmem>>, %arg22: memref<1x2x16x32xf32, #tpu.memory_space<vmem>>, %arg23: memref<1x1x32xf32, #tpu.memory_space<vmem>>, %arg24: memref<1x3x32x32xf32, #tpu.memory_space<vmem>>, %arg25: memref<1x3x1x32xf32, #tpu.memory_space<vmem>>, %arg26: memref<1x2x16x32xf32, #tpu.memory_space<vmem>>, %arg27: memref<1x1x32xf32, #tpu.memory_space<vmem>>, %arg28: memref<1x2x32xf32, #tpu.memory_space<vmem>>, %arg29: memref<1x2x32xf32, #tpu.memory_space<vmem>>, %arg30: memref<1x2x32xf32, #tpu.memory_space<vmem>>, %arg31: memref<1x32x64xf32, #tpu.memory_space<vmem>>, %arg32: memref<1x1x64xf32, #tpu.memory_space<vmem>>, %arg33: memref<1x64x32xf32, #tpu.memory_space<vmem>>, %arg34: memref<1x1x32xf32, #tpu.memory_space<vmem>>, %arg35: memref<2x32xf32, #tpu.memory_space<vmem>>, %arg36: memref<32x15xf32, #tpu.memory_space<vmem>>, %arg37: memref<1x15xf32, #tpu.memory_space<vmem>>, %arg38: memref<1x8x15xf32, #tpu.memory_space<vmem>>, %arg39: memref<34x32xf32, #tpu.memory_space<vmem>>) attributes {dimension_semantics = [#tpu.dimension_semantics<parallel>], iteration_bounds = array<i64: 2>, scalar_prefetch = 0 : i64, scratch_operands = 1 : i64, tpu.core_type = #tpu.core_type<tc>, window_params = [{transform_indices = @transform_0, window_bounds = array<i64: 1, 32, 32>}, {transform_indices = @transform_1, window_bounds = array<i64: 1, 1, 32>}, {transform_indices = @transform_2, window_bounds = array<i64: 1, 1, 14>}, {pipeline_mode = #tpu.pipeline_mode<synchronous>, transform_indices = @transform_3, window_bounds = array<i64: 34, 32>}, {pipeline_mode = #tpu.pipeline_mode<synchronous>, transform_indices = @transform_4, window_bounds = array<i64: 8, 32>}, {pipeline_mode = #tpu.pipeline_mode<synchronous>, transform_indices = @transform_5, window_bounds = array<i64: 32, 32>}, {pipeline_mode = #tpu.pipeline_mode<synchronous>, transform_indices = @transform_6, window_bounds = array<i64: 1, 32>}, {pipeline_mode = #tpu.pipeline_mode<synchronous>, transform_indices = @transform_7, window_bounds = array<i64: 14, 32>}, {pipeline_mode = #tpu.pipeline_mode<synchronous>, transform_indices = @transform_8, window_bounds = array<i64: 1, 32>}, {pipeline_mode = #tpu.pipeline_mode<synchronous>, transform_indices = @transform_9, window_bounds = array<i64: 1, 3, 32, 32>}, {pipeline_mode = #tpu.pipeline_mode<synchronous>, transform_indices = @transform_10, window_bounds = array<i64: 1, 3, 1, 32>}, {pipeline_mode = #tpu.pipeline_mode<synchronous>, transform_indices = @transform_11, window_bounds = array<i64: 1, 2, 16, 32>}, {pipeline_mode = #tpu.pipeline_mode<synchronous>, transform_indices = @transform_12, window_bounds = array<i64: 1, 1, 32>}, {pipeline_mode = #tpu.pipeline_mode<synchronous>, transform_indices = @transform_13, window_bounds = array<i64: 1, 2, 32>}, {pipeline_mode = #tpu.pipeline_mode<synchronous>, transform_indices = @transform_14, window_bounds = array<i64: 1, 32, 64>}, {pipeline_mode = #tpu.pipeline_mode<synchronous>, transform_indices = @transform_15, window_bounds = array<i64: 1, 1, 64>}, {pipeline_mode = #tpu.pipeline_mode<synchronous>, transform_indices = @transform_16, window_bounds = array<i64: 1, 64, 32>}, {pipeline_mode = #tpu.pipeline_mode<synchronous>, transform_indices = @transform_17, window_bounds = array<i64: 1, 1, 32>}, {pipeline_mode = #tpu.pipeline_mode<synchronous>, transform_indices = @transform_18, window_bounds = array<i64: 1, 2, 32>}, {pipeline_mode = #tpu.pipeline_mode<synchronous>, transform_indices = @transform_19, window_bounds = array<i64: 1, 3, 32, 32>}, {pipeline_mode = #tpu.pipeline_mode<synchronous>, transform_indices = @transform_20, window_bounds = array<i64: 1, 3, 1, 32>}, {pipeline_mode = #tpu.pipeline_mode<synchronous>, transform_indices = @transform_21, window_bounds = array<i64: 1, 2, 16, 32>}, {pipeline_mode = #tpu.pipeline_mode<synchronous>, transform_indices = @transform_22, window_bounds = array<i64: 1, 1, 32>}, {pipeline_mode = #tpu.pipeline_mode<synchronous>, transform_indices = @transform_23, window_bounds = array<i64: 1, 3, 32, 32>}, {pipeline_mode = #tpu.pipeline_mode<synchronous>, transform_indices = @transform_24, window_bounds = array<i64: 1, 3, 1, 32>}, {pipeline_mode = #tpu.pipeline_mode<synchronous>, transform_indices = @transform_25, window_bounds = array<i64: 1, 2, 16, 32>}, {pipeline_mode = #tpu.pipeline_mode<synchronous>, transform_indices = @transform_26, window_bounds = array<i64: 1, 1, 32>}, {pipeline_mode = #tpu.pipeline_mode<synchronous>, transform_indices = @transform_27, window_bounds = array<i64: 1, 2, 32>}, {pipeline_mode = #tpu.pipeline_mode<synchronous>, transform_indices = @transform_28, window_bounds = array<i64: 1, 2, 32>}, {pipeline_mode = #tpu.pipeline_mode<synchronous>, transform_indices = @transform_29, window_bounds = array<i64: 1, 2, 32>}, {pipeline_mode = #tpu.pipeline_mode<synchronous>, transform_indices = @transform_30, window_bounds = array<i64: 1, 32, 64>}, {pipeline_mode = #tpu.pipeline_mode<synchronous>, transform_indices = @transform_31, window_bounds = array<i64: 1, 1, 64>}, {pipeline_mode = #tpu.pipeline_mode<synchronous>, transform_indices = @transform_32, window_bounds = array<i64: 1, 64, 32>}, {pipeline_mode = #tpu.pipeline_mode<synchronous>, transform_indices = @transform_33, window_bounds = array<i64: 1, 1, 32>}, {pipeline_mode = #tpu.pipeline_mode<synchronous>, transform_indices = @transform_34, window_bounds = array<i64: 2, 32>}, {pipeline_mode = #tpu.pipeline_mode<synchronous>, transform_indices = @transform_35, window_bounds = array<i64: 32, 15>}, {pipeline_mode = #tpu.pipeline_mode<synchronous>, transform_indices = @transform_36, window_bounds = array<i64: 1, 15>}, {transform_indices = @transform_37, window_bounds = array<i64: 1, 8, 15>}]} {
    %c0 = arith.constant 0 : index
    %c0_0 = arith.constant 0 : index
    %0 = vector.load %arg4[%c0, %c0_0] : memref<34x32xf32, #tpu.memory_space<vmem>>, vector<34x32xf32>
    %c0_1 = arith.constant 0 : index
    %c0_2 = arith.constant 0 : index
    %c0_3 = arith.constant 0 : index
    %1 = vector.load %arg2[%c0_1, %c0_2, %c0_3] : memref<1x1x32xf32, #tpu.memory_space<vmem>>, vector<1x1x32xf32>
    %2 = vector.shape_cast %1 : vector<1x1x32xf32> to vector<1x32xf32>
    %c0_4 = arith.constant 0 : index
    %c0_5 = arith.constant 0 : index
    %3 = vector.load %arg6[%c0_4, %c0_5] : memref<32x32xf32, #tpu.memory_space<vmem>>, vector<32x32xf32>
    %cst = arith.constant dense<0.000000e+00> : vector<1x32xf32>
    %4 = tpu.matmul %2, %3, %cst {dimension_numbers = #tpu.dot_dimension_numbers<[1], [0], [0], [1], [0, 0, 1, 1], [], []>} : vector<1x32xf32>, vector<32x32xf32>, vector<1x32xf32> -> vector<1x32xf32>
    %c0_6 = arith.constant 0 : index
    %c0_7 = arith.constant 0 : index
    %5 = vector.load %arg7[%c0_6, %c0_7] : memref<1x32xf32, #tpu.memory_space<vmem>>, vector<1x32xf32>
    %6 = arith.addf %4, %5 : vector<1x32xf32>
    %c0_8 = arith.constant 0 : index
    %c0_9 = arith.constant 0 : index
    %c0_10 = arith.constant 0 : index
    %7 = vector.load %arg3[%c0_8, %c0_9, %c0_10] : memref<1x1x14xf32, #tpu.memory_space<vmem>>, vector<1x1x14xf32>
    %8 = vector.shape_cast %7 : vector<1x1x14xf32> to vector<1x14xf32>
    %c0_11 = arith.constant 0 : index
    %c0_12 = arith.constant 0 : index
    %9 = vector.load %arg8[%c0_11, %c0_12] : memref<14x32xf32, #tpu.memory_space<vmem>>, vector<14x32xf32>
    %cst_13 = arith.constant dense<0.000000e+00> : vector<1x32xf32>
    %10 = tpu.matmul %8, %9, %cst_13 {dimension_numbers = #tpu.dot_dimension_numbers<[1], [0], [0], [1], [0, 0, 1, 1], [], []>} : vector<1x14xf32>, vector<14x32xf32>, vector<1x32xf32> -> vector<1x32xf32>
    %c0_14 = arith.constant 0 : index
    %c0_15 = arith.constant 0 : index
    %11 = vector.load %arg9[%c0_14, %c0_15] : memref<1x32xf32, #tpu.memory_space<vmem>>, vector<1x32xf32>
    %12 = arith.addf %10, %11 : vector<1x32xf32>
    %c0_16 = arith.constant 0 : index
    %c0_17 = arith.constant 0 : index
    %13 = vector.load %arg39[%c0_16, %c0_17] : memref<34x32xf32, #tpu.memory_space<vmem>>, vector<1x32xf32>
    tpu.vector_store %arg39[%c0_16, %c0_17], %6 {strides = array<i32>} : memref<34x32xf32, #tpu.memory_space<vmem>>, vector<1x32xf32>,
    %c1 = arith.constant 1 : index
    %c0_18 = arith.constant 0 : index
    %14 = vector.load %arg39[%c1, %c0_18] : memref<34x32xf32, #tpu.memory_space<vmem>>, vector<1x32xf32>
    tpu.vector_store %arg39[%c1, %c0_18], %12 {strides = array<i32>} : memref<34x32xf32, #tpu.memory_space<vmem>>, vector<1x32xf32>,
    %c0_19 = arith.constant 0 : index
    %c0_20 = arith.constant 0 : index
    %c0_21 = arith.constant 0 : index
    %15 = vector.load %arg1[%c0_19, %c0_20, %c0_21] : memref<1x32x32xf32, #tpu.memory_space<vmem>>, vector<1x32x32xf32>
    %16 = vector.shape_cast %15 : vector<1x32x32xf32> to vector<32x32xf32>
    %c2 = arith.constant 2 : index
    %c0_22 = arith.constant 0 : index
    %17 = vector.load %arg39[%c2, %c0_22] : memref<34x32xf32, #tpu.memory_space<vmem>>, vector<32x32xf32>
    tpu.vector_store %arg39[%c2, %c0_22], %16 {strides = array<i32>} : memref<34x32xf32, #tpu.memory_space<vmem>>, vector<32x32xf32>,
    %c0_23 = arith.constant 0 : index
    %c0_24 = arith.constant 0 : index
    %18 = vector.load %arg39[%c0_23, %c0_24] : memref<34x32xf32, #tpu.memory_space<vmem>>, vector<34x32xf32>
    %19 = arith.addf %18, %0 : vector<34x32xf32>
    %c0_25 = arith.constant 0 : index
    %c0_26 = arith.constant 0 : index
    %c0_27 = arith.constant 0 : index
    %c0_28 = arith.constant 0 : index
    %20 = vector.load %arg10[%c0_25, %c0_26, %c0_27, %c0_28] : memref<1x3x32x32xf32, #tpu.memory_space<vmem>>, vector<1x1x32x32xf32>
    %21 = vector.shape_cast %20 : vector<1x1x32x32xf32> to vector<32x32xf32>
    %cst_29 = arith.constant dense<0.000000e+00> : vector<34x32xf32>
    %22 = tpu.matmul %19, %21, %cst_29 {dimension_numbers = #tpu.dot_dimension_numbers<[1], [0], [0], [1], [0, 0, 1, 1], [], []>} : vector<34x32xf32>, vector<32x32xf32>, vector<34x32xf32> -> vector<34x32xf32>
    %c0_30 = arith.constant 0 : index
    %c0_31 = arith.constant 0 : index
    %c0_32 = arith.constant 0 : index
    %c0_33 = arith.constant 0 : index
    %23 = vector.load %arg11[%c0_30, %c0_31, %c0_32, %c0_33] : memref<1x3x1x32xf32, #tpu.memory_space<vmem>>, vector<1x1x1x32xf32>
    %24 = vector.shape_cast %23 : vector<1x1x1x32xf32> to vector<1x32xf32>
    %25 = vector.broadcast %24 : vector<1x32xf32> to vector<34x32xf32>
    %26 = arith.addf %22, %25 : vector<34x32xf32>
    %c0_34 = arith.constant 0 : index
    %c1_35 = arith.constant 1 : index
    %c0_36 = arith.constant 0 : index
    %c0_37 = arith.constant 0 : index
    %27 = vector.load %arg10[%c0_34, %c1_35, %c0_36, %c0_37] : memref<1x3x32x32xf32, #tpu.memory_space<vmem>>, vector<1x1x32x32xf32>
    %28 = vector.shape_cast %27 : vector<1x1x32x32xf32> to vector<32x32xf32>
    %cst_38 = arith.constant dense<0.000000e+00> : vector<34x32xf32>
    %29 = tpu.matmul %19, %28, %cst_38 {dimension_numbers = #tpu.dot_dimension_numbers<[1], [0], [0], [1], [0, 0, 1, 1], [], []>} : vector<34x32xf32>, vector<32x32xf32>, vector<34x32xf32> -> vector<34x32xf32>
    %c0_39 = arith.constant 0 : index
    %c1_40 = arith.constant 1 : index
    %c0_41 = arith.constant 0 : index
    %c0_42 = arith.constant 0 : index
    %30 = vector.load %arg11[%c0_39, %c1_40, %c0_41, %c0_42] : memref<1x3x1x32xf32, #tpu.memory_space<vmem>>, vector<1x1x1x32xf32>
    %31 = vector.shape_cast %30 : vector<1x1x1x32xf32> to vector<1x32xf32>
    %32 = vector.broadcast %31 : vector<1x32xf32> to vector<34x32xf32>
    %33 = arith.addf %29, %32 : vector<34x32xf32>
    %c0_43 = arith.constant 0 : index
    %c2_44 = arith.constant 2 : index
    %c0_45 = arith.constant 0 : index
    %c0_46 = arith.constant 0 : index
    %34 = vector.load %arg10[%c0_43, %c2_44, %c0_45, %c0_46] : memref<1x3x32x32xf32, #tpu.memory_space<vmem>>, vector<1x1x32x32xf32>
    %35 = vector.shape_cast %34 : vector<1x1x32x32xf32> to vector<32x32xf32>
    %cst_47 = arith.constant dense<0.000000e+00> : vector<34x32xf32>
    %36 = tpu.matmul %18, %35, %cst_47 {dimension_numbers = #tpu.dot_dimension_numbers<[1], [0], [0], [1], [0, 0, 1, 1], [], []>} : vector<34x32xf32>, vector<32x32xf32>, vector<34x32xf32> -> vector<34x32xf32>
    %c0_48 = arith.constant 0 : index
    %c2_49 = arith.constant 2 : index
    %c0_50 = arith.constant 0 : index
    %c0_51 = arith.constant 0 : index
    %37 = vector.load %arg11[%c0_48, %c2_49, %c0_50, %c0_51] : memref<1x3x1x32xf32, #tpu.memory_space<vmem>>, vector<1x1x1x32xf32>
    %38 = vector.shape_cast %37 : vector<1x1x1x32xf32> to vector<1x32xf32>
    %39 = vector.broadcast %38 : vector<1x32xf32> to vector<34x32xf32>
    %40 = arith.addf %36, %39 : vector<34x32xf32>
    %c0_52 = arith.constant 0 : index
    %c0_53 = arith.constant 0 : index
    %c0_54 = arith.constant 0 : index
    %41 = vector.load %arg13[%c0_52, %c0_53, %c0_54] : memref<1x1x32xf32, #tpu.memory_space<vmem>>, vector<1x1x32xf32>
    %42 = vector.shape_cast %41 : vector<1x1x32xf32> to vector<1x32xf32>
    %43 = vector.extract_strided_slice %26 {offsets = [0, 0], sizes = [34, 16], strides = [1, 1]} : vector<34x32xf32> to vector<34x16xf32>
    %44 = vector.extract_strided_slice %33 {offsets = [0, 0], sizes = [34, 16], strides = [1, 1]} : vector<34x32xf32> to vector<34x16xf32>
    %cst_55 = arith.constant dense<0.000000e+00> : vector<34x34xf32>
    %45 = tpu.matmul %43, %44, %cst_55 {dimension_numbers = #tpu.dot_dimension_numbers<[1], [1], [0], [0], [0, 0, 1, 0], [], []>} : vector<34x16xf32>, vector<34x16xf32>, vector<34x34xf32> -> vector<34x34xf32>
    %cst_56 = arith.constant 2.500000e-01 : f32
    %46 = vector.broadcast %cst_56 : f32 to vector<34x34xf32>
    %47 = arith.mulf %45, %46 : vector<34x34xf32>
    %cst_57 = arith.constant dense<0xFF800000> : vector<34xf32>
    %48 = vector.multi_reduction <maximumf>, %47, %cst_57 [1] : vector<34x34xf32> to vector<34xf32>
    %49 = vector.shape_cast %48 : vector<34xf32> to vector<34x1xf32>
    %50 = vector.broadcast %49 : vector<34x1xf32> to vector<34x34xf32>
    %51 = arith.subf %47, %50 : vector<34x34xf32>
    %52 = math.exp %51 : vector<34x34xf32>
    %cst_58 = arith.constant dense<0.000000e+00> : vector<34xf32>
    %53 = vector.multi_reduction <add>, %52, %cst_58 [1] : vector<34x34xf32> to vector<34xf32>
    %54 = vector.shape_cast %53 : vector<34xf32> to vector<34x1xf32>
    %55 = vector.broadcast %54 : vector<34x1xf32> to vector<34x34xf32>
    %56 = arith.divf %52, %55 : vector<34x34xf32>
    %57 = vector.extract_strided_slice %40 {offsets = [0, 0], sizes = [34, 16], strides = [1, 1]} : vector<34x32xf32> to vector<34x16xf32>
    %cst_59 = arith.constant dense<0.000000e+00> : vector<34x16xf32>
    %58 = tpu.matmul %56, %57, %cst_59 {dimension_numbers = #tpu.dot_dimension_numbers<[1], [0], [0], [1], [0, 0, 1, 1], [], []>} : vector<34x34xf32>, vector<34x16xf32>, vector<34x16xf32> -> vector<34x16xf32>
    %c0_60 = arith.constant 0 : index
    %c0_61 = arith.constant 0 : index
    %c0_62 = arith.constant 0 : index
    %c0_63 = arith.constant 0 : index
    %59 = vector.load %arg12[%c0_60, %c0_61, %c0_62, %c0_63] : memref<1x2x16x32xf32, #tpu.memory_space<vmem>>, vector<1x1x16x32xf32>
    %60 = vector.shape_cast %59 : vector<1x1x16x32xf32> to vector<16x32xf32>
    %cst_64 = arith.constant dense<0.000000e+00> : vector<34x32xf32>
    %61 = tpu.matmul %58, %60, %cst_64 {dimension_numbers = #tpu.dot_dimension_numbers<[1], [0], [0], [1], [0, 0, 1, 1], [], []>} : vector<34x16xf32>, vector<16x32xf32>, vector<34x32xf32> -> vector<34x32xf32>
    %62 = vector.broadcast %42 : vector<1x32xf32> to vector<34x32xf32>
    %63 = arith.addf %62, %61 : vector<34x32xf32>
    %64 = vector.extract_strided_slice %26 {offsets = [0, 16], sizes = [34, 16], strides = [1, 1]} : vector<34x32xf32> to vector<34x16xf32>
    %65 = vector.extract_strided_slice %33 {offsets = [0, 16], sizes = [34, 16], strides = [1, 1]} : vector<34x32xf32> to vector<34x16xf32>
    %cst_65 = arith.constant dense<0.000000e+00> : vector<34x34xf32>
    %66 = tpu.matmul %64, %65, %cst_65 {dimension_numbers = #tpu.dot_dimension_numbers<[1], [1], [0], [0], [0, 0, 1, 0], [], []>} : vector<34x16xf32>, vector<34x16xf32>, vector<34x34xf32> -> vector<34x34xf32>
    %cst_66 = arith.constant 2.500000e-01 : f32
    %67 = vector.broadcast %cst_66 : f32 to vector<34x34xf32>
    %68 = arith.mulf %66, %67 : vector<34x34xf32>
    %cst_67 = arith.constant dense<0xFF800000> : vector<34xf32>
    %69 = vector.multi_reduction <maximumf>, %68, %cst_67 [1] : vector<34x34xf32> to vector<34xf32>
    %70 = vector.shape_cast %69 : vector<34xf32> to vector<34x1xf32>
    %71 = vector.broadcast %70 : vector<34x1xf32> to vector<34x34xf32>
    %72 = arith.subf %68, %71 : vector<34x34xf32>
    %73 = math.exp %72 : vector<34x34xf32>
    %cst_68 = arith.constant dense<0.000000e+00> : vector<34xf32>
    %74 = vector.multi_reduction <add>, %73, %cst_68 [1] : vector<34x34xf32> to vector<34xf32>
    %75 = vector.shape_cast %74 : vector<34xf32> to vector<34x1xf32>
    %76 = vector.broadcast %75 : vector<34x1xf32> to vector<34x34xf32>
    %77 = arith.divf %73, %76 : vector<34x34xf32>
    %78 = vector.extract_strided_slice %40 {offsets = [0, 16], sizes = [34, 16], strides = [1, 1]} : vector<34x32xf32> to vector<34x16xf32>
    %cst_69 = arith.constant dense<0.000000e+00> : vector<34x16xf32>
    %79 = tpu.matmul %77, %78, %cst_69 {dimension_numbers = #tpu.dot_dimension_numbers<[1], [0], [0], [1], [0, 0, 1, 1], [], []>} : vector<34x34xf32>, vector<34x16xf32>, vector<34x16xf32> -> vector<34x16xf32>
    %c0_70 = arith.constant 0 : index
    %c1_71 = arith.constant 1 : index
    %c0_72 = arith.constant 0 : index
    %c0_73 = arith.constant 0 : index
    %80 = vector.load %arg12[%c0_70, %c1_71, %c0_72, %c0_73] : memref<1x2x16x32xf32, #tpu.memory_space<vmem>>, vector<1x1x16x32xf32>
    %81 = vector.shape_cast %80 : vector<1x1x16x32xf32> to vector<16x32xf32>
    %cst_74 = arith.constant dense<0.000000e+00> : vector<34x32xf32>
    %82 = tpu.matmul %79, %81, %cst_74 {dimension_numbers = #tpu.dot_dimension_numbers<[1], [0], [0], [1], [0, 0, 1, 1], [], []>} : vector<34x16xf32>, vector<16x32xf32>, vector<34x32xf32> -> vector<34x32xf32>
    %83 = arith.addf %63, %82 : vector<34x32xf32>
    %84 = arith.addf %18, %83 : vector<34x32xf32>
    %c0_75 = arith.constant 0 : index
    %c0_76 = arith.constant 0 : index
    %c0_77 = arith.constant 0 : index
    %85 = vector.load %arg14[%c0_75, %c0_76, %c0_77] : memref<1x2x32xf32, #tpu.memory_space<vmem>>, vector<1x2x32xf32>
    %86 = vector.shape_cast %85 : vector<1x2x32xf32> to vector<2x32xf32>
    %87 = vector.extract_strided_slice %86 {offsets = [0, 0], sizes = [1, 32], strides = [1, 1]} : vector<2x32xf32> to vector<1x32xf32>
    %88 = vector.extract_strided_slice %86 {offsets = [1, 0], sizes = [1, 32], strides = [1, 1]} : vector<2x32xf32> to vector<1x32xf32>
    %cst_78 = arith.constant dense<0.000000e+00> : vector<34xf32>
    %89 = vector.multi_reduction <add>, %84, %cst_78 [1] : vector<34x32xf32> to vector<34xf32>
    %90 = vector.shape_cast %89 : vector<34xf32> to vector<34x1xf32>
    %cst_79 = arith.constant 3.200000e+01 : f32
    %91 = vector.broadcast %cst_79 : f32 to vector<34x1xf32>
    %92 = arith.divf %90, %91 : vector<34x1xf32>
    %93 = vector.broadcast %92 : vector<34x1xf32> to vector<34x32xf32>
    %94 = arith.subf %84, %93 : vector<34x32xf32>
    %95 = arith.mulf %94, %94 : vector<34x32xf32>
    %cst_80 = arith.constant dense<0.000000e+00> : vector<34xf32>
    %96 = vector.multi_reduction <add>, %95, %cst_80 [1] : vector<34x32xf32> to vector<34xf32>
    %97 = vector.shape_cast %96 : vector<34xf32> to vector<34x1xf32>
    %cst_81 = arith.constant 3.200000e+01 : f32
    %98 = vector.broadcast %cst_81 : f32 to vector<34x1xf32>
    %99 = arith.divf %97, %98 : vector<34x1xf32>
    %cst_82 = arith.constant 9.99999974E-6 : f32
    %100 = vector.broadcast %cst_82 : f32 to vector<34x1xf32>
    %101 = arith.addf %99, %100 : vector<34x1xf32>
    %102 = math.rsqrt %101 : vector<34x1xf32>
    %103 = vector.broadcast %102 : vector<34x1xf32> to vector<34x32xf32>
    %104 = arith.mulf %94, %103 : vector<34x32xf32>
    %105 = vector.broadcast %87 : vector<1x32xf32> to vector<34x32xf32>
    %106 = arith.mulf %104, %105 : vector<34x32xf32>
    %107 = vector.broadcast %88 : vector<1x32xf32> to vector<34x32xf32>
    %108 = arith.addf %106, %107 : vector<34x32xf32>
    %c0_83 = arith.constant 0 : index
    %c0_84 = arith.constant 0 : index
    %c0_85 = arith.constant 0 : index
    %109 = vector.load %arg15[%c0_83, %c0_84, %c0_85] : memref<1x32x64xf32, #tpu.memory_space<vmem>>, vector<1x32x64xf32>
    %110 = vector.shape_cast %109 : vector<1x32x64xf32> to vector<32x64xf32>
    %cst_86 = arith.constant dense<0.000000e+00> : vector<34x64xf32>
    %111 = tpu.matmul %108, %110, %cst_86 {dimension_numbers = #tpu.dot_dimension_numbers<[1], [0], [0], [1], [0, 0, 1, 1], [], []>} : vector<34x32xf32>, vector<32x64xf32>, vector<34x64xf32> -> vector<34x64xf32>
    %c0_87 = arith.constant 0 : index
    %c0_88 = arith.constant 0 : index
    %c0_89 = arith.constant 0 : index
    %112 = vector.load %arg16[%c0_87, %c0_88, %c0_89] : memref<1x1x64xf32, #tpu.memory_space<vmem>>, vector<1x1x64xf32>
    %113 = vector.shape_cast %112 : vector<1x1x64xf32> to vector<1x64xf32>
    %114 = vector.broadcast %113 : vector<1x64xf32> to vector<34x64xf32>
    %115 = arith.addf %111, %114 : vector<34x64xf32>
    %cst_90 = arith.constant 0.000000e+00 : f32
    %116 = vector.broadcast %cst_90 : f32 to vector<34x64xf32>
    %117 = arith.maximumf %115, %116 : vector<34x64xf32>
    %c0_91 = arith.constant 0 : index
    %c0_92 = arith.constant 0 : index
    %c0_93 = arith.constant 0 : index
    %118 = vector.load %arg17[%c0_91, %c0_92, %c0_93] : memref<1x64x32xf32, #tpu.memory_space<vmem>>, vector<1x64x32xf32>
    %119 = vector.shape_cast %118 : vector<1x64x32xf32> to vector<64x32xf32>
    %cst_94 = arith.constant dense<0.000000e+00> : vector<34x32xf32>
    %120 = tpu.matmul %117, %119, %cst_94 {dimension_numbers = #tpu.dot_dimension_numbers<[1], [0], [0], [1], [0, 0, 1, 1], [], []>} : vector<34x64xf32>, vector<64x32xf32>, vector<34x32xf32> -> vector<34x32xf32>
    %c0_95 = arith.constant 0 : index
    %c0_96 = arith.constant 0 : index
    %c0_97 = arith.constant 0 : index
    %121 = vector.load %arg18[%c0_95, %c0_96, %c0_97] : memref<1x1x32xf32, #tpu.memory_space<vmem>>, vector<1x1x32xf32>
    %122 = vector.shape_cast %121 : vector<1x1x32xf32> to vector<1x32xf32>
    %123 = vector.broadcast %122 : vector<1x32xf32> to vector<34x32xf32>
    %124 = arith.addf %120, %123 : vector<34x32xf32>
    %125 = arith.addf %108, %124 : vector<34x32xf32>
    %c0_98 = arith.constant 0 : index
    %c0_99 = arith.constant 0 : index
    %c0_100 = arith.constant 0 : index
    %126 = vector.load %arg19[%c0_98, %c0_99, %c0_100] : memref<1x2x32xf32, #tpu.memory_space<vmem>>, vector<1x2x32xf32>
    %127 = vector.shape_cast %126 : vector<1x2x32xf32> to vector<2x32xf32>
    %128 = vector.extract_strided_slice %127 {offsets = [0, 0], sizes = [1, 32], strides = [1, 1]} : vector<2x32xf32> to vector<1x32xf32>
    %129 = vector.extract_strided_slice %127 {offsets = [1, 0], sizes = [1, 32], strides = [1, 1]} : vector<2x32xf32> to vector<1x32xf32>
    %cst_101 = arith.constant dense<0.000000e+00> : vector<34xf32>
    %130 = vector.multi_reduction <add>, %125, %cst_101 [1] : vector<34x32xf32> to vector<34xf32>
    %131 = vector.shape_cast %130 : vector<34xf32> to vector<34x1xf32>
    %cst_102 = arith.constant 3.200000e+01 : f32
    %132 = vector.broadcast %cst_102 : f32 to vector<34x1xf32>
    %133 = arith.divf %131, %132 : vector<34x1xf32>
    %134 = vector.broadcast %133 : vector<34x1xf32> to vector<34x32xf32>
    %135 = arith.subf %125, %134 : vector<34x32xf32>
    %136 = arith.mulf %135, %135 : vector<34x32xf32>
    %cst_103 = arith.constant dense<0.000000e+00> : vector<34xf32>
    %137 = vector.multi_reduction <add>, %136, %cst_103 [1] : vector<34x32xf32> to vector<34xf32>
    %138 = vector.shape_cast %137 : vector<34xf32> to vector<34x1xf32>
    %cst_104 = arith.constant 3.200000e+01 : f32
    %139 = vector.broadcast %cst_104 : f32 to vector<34x1xf32>
    %140 = arith.divf %138, %139 : vector<34x1xf32>
    %cst_105 = arith.constant 9.99999974E-6 : f32
    %141 = vector.broadcast %cst_105 : f32 to vector<34x1xf32>
    %142 = arith.addf %140, %141 : vector<34x1xf32>
    %143 = math.rsqrt %142 : vector<34x1xf32>
    %144 = vector.broadcast %143 : vector<34x1xf32> to vector<34x32xf32>
    %145 = arith.mulf %135, %144 : vector<34x32xf32>
    %146 = vector.broadcast %128 : vector<1x32xf32> to vector<34x32xf32>
    %147 = arith.mulf %145, %146 : vector<34x32xf32>
    %148 = vector.broadcast %129 : vector<1x32xf32> to vector<34x32xf32>
    %149 = arith.addf %147, %148 : vector<34x32xf32>
    %c0_106 = arith.constant 0 : index
    %c0_107 = arith.constant 0 : index
    %150 = vector.load %arg5[%c0_106, %c0_107] : memref<8x32xf32, #tpu.memory_space<vmem>>, vector<8x32xf32>
    %cst_108 = arith.constant 0.000000e+00 : f32
    %151 = vector.broadcast %cst_108 : f32 to vector<8x32xf32>
    %152 = arith.addf %151, %150 : vector<8x32xf32>
    %c0_109 = arith.constant 0 : index
    %c0_110 = arith.constant 0 : index
    %c0_111 = arith.constant 0 : index
    %c0_112 = arith.constant 0 : index
    %153 = vector.load %arg20[%c0_109, %c0_110, %c0_111, %c0_112] : memref<1x3x32x32xf32, #tpu.memory_space<vmem>>, vector<1x1x32x32xf32>
    %154 = vector.shape_cast %153 : vector<1x1x32x32xf32> to vector<32x32xf32>
    %cst_113 = arith.constant dense<0.000000e+00> : vector<8x32xf32>
    %155 = tpu.matmul %152, %154, %cst_113 {dimension_numbers = #tpu.dot_dimension_numbers<[1], [0], [0], [1], [0, 0, 1, 1], [], []>} : vector<8x32xf32>, vector<32x32xf32>, vector<8x32xf32> -> vector<8x32xf32>
    %c0_114 = arith.constant 0 : index
    %c0_115 = arith.constant 0 : index
    %c0_116 = arith.constant 0 : index
    %c0_117 = arith.constant 0 : index
    %156 = vector.load %arg21[%c0_114, %c0_115, %c0_116, %c0_117] : memref<1x3x1x32xf32, #tpu.memory_space<vmem>>, vector<1x1x1x32xf32>
    %157 = vector.shape_cast %156 : vector<1x1x1x32xf32> to vector<1x32xf32>
    %158 = vector.broadcast %157 : vector<1x32xf32> to vector<8x32xf32>
    %159 = arith.addf %155, %158 : vector<8x32xf32>
    %c0_118 = arith.constant 0 : index
    %c1_119 = arith.constant 1 : index
    %c0_120 = arith.constant 0 : index
    %c0_121 = arith.constant 0 : index
    %160 = vector.load %arg20[%c0_118, %c1_119, %c0_120, %c0_121] : memref<1x3x32x32xf32, #tpu.memory_space<vmem>>, vector<1x1x32x32xf32>
    %161 = vector.shape_cast %160 : vector<1x1x32x32xf32> to vector<32x32xf32>
    %cst_122 = arith.constant dense<0.000000e+00> : vector<8x32xf32>
    %162 = tpu.matmul %152, %161, %cst_122 {dimension_numbers = #tpu.dot_dimension_numbers<[1], [0], [0], [1], [0, 0, 1, 1], [], []>} : vector<8x32xf32>, vector<32x32xf32>, vector<8x32xf32> -> vector<8x32xf32>
    %c0_123 = arith.constant 0 : index
    %c1_124 = arith.constant 1 : index
    %c0_125 = arith.constant 0 : index
    %c0_126 = arith.constant 0 : index
    %163 = vector.load %arg21[%c0_123, %c1_124, %c0_125, %c0_126] : memref<1x3x1x32xf32, #tpu.memory_space<vmem>>, vector<1x1x1x32xf32>
    %164 = vector.shape_cast %163 : vector<1x1x1x32xf32> to vector<1x32xf32>
    %165 = vector.broadcast %164 : vector<1x32xf32> to vector<8x32xf32>
    %166 = arith.addf %162, %165 : vector<8x32xf32>
    %c0_127 = arith.constant 0 : index
    %c2_128 = arith.constant 2 : index
    %c0_129 = arith.constant 0 : index
    %c0_130 = arith.constant 0 : index
    %167 = vector.load %arg20[%c0_127, %c2_128, %c0_129, %c0_130] : memref<1x3x32x32xf32, #tpu.memory_space<vmem>>, vector<1x1x32x32xf32>
    %168 = vector.shape_cast %167 : vector<1x1x32x32xf32> to vector<32x32xf32>
    %cst_131 = arith.constant dense<0.000000e+00> : vector<8x32xf32>
    %169 = tpu.matmul %151, %168, %cst_131 {dimension_numbers = #tpu.dot_dimension_numbers<[1], [0], [0], [1], [0, 0, 1, 1], [], []>} : vector<8x32xf32>, vector<32x32xf32>, vector<8x32xf32> -> vector<8x32xf32>
    %c0_132 = arith.constant 0 : index
    %c2_133 = arith.constant 2 : index
    %c0_134 = arith.constant 0 : index
    %c0_135 = arith.constant 0 : index
    %170 = vector.load %arg21[%c0_132, %c2_133, %c0_134, %c0_135] : memref<1x3x1x32xf32, #tpu.memory_space<vmem>>, vector<1x1x1x32xf32>
    %171 = vector.shape_cast %170 : vector<1x1x1x32xf32> to vector<1x32xf32>
    %172 = vector.broadcast %171 : vector<1x32xf32> to vector<8x32xf32>
    %173 = arith.addf %169, %172 : vector<8x32xf32>
    %c0_136 = arith.constant 0 : index
    %c0_137 = arith.constant 0 : index
    %c0_138 = arith.constant 0 : index
    %174 = vector.load %arg23[%c0_136, %c0_137, %c0_138] : memref<1x1x32xf32, #tpu.memory_space<vmem>>, vector<1x1x32xf32>
    %175 = vector.shape_cast %174 : vector<1x1x32xf32> to vector<1x32xf32>
    %176 = vector.extract_strided_slice %159 {offsets = [0, 0], sizes = [8, 16], strides = [1, 1]} : vector<8x32xf32> to vector<8x16xf32>
    %177 = vector.extract_strided_slice %166 {offsets = [0, 0], sizes = [8, 16], strides = [1, 1]} : vector<8x32xf32> to vector<8x16xf32>
    %cst_139 = arith.constant dense<0.000000e+00> : vector<8x8xf32>
    %178 = tpu.matmul %176, %177, %cst_139 {dimension_numbers = #tpu.dot_dimension_numbers<[1], [1], [0], [0], [0, 0, 1, 0], [], []>} : vector<8x16xf32>, vector<8x16xf32>, vector<8x8xf32> -> vector<8x8xf32>
    %cst_140 = arith.constant 2.500000e-01 : f32
    %179 = vector.broadcast %cst_140 : f32 to vector<8x8xf32>
    %180 = arith.mulf %178, %179 : vector<8x8xf32>
    %cst_141 = arith.constant dense<0xFF800000> : vector<8xf32>
    %181 = vector.multi_reduction <maximumf>, %180, %cst_141 [1] : vector<8x8xf32> to vector<8xf32>
    %182 = vector.shape_cast %181 : vector<8xf32> to vector<8x1xf32>
    %183 = vector.broadcast %182 : vector<8x1xf32> to vector<8x8xf32>
    %184 = arith.subf %180, %183 : vector<8x8xf32>
    %185 = math.exp %184 : vector<8x8xf32>
    %cst_142 = arith.constant dense<0.000000e+00> : vector<8xf32>
    %186 = vector.multi_reduction <add>, %185, %cst_142 [1] : vector<8x8xf32> to vector<8xf32>
    %187 = vector.shape_cast %186 : vector<8xf32> to vector<8x1xf32>
    %188 = vector.broadcast %187 : vector<8x1xf32> to vector<8x8xf32>
    %189 = arith.divf %185, %188 : vector<8x8xf32>
    %190 = vector.extract_strided_slice %173 {offsets = [0, 0], sizes = [8, 16], strides = [1, 1]} : vector<8x32xf32> to vector<8x16xf32>
    %cst_143 = arith.constant dense<0.000000e+00> : vector<8x16xf32>
    %191 = tpu.matmul %189, %190, %cst_143 {dimension_numbers = #tpu.dot_dimension_numbers<[1], [0], [0], [1], [0, 0, 1, 1], [], []>} : vector<8x8xf32>, vector<8x16xf32>, vector<8x16xf32> -> vector<8x16xf32>
    %c0_144 = arith.constant 0 : index
    %c0_145 = arith.constant 0 : index
    %c0_146 = arith.constant 0 : index
    %c0_147 = arith.constant 0 : index
    %192 = vector.load %arg22[%c0_144, %c0_145, %c0_146, %c0_147] : memref<1x2x16x32xf32, #tpu.memory_space<vmem>>, vector<1x1x16x32xf32>
    %193 = vector.shape_cast %192 : vector<1x1x16x32xf32> to vector<16x32xf32>
    %cst_148 = arith.constant dense<0.000000e+00> : vector<8x32xf32>
    %194 = tpu.matmul %191, %193, %cst_148 {dimension_numbers = #tpu.dot_dimension_numbers<[1], [0], [0], [1], [0, 0, 1, 1], [], []>} : vector<8x16xf32>, vector<16x32xf32>, vector<8x32xf32> -> vector<8x32xf32>
    %195 = vector.broadcast %175 : vector<1x32xf32> to vector<8x32xf32>
    %196 = arith.addf %195, %194 : vector<8x32xf32>
    %197 = vector.extract_strided_slice %159 {offsets = [0, 16], sizes = [8, 16], strides = [1, 1]} : vector<8x32xf32> to vector<8x16xf32>
    %198 = vector.extract_strided_slice %166 {offsets = [0, 16], sizes = [8, 16], strides = [1, 1]} : vector<8x32xf32> to vector<8x16xf32>
    %cst_149 = arith.constant dense<0.000000e+00> : vector<8x8xf32>
    %199 = tpu.matmul %197, %198, %cst_149 {dimension_numbers = #tpu.dot_dimension_numbers<[1], [1], [0], [0], [0, 0, 1, 0], [], []>} : vector<8x16xf32>, vector<8x16xf32>, vector<8x8xf32> -> vector<8x8xf32>
    %cst_150 = arith.constant 2.500000e-01 : f32
    %200 = vector.broadcast %cst_150 : f32 to vector<8x8xf32>
    %201 = arith.mulf %199, %200 : vector<8x8xf32>
    %cst_151 = arith.constant dense<0xFF800000> : vector<8xf32>
    %202 = vector.multi_reduction <maximumf>, %201, %cst_151 [1] : vector<8x8xf32> to vector<8xf32>
    %203 = vector.shape_cast %202 : vector<8xf32> to vector<8x1xf32>
    %204 = vector.broadcast %203 : vector<8x1xf32> to vector<8x8xf32>
    %205 = arith.subf %201, %204 : vector<8x8xf32>
    %206 = math.exp %205 : vector<8x8xf32>
    %cst_152 = arith.constant dense<0.000000e+00> : vector<8xf32>
    %207 = vector.multi_reduction <add>, %206, %cst_152 [1] : vector<8x8xf32> to vector<8xf32>
    %208 = vector.shape_cast %207 : vector<8xf32> to vector<8x1xf32>
    %209 = vector.broadcast %208 : vector<8x1xf32> to vector<8x8xf32>
    %210 = arith.divf %206, %209 : vector<8x8xf32>
    %211 = vector.extract_strided_slice %173 {offsets = [0, 16], sizes = [8, 16], strides = [1, 1]} : vector<8x32xf32> to vector<8x16xf32>
    %cst_153 = arith.constant dense<0.000000e+00> : vector<8x16xf32>
    %212 = tpu.matmul %210, %211, %cst_153 {dimension_numbers = #tpu.dot_dimension_numbers<[1], [0], [0], [1], [0, 0, 1, 1], [], []>} : vector<8x8xf32>, vector<8x16xf32>, vector<8x16xf32> -> vector<8x16xf32>
    %c0_154 = arith.constant 0 : index
    %c1_155 = arith.constant 1 : index
    %c0_156 = arith.constant 0 : index
    %c0_157 = arith.constant 0 : index
    %213 = vector.load %arg22[%c0_154, %c1_155, %c0_156, %c0_157] : memref<1x2x16x32xf32, #tpu.memory_space<vmem>>, vector<1x1x16x32xf32>
    %214 = vector.shape_cast %213 : vector<1x1x16x32xf32> to vector<16x32xf32>
    %cst_158 = arith.constant dense<0.000000e+00> : vector<8x32xf32>
    %215 = tpu.matmul %212, %214, %cst_158 {dimension_numbers = #tpu.dot_dimension_numbers<[1], [0], [0], [1], [0, 0, 1, 1], [], []>} : vector<8x16xf32>, vector<16x32xf32>, vector<8x32xf32> -> vector<8x32xf32>
    %216 = arith.addf %196, %215 : vector<8x32xf32>
    %217 = arith.addf %151, %216 : vector<8x32xf32>
    %c0_159 = arith.constant 0 : index
    %c0_160 = arith.constant 0 : index
    %c0_161 = arith.constant 0 : index
    %218 = vector.load %arg28[%c0_159, %c0_160, %c0_161] : memref<1x2x32xf32, #tpu.memory_space<vmem>>, vector<1x2x32xf32>
    %219 = vector.shape_cast %218 : vector<1x2x32xf32> to vector<2x32xf32>
    %220 = vector.extract_strided_slice %219 {offsets = [0, 0], sizes = [1, 32], strides = [1, 1]} : vector<2x32xf32> to vector<1x32xf32>
    %221 = vector.extract_strided_slice %219 {offsets = [1, 0], sizes = [1, 32], strides = [1, 1]} : vector<2x32xf32> to vector<1x32xf32>
    %cst_162 = arith.constant dense<0.000000e+00> : vector<8xf32>
    %222 = vector.multi_reduction <add>, %217, %cst_162 [1] : vector<8x32xf32> to vector<8xf32>
    %223 = vector.shape_cast %222 : vector<8xf32> to vector<8x1xf32>
    %cst_163 = arith.constant 3.200000e+01 : f32
    %224 = vector.broadcast %cst_163 : f32 to vector<8x1xf32>
    %225 = arith.divf %223, %224 : vector<8x1xf32>
    %226 = vector.broadcast %225 : vector<8x1xf32> to vector<8x32xf32>
    %227 = arith.subf %217, %226 : vector<8x32xf32>
    %228 = arith.mulf %227, %227 : vector<8x32xf32>
    %cst_164 = arith.constant dense<0.000000e+00> : vector<8xf32>
    %229 = vector.multi_reduction <add>, %228, %cst_164 [1] : vector<8x32xf32> to vector<8xf32>
    %230 = vector.shape_cast %229 : vector<8xf32> to vector<8x1xf32>
    %cst_165 = arith.constant 3.200000e+01 : f32
    %231 = vector.broadcast %cst_165 : f32 to vector<8x1xf32>
    %232 = arith.divf %230, %231 : vector<8x1xf32>
    %cst_166 = arith.constant 9.99999974E-6 : f32
    %233 = vector.broadcast %cst_166 : f32 to vector<8x1xf32>
    %234 = arith.addf %232, %233 : vector<8x1xf32>
    %235 = math.rsqrt %234 : vector<8x1xf32>
    %236 = vector.broadcast %235 : vector<8x1xf32> to vector<8x32xf32>
    %237 = arith.mulf %227, %236 : vector<8x32xf32>
    %238 = vector.broadcast %220 : vector<1x32xf32> to vector<8x32xf32>
    %239 = arith.mulf %237, %238 : vector<8x32xf32>
    %240 = vector.broadcast %221 : vector<1x32xf32> to vector<8x32xf32>
    %241 = arith.addf %239, %240 : vector<8x32xf32>
    %242 = arith.addf %241, %150 : vector<8x32xf32>
    %243 = arith.addf %149, %0 : vector<34x32xf32>
    %c0_167 = arith.constant 0 : index
    %c0_168 = arith.constant 0 : index
    %c0_169 = arith.constant 0 : index
    %c0_170 = arith.constant 0 : index
    %244 = vector.load %arg24[%c0_167, %c0_168, %c0_169, %c0_170] : memref<1x3x32x32xf32, #tpu.memory_space<vmem>>, vector<1x1x32x32xf32>
    %245 = vector.shape_cast %244 : vector<1x1x32x32xf32> to vector<32x32xf32>
    %cst_171 = arith.constant dense<0.000000e+00> : vector<8x32xf32>
    %246 = tpu.matmul %242, %245, %cst_171 {dimension_numbers = #tpu.dot_dimension_numbers<[1], [0], [0], [1], [0, 0, 1, 1], [], []>} : vector<8x32xf32>, vector<32x32xf32>, vector<8x32xf32> -> vector<8x32xf32>
    %c0_172 = arith.constant 0 : index
    %c0_173 = arith.constant 0 : index
    %c0_174 = arith.constant 0 : index
    %c0_175 = arith.constant 0 : index
    %247 = vector.load %arg25[%c0_172, %c0_173, %c0_174, %c0_175] : memref<1x3x1x32xf32, #tpu.memory_space<vmem>>, vector<1x1x1x32xf32>
    %248 = vector.shape_cast %247 : vector<1x1x1x32xf32> to vector<1x32xf32>
    %249 = vector.broadcast %248 : vector<1x32xf32> to vector<8x32xf32>
    %250 = arith.addf %246, %249 : vector<8x32xf32>
    %c0_176 = arith.constant 0 : index
    %c1_177 = arith.constant 1 : index
    %c0_178 = arith.constant 0 : index
    %c0_179 = arith.constant 0 : index
    %251 = vector.load %arg24[%c0_176, %c1_177, %c0_178, %c0_179] : memref<1x3x32x32xf32, #tpu.memory_space<vmem>>, vector<1x1x32x32xf32>
    %252 = vector.shape_cast %251 : vector<1x1x32x32xf32> to vector<32x32xf32>
    %cst_180 = arith.constant dense<0.000000e+00> : vector<34x32xf32>
    %253 = tpu.matmul %243, %252, %cst_180 {dimension_numbers = #tpu.dot_dimension_numbers<[1], [0], [0], [1], [0, 0, 1, 1], [], []>} : vector<34x32xf32>, vector<32x32xf32>, vector<34x32xf32> -> vector<34x32xf32>
    %c0_181 = arith.constant 0 : index
    %c1_182 = arith.constant 1 : index
    %c0_183 = arith.constant 0 : index
    %c0_184 = arith.constant 0 : index
    %254 = vector.load %arg25[%c0_181, %c1_182, %c0_183, %c0_184] : memref<1x3x1x32xf32, #tpu.memory_space<vmem>>, vector<1x1x1x32xf32>
    %255 = vector.shape_cast %254 : vector<1x1x1x32xf32> to vector<1x32xf32>
    %256 = vector.broadcast %255 : vector<1x32xf32> to vector<34x32xf32>
    %257 = arith.addf %253, %256 : vector<34x32xf32>
    %c0_185 = arith.constant 0 : index
    %c2_186 = arith.constant 2 : index
    %c0_187 = arith.constant 0 : index
    %c0_188 = arith.constant 0 : index
    %258 = vector.load %arg24[%c0_185, %c2_186, %c0_187, %c0_188] : memref<1x3x32x32xf32, #tpu.memory_space<vmem>>, vector<1x1x32x32xf32>
    %259 = vector.shape_cast %258 : vector<1x1x32x32xf32> to vector<32x32xf32>
    %cst_189 = arith.constant dense<0.000000e+00> : vector<34x32xf32>
    %260 = tpu.matmul %149, %259, %cst_189 {dimension_numbers = #tpu.dot_dimension_numbers<[1], [0], [0], [1], [0, 0, 1, 1], [], []>} : vector<34x32xf32>, vector<32x32xf32>, vector<34x32xf32> -> vector<34x32xf32>
    %c0_190 = arith.constant 0 : index
    %c2_191 = arith.constant 2 : index
    %c0_192 = arith.constant 0 : index
    %c0_193 = arith.constant 0 : index
    %261 = vector.load %arg25[%c0_190, %c2_191, %c0_192, %c0_193] : memref<1x3x1x32xf32, #tpu.memory_space<vmem>>, vector<1x1x1x32xf32>
    %262 = vector.shape_cast %261 : vector<1x1x1x32xf32> to vector<1x32xf32>
    %263 = vector.broadcast %262 : vector<1x32xf32> to vector<34x32xf32>
    %264 = arith.addf %260, %263 : vector<34x32xf32>
    %c0_194 = arith.constant 0 : index
    %c0_195 = arith.constant 0 : index
    %c0_196 = arith.constant 0 : index
    %265 = vector.load %arg27[%c0_194, %c0_195, %c0_196] : memref<1x1x32xf32, #tpu.memory_space<vmem>>, vector<1x1x32xf32>
    %266 = vector.shape_cast %265 : vector<1x1x32xf32> to vector<1x32xf32>
    %267 = vector.extract_strided_slice %250 {offsets = [0, 0], sizes = [8, 16], strides = [1, 1]} : vector<8x32xf32> to vector<8x16xf32>
    %268 = vector.extract_strided_slice %257 {offsets = [0, 0], sizes = [34, 16], strides = [1, 1]} : vector<34x32xf32> to vector<34x16xf32>
    %cst_197 = arith.constant dense<0.000000e+00> : vector<8x34xf32>
    %269 = tpu.matmul %267, %268, %cst_197 {dimension_numbers = #tpu.dot_dimension_numbers<[1], [1], [0], [0], [0, 0, 1, 0], [], []>} : vector<8x16xf32>, vector<34x16xf32>, vector<8x34xf32> -> vector<8x34xf32>
    %cst_198 = arith.constant 2.500000e-01 : f32
    %270 = vector.broadcast %cst_198 : f32 to vector<8x34xf32>
    %271 = arith.mulf %269, %270 : vector<8x34xf32>
    %cst_199 = arith.constant dense<0xFF800000> : vector<8xf32>
    %272 = vector.multi_reduction <maximumf>, %271, %cst_199 [1] : vector<8x34xf32> to vector<8xf32>
    %273 = vector.shape_cast %272 : vector<8xf32> to vector<8x1xf32>
    %274 = vector.broadcast %273 : vector<8x1xf32> to vector<8x34xf32>
    %275 = arith.subf %271, %274 : vector<8x34xf32>
    %276 = math.exp %275 : vector<8x34xf32>
    %cst_200 = arith.constant dense<0.000000e+00> : vector<8xf32>
    %277 = vector.multi_reduction <add>, %276, %cst_200 [1] : vector<8x34xf32> to vector<8xf32>
    %278 = vector.shape_cast %277 : vector<8xf32> to vector<8x1xf32>
    %279 = vector.broadcast %278 : vector<8x1xf32> to vector<8x34xf32>
    %280 = arith.divf %276, %279 : vector<8x34xf32>
    %281 = vector.extract_strided_slice %264 {offsets = [0, 0], sizes = [34, 16], strides = [1, 1]} : vector<34x32xf32> to vector<34x16xf32>
    %cst_201 = arith.constant dense<0.000000e+00> : vector<8x16xf32>
    %282 = tpu.matmul %280, %281, %cst_201 {dimension_numbers = #tpu.dot_dimension_numbers<[1], [0], [0], [1], [0, 0, 1, 1], [], []>} : vector<8x34xf32>, vector<34x16xf32>, vector<8x16xf32> -> vector<8x16xf32>
    %c0_202 = arith.constant 0 : index
    %c0_203 = arith.constant 0 : index
    %c0_204 = arith.constant 0 : index
    %c0_205 = arith.constant 0 : index
    %283 = vector.load %arg26[%c0_202, %c0_203, %c0_204, %c0_205] : memref<1x2x16x32xf32, #tpu.memory_space<vmem>>, vector<1x1x16x32xf32>
    %284 = vector.shape_cast %283 : vector<1x1x16x32xf32> to vector<16x32xf32>
    %cst_206 = arith.constant dense<0.000000e+00> : vector<8x32xf32>
    %285 = tpu.matmul %282, %284, %cst_206 {dimension_numbers = #tpu.dot_dimension_numbers<[1], [0], [0], [1], [0, 0, 1, 1], [], []>} : vector<8x16xf32>, vector<16x32xf32>, vector<8x32xf32> -> vector<8x32xf32>
    %286 = vector.broadcast %266 : vector<1x32xf32> to vector<8x32xf32>
    %287 = arith.addf %286, %285 : vector<8x32xf32>
    %288 = vector.extract_strided_slice %250 {offsets = [0, 16], sizes = [8, 16], strides = [1, 1]} : vector<8x32xf32> to vector<8x16xf32>
    %289 = vector.extract_strided_slice %257 {offsets = [0, 16], sizes = [34, 16], strides = [1, 1]} : vector<34x32xf32> to vector<34x16xf32>
    %cst_207 = arith.constant dense<0.000000e+00> : vector<8x34xf32>
    %290 = tpu.matmul %288, %289, %cst_207 {dimension_numbers = #tpu.dot_dimension_numbers<[1], [1], [0], [0], [0, 0, 1, 0], [], []>} : vector<8x16xf32>, vector<34x16xf32>, vector<8x34xf32> -> vector<8x34xf32>
    %cst_208 = arith.constant 2.500000e-01 : f32
    %291 = vector.broadcast %cst_208 : f32 to vector<8x34xf32>
    %292 = arith.mulf %290, %291 : vector<8x34xf32>
    %cst_209 = arith.constant dense<0xFF800000> : vector<8xf32>
    %293 = vector.multi_reduction <maximumf>, %292, %cst_209 [1] : vector<8x34xf32> to vector<8xf32>
    %294 = vector.shape_cast %293 : vector<8xf32> to vector<8x1xf32>
    %295 = vector.broadcast %294 : vector<8x1xf32> to vector<8x34xf32>
    %296 = arith.subf %292, %295 : vector<8x34xf32>
    %297 = math.exp %296 : vector<8x34xf32>
    %cst_210 = arith.constant dense<0.000000e+00> : vector<8xf32>
    %298 = vector.multi_reduction <add>, %297, %cst_210 [1] : vector<8x34xf32> to vector<8xf32>
    %299 = vector.shape_cast %298 : vector<8xf32> to vector<8x1xf32>
    %300 = vector.broadcast %299 : vector<8x1xf32> to vector<8x34xf32>
    %301 = arith.divf %297, %300 : vector<8x34xf32>
    %302 = vector.extract_strided_slice %264 {offsets = [0, 16], sizes = [34, 16], strides = [1, 1]} : vector<34x32xf32> to vector<34x16xf32>
    %cst_211 = arith.constant dense<0.000000e+00> : vector<8x16xf32>
    %303 = tpu.matmul %301, %302, %cst_211 {dimension_numbers = #tpu.dot_dimension_numbers<[1], [0], [0], [1], [0, 0, 1, 1], [], []>} : vector<8x34xf32>, vector<34x16xf32>, vector<8x16xf32> -> vector<8x16xf32>
    %c0_212 = arith.constant 0 : index
    %c1_213 = arith.constant 1 : index
    %c0_214 = arith.constant 0 : index
    %c0_215 = arith.constant 0 : index
    %304 = vector.load %arg26[%c0_212, %c1_213, %c0_214, %c0_215] : memref<1x2x16x32xf32, #tpu.memory_space<vmem>>, vector<1x1x16x32xf32>
    %305 = vector.shape_cast %304 : vector<1x1x16x32xf32> to vector<16x32xf32>
    %cst_216 = arith.constant dense<0.000000e+00> : vector<8x32xf32>
    %306 = tpu.matmul %303, %305, %cst_216 {dimension_numbers = #tpu.dot_dimension_numbers<[1], [0], [0], [1], [0, 0, 1, 1], [], []>} : vector<8x16xf32>, vector<16x32xf32>, vector<8x32xf32> -> vector<8x32xf32>
    %307 = arith.addf %287, %306 : vector<8x32xf32>
    %308 = arith.addf %241, %307 : vector<8x32xf32>
    %c0_217 = arith.constant 0 : index
    %c0_218 = arith.constant 0 : index
    %c0_219 = arith.constant 0 : index
    %309 = vector.load %arg29[%c0_217, %c0_218, %c0_219] : memref<1x2x32xf32, #tpu.memory_space<vmem>>, vector<1x2x32xf32>
    %310 = vector.shape_cast %309 : vector<1x2x32xf32> to vector<2x32xf32>
    %311 = vector.extract_strided_slice %310 {offsets = [0, 0], sizes = [1, 32], strides = [1, 1]} : vector<2x32xf32> to vector<1x32xf32>
    %312 = vector.extract_strided_slice %310 {offsets = [1, 0], sizes = [1, 32], strides = [1, 1]} : vector<2x32xf32> to vector<1x32xf32>
    %cst_220 = arith.constant dense<0.000000e+00> : vector<8xf32>
    %313 = vector.multi_reduction <add>, %308, %cst_220 [1] : vector<8x32xf32> to vector<8xf32>
    %314 = vector.shape_cast %313 : vector<8xf32> to vector<8x1xf32>
    %cst_221 = arith.constant 3.200000e+01 : f32
    %315 = vector.broadcast %cst_221 : f32 to vector<8x1xf32>
    %316 = arith.divf %314, %315 : vector<8x1xf32>
    %317 = vector.broadcast %316 : vector<8x1xf32> to vector<8x32xf32>
    %318 = arith.subf %308, %317 : vector<8x32xf32>
    %319 = arith.mulf %318, %318 : vector<8x32xf32>
    %cst_222 = arith.constant dense<0.000000e+00> : vector<8xf32>
    %320 = vector.multi_reduction <add>, %319, %cst_222 [1] : vector<8x32xf32> to vector<8xf32>
    %321 = vector.shape_cast %320 : vector<8xf32> to vector<8x1xf32>
    %cst_223 = arith.constant 3.200000e+01 : f32
    %322 = vector.broadcast %cst_223 : f32 to vector<8x1xf32>
    %323 = arith.divf %321, %322 : vector<8x1xf32>
    %cst_224 = arith.constant 9.99999974E-6 : f32
    %324 = vector.broadcast %cst_224 : f32 to vector<8x1xf32>
    %325 = arith.addf %323, %324 : vector<8x1xf32>
    %326 = math.rsqrt %325 : vector<8x1xf32>
    %327 = vector.broadcast %326 : vector<8x1xf32> to vector<8x32xf32>
    %328 = arith.mulf %318, %327 : vector<8x32xf32>
    %329 = vector.broadcast %311 : vector<1x32xf32> to vector<8x32xf32>
    %330 = arith.mulf %328, %329 : vector<8x32xf32>
    %331 = vector.broadcast %312 : vector<1x32xf32> to vector<8x32xf32>
    %332 = arith.addf %330, %331 : vector<8x32xf32>
    %c0_225 = arith.constant 0 : index
    %c0_226 = arith.constant 0 : index
    %c0_227 = arith.constant 0 : index
    %333 = vector.load %arg31[%c0_225, %c0_226, %c0_227] : memref<1x32x64xf32, #tpu.memory_space<vmem>>, vector<1x32x64xf32>
    %334 = vector.shape_cast %333 : vector<1x32x64xf32> to vector<32x64xf32>
    %cst_228 = arith.constant dense<0.000000e+00> : vector<8x64xf32>
    %335 = tpu.matmul %332, %334, %cst_228 {dimension_numbers = #tpu.dot_dimension_numbers<[1], [0], [0], [1], [0, 0, 1, 1], [], []>} : vector<8x32xf32>, vector<32x64xf32>, vector<8x64xf32> -> vector<8x64xf32>
    %c0_229 = arith.constant 0 : index
    %c0_230 = arith.constant 0 : index
    %c0_231 = arith.constant 0 : index
    %336 = vector.load %arg32[%c0_229, %c0_230, %c0_231] : memref<1x1x64xf32, #tpu.memory_space<vmem>>, vector<1x1x64xf32>
    %337 = vector.shape_cast %336 : vector<1x1x64xf32> to vector<1x64xf32>
    %338 = vector.broadcast %337 : vector<1x64xf32> to vector<8x64xf32>
    %339 = arith.addf %335, %338 : vector<8x64xf32>
    %cst_232 = arith.constant 0.000000e+00 : f32
    %340 = vector.broadcast %cst_232 : f32 to vector<8x64xf32>
    %341 = arith.maximumf %339, %340 : vector<8x64xf32>
    %c0_233 = arith.constant 0 : index
    %c0_234 = arith.constant 0 : index
    %c0_235 = arith.constant 0 : index
    %342 = vector.load %arg33[%c0_233, %c0_234, %c0_235] : memref<1x64x32xf32, #tpu.memory_space<vmem>>, vector<1x64x32xf32>
    %343 = vector.shape_cast %342 : vector<1x64x32xf32> to vector<64x32xf32>
    %cst_236 = arith.constant dense<0.000000e+00> : vector<8x32xf32>
    %344 = tpu.matmul %341, %343, %cst_236 {dimension_numbers = #tpu.dot_dimension_numbers<[1], [0], [0], [1], [0, 0, 1, 1], [], []>} : vector<8x64xf32>, vector<64x32xf32>, vector<8x32xf32> -> vector<8x32xf32>
    %c0_237 = arith.constant 0 : index
    %c0_238 = arith.constant 0 : index
    %c0_239 = arith.constant 0 : index
    %345 = vector.load %arg34[%c0_237, %c0_238, %c0_239] : memref<1x1x32xf32, #tpu.memory_space<vmem>>, vector<1x1x32xf32>
    %346 = vector.shape_cast %345 : vector<1x1x32xf32> to vector<1x32xf32>
    %347 = vector.broadcast %346 : vector<1x32xf32> to vector<8x32xf32>
    %348 = arith.addf %344, %347 : vector<8x32xf32>
    %349 = arith.addf %332, %348 : vector<8x32xf32>
    %c0_240 = arith.constant 0 : index
    %c0_241 = arith.constant 0 : index
    %c0_242 = arith.constant 0 : index
    %350 = vector.load %arg30[%c0_240, %c0_241, %c0_242] : memref<1x2x32xf32, #tpu.memory_space<vmem>>, vector<1x2x32xf32>
    %351 = vector.shape_cast %350 : vector<1x2x32xf32> to vector<2x32xf32>
    %352 = vector.extract_strided_slice %351 {offsets = [0, 0], sizes = [1, 32], strides = [1, 1]} : vector<2x32xf32> to vector<1x32xf32>
    %353 = vector.extract_strided_slice %351 {offsets = [1, 0], sizes = [1, 32], strides = [1, 1]} : vector<2x32xf32> to vector<1x32xf32>
    %cst_243 = arith.constant dense<0.000000e+00> : vector<8xf32>
    %354 = vector.multi_reduction <add>, %349, %cst_243 [1] : vector<8x32xf32> to vector<8xf32>
    %355 = vector.shape_cast %354 : vector<8xf32> to vector<8x1xf32>
    %cst_244 = arith.constant 3.200000e+01 : f32
    %356 = vector.broadcast %cst_244 : f32 to vector<8x1xf32>
    %357 = arith.divf %355, %356 : vector<8x1xf32>
    %358 = vector.broadcast %357 : vector<8x1xf32> to vector<8x32xf32>
    %359 = arith.subf %349, %358 : vector<8x32xf32>
    %360 = arith.mulf %359, %359 : vector<8x32xf32>
    %cst_245 = arith.constant dense<0.000000e+00> : vector<8xf32>
    %361 = vector.multi_reduction <add>, %360, %cst_245 [1] : vector<8x32xf32> to vector<8xf32>
    %362 = vector.shape_cast %361 : vector<8xf32> to vector<8x1xf32>
    %cst_246 = arith.constant 3.200000e+01 : f32
    %363 = vector.broadcast %cst_246 : f32 to vector<8x1xf32>
    %364 = arith.divf %362, %363 : vector<8x1xf32>
    %cst_247 = arith.constant 9.99999974E-6 : f32
    %365 = vector.broadcast %cst_247 : f32 to vector<8x1xf32>
    %366 = arith.addf %364, %365 : vector<8x1xf32>
    %367 = math.rsqrt %366 : vector<8x1xf32>
    %368 = vector.broadcast %367 : vector<8x1xf32> to vector<8x32xf32>
    %369 = arith.mulf %359, %368 : vector<8x32xf32>
    %370 = vector.broadcast %352 : vector<1x32xf32> to vector<8x32xf32>
    %371 = arith.mulf %369, %370 : vector<8x32xf32>
    %372 = vector.broadcast %353 : vector<1x32xf32> to vector<8x32xf32>
    %373 = arith.addf %371, %372 : vector<8x32xf32>
    %c0_248 = arith.constant 0 : index
    %c0_249 = arith.constant 0 : index
    %374 = vector.load %arg35[%c0_248, %c0_249] : memref<2x32xf32, #tpu.memory_space<vmem>>, vector<2x32xf32>
    %375 = vector.extract_strided_slice %374 {offsets = [0, 0], sizes = [1, 32], strides = [1, 1]} : vector<2x32xf32> to vector<1x32xf32>
    %376 = vector.extract_strided_slice %374 {offsets = [1, 0], sizes = [1, 32], strides = [1, 1]} : vector<2x32xf32> to vector<1x32xf32>
    %cst_250 = arith.constant dense<0.000000e+00> : vector<8xf32>
    %377 = vector.multi_reduction <add>, %373, %cst_250 [1] : vector<8x32xf32> to vector<8xf32>
    %378 = vector.shape_cast %377 : vector<8xf32> to vector<8x1xf32>
    %cst_251 = arith.constant 3.200000e+01 : f32
    %379 = vector.broadcast %cst_251 : f32 to vector<8x1xf32>
    %380 = arith.divf %378, %379 : vector<8x1xf32>
    %381 = vector.broadcast %380 : vector<8x1xf32> to vector<8x32xf32>
    %382 = arith.subf %373, %381 : vector<8x32xf32>
    %383 = arith.mulf %382, %382 : vector<8x32xf32>
    %cst_252 = arith.constant dense<0.000000e+00> : vector<8xf32>
    %384 = vector.multi_reduction <add>, %383, %cst_252 [1] : vector<8x32xf32> to vector<8xf32>
    %385 = vector.shape_cast %384 : vector<8xf32> to vector<8x1xf32>
    %cst_253 = arith.constant 3.200000e+01 : f32
    %386 = vector.broadcast %cst_253 : f32 to vector<8x1xf32>
    %387 = arith.divf %385, %386 : vector<8x1xf32>
    %cst_254 = arith.constant 9.99999974E-6 : f32
    %388 = vector.broadcast %cst_254 : f32 to vector<8x1xf32>
    %389 = arith.addf %387, %388 : vector<8x1xf32>
    %390 = math.rsqrt %389 : vector<8x1xf32>
    %391 = vector.broadcast %390 : vector<8x1xf32> to vector<8x32xf32>
    %392 = arith.mulf %382, %391 : vector<8x32xf32>
    %393 = vector.broadcast %375 : vector<1x32xf32> to vector<8x32xf32>
    %394 = arith.mulf %392, %393 : vector<8x32xf32>
    %395 = vector.broadcast %376 : vector<1x32xf32> to vector<8x32xf32>
    %396 = arith.addf %394, %395 : vector<8x32xf32>
    %c0_255 = arith.constant 0 : index
    %c0_256 = arith.constant 0 : index
    %397 = vector.load %arg36[%c0_255, %c0_256] : memref<32x15xf32, #tpu.memory_space<vmem>>, vector<32x15xf32>
    %cst_257 = arith.constant dense<0.000000e+00> : vector<8x15xf32>
    %398 = tpu.matmul %396, %397, %cst_257 {dimension_numbers = #tpu.dot_dimension_numbers<[1], [0], [0], [1], [0, 0, 1, 1], [], []>} : vector<8x32xf32>, vector<32x15xf32>, vector<8x15xf32> -> vector<8x15xf32>
    %c0_258 = arith.constant 0 : index
    %c0_259 = arith.constant 0 : index
    %399 = vector.load %arg37[%c0_258, %c0_259] : memref<1x15xf32, #tpu.memory_space<vmem>>, vector<1x15xf32>
    %400 = vector.broadcast %399 : vector<1x15xf32> to vector<8x15xf32>
    %401 = arith.addf %398, %400 : vector<8x15xf32>
    %c0_260 = arith.constant 0 : index
    %c0_261 = arith.constant 0 : index
    %c0_262 = arith.constant 0 : index
    %402 = vector.load %arg38[%c0_260, %c0_261, %c0_262] : memref<1x8x15xf32, #tpu.memory_space<vmem>>, vector<1x8x15xf32>
    %403 = vector.shape_cast %402 : vector<1x8x15xf32> to vector<8x15xf32>
    %404 = vector.shape_cast %401 : vector<8x15xf32> to vector<1x8x15xf32>
    tpu.vector_store %arg38[%c0_260, %c0_261, %c0_262], %404 {strides = array<i32>} : memref<1x8x15xf32, #tpu.memory_space<vmem>>, vector<1x8x15xf32>,
    return
  }
  func.func @transform_0(%arg0: i32) -> (i32, i32, i32) {
    %c0_i32 = arith.constant 0 : i32
    %c0_i32_0 = arith.constant 0 : i32
    %c0_i32_1 = arith.constant 0 : i32
    return %arg0, %c0_i32, %c0_i32_0 : i32, i32, i32
  }
  func.func @transform_1(%arg0: i32) -> (i32, i32, i32) {
    %c0_i32 = arith.constant 0 : i32
    %c0_i32_0 = arith.constant 0 : i32
    %c0_i32_1 = arith.constant 0 : i32
    return %arg0, %c0_i32, %c0_i32_0 : i32, i32, i32
  }
  func.func @transform_2(%arg0: i32) -> (i32, i32, i32) {
    %c0_i32 = arith.constant 0 : i32
    %c0_i32_0 = arith.constant 0 : i32
    %c0_i32_1 = arith.constant 0 : i32
    return %arg0, %c0_i32, %c0_i32_0 : i32, i32, i32
  }
  func.func @transform_3(%arg0: i32) -> (i32, i32) {
    %c0_i32 = arith.constant 0 : i32
    %c0_i32_0 = arith.constant 0 : i32
    %c0_i32_1 = arith.constant 0 : i32
    return %c0_i32, %c0_i32_0 : i32, i32
  }
  func.func @transform_4(%arg0: i32) -> (i32, i32) {
    %c0_i32 = arith.constant 0 : i32
    %c0_i32_0 = arith.constant 0 : i32
    %c0_i32_1 = arith.constant 0 : i32
    return %c0_i32, %c0_i32_0 : i32, i32
  }
  func.func @transform_5(%arg0: i32) -> (i32, i32) {
    %c0_i32 = arith.constant 0 : i32
    %c0_i32_0 = arith.constant 0 : i32
    %c0_i32_1 = arith.constant 0 : i32
    return %c0_i32, %c0_i32_0 : i32, i32
  }
  func.func @transform_6(%arg0: i32) -> (i32, i32) {
    %c0_i32 = arith.constant 0 : i32
    %c0_i32_0 = arith.constant 0 : i32
    %c0_i32_1 = arith.constant 0 : i32
    return %c0_i32, %c0_i32_0 : i32, i32
  }
  func.func @transform_7(%arg0: i32) -> (i32, i32) {
    %c0_i32 = arith.constant 0 : i32
    %c0_i32_0 = arith.constant 0 : i32
    %c0_i32_1 = arith.constant 0 : i32
    return %c0_i32, %c0_i32_0 : i32, i32
  }
  func.func @transform_8(%arg0: i32) -> (i32, i32) {
    %c0_i32 = arith.constant 0 : i32
    %c0_i32_0 = arith.constant 0 : i32
    %c0_i32_1 = arith.constant 0 : i32
    return %c0_i32, %c0_i32_0 : i32, i32
  }
  func.func @transform_9(%arg0: i32) -> (i32, i32, i32, i32) {
    %c0_i32 = arith.constant 0 : i32
    %c0_i32_0 = arith.constant 0 : i32
    %c0_i32_1 = arith.constant 0 : i32
    %c0_i32_2 = arith.constant 0 : i32
    %c0_i32_3 = arith.constant 0 : i32
    return %c0_i32, %c0_i32_0, %c0_i32_1, %c0_i32_2 : i32, i32, i32, i32
  }
  func.func @transform_10(%arg0: i32) -> (i32, i32, i32, i32) {
    %c0_i32 = arith.constant 0 : i32
    %c0_i32_0 = arith.constant 0 : i32
    %c0_i32_1 = arith.constant 0 : i32
    %c0_i32_2 = arith.constant 0 : i32
    %c0_i32_3 = arith.constant 0 : i32
    return %c0_i32, %c0_i32_0, %c0_i32_1, %c0_i32_2 : i32, i32, i32, i32
  }
  func.func @transform_11(%arg0: i32) -> (i32, i32, i32, i32) {
    %c0_i32 = arith.constant 0 : i32
    %c0_i32_0 = arith.constant 0 : i32
    %c0_i32_1 = arith.constant 0 : i32
    %c0_i32_2 = arith.constant 0 : i32
    %c0_i32_3 = arith.constant 0 : i32
    return %c0_i32, %c0_i32_0, %c0_i32_1, %c0_i32_2 : i32, i32, i32, i32
  }
  func.func @transform_12(%arg0: i32) -> (i32, i32, i32) {
    %c0_i32 = arith.constant 0 : i32
    %c0_i32_0 = arith.constant 0 : i32
    %c0_i32_1 = arith.constant 0 : i32
    %c0_i32_2 = arith.constant 0 : i32
    return %c0_i32, %c0_i32_0, %c0_i32_1 : i32, i32, i32
  }
  func.func @transform_13(%arg0: i32) -> (i32, i32, i32) {
    %c0_i32 = arith.constant 0 : i32
    %c0_i32_0 = arith.constant 0 : i32
    %c0_i32_1 = arith.constant 0 : i32
    %c0_i32_2 = arith.constant 0 : i32
    return %c0_i32, %c0_i32_0, %c0_i32_1 : i32, i32, i32
  }
  func.func @transform_14(%arg0: i32) -> (i32, i32, i32) {
    %c0_i32 = arith.constant 0 : i32
    %c0_i32_0 = arith.constant 0 : i32
    %c0_i32_1 = arith.constant 0 : i32
    %c0_i32_2 = arith.constant 0 : i32
    return %c0_i32, %c0_i32_0, %c0_i32_1 : i32, i32, i32
  }
  func.func @transform_15(%arg0: i32) -> (i32, i32, i32) {
    %c0_i32 = arith.constant 0 : i32
    %c0_i32_0 = arith.constant 0 : i32
    %c0_i32_1 = arith.constant 0 : i32
    %c0_i32_2 = arith.constant 0 : i32
    return %c0_i32, %c0_i32_0, %c0_i32_1 : i32, i32, i32
  }
  func.func @transform_16(%arg0: i32) -> (i32, i32, i32) {
    %c0_i32 = arith.constant 0 : i32
    %c0_i32_0 = arith.constant 0 : i32
    %c0_i32_1 = arith.constant 0 : i32
    %c0_i32_2 = arith.constant 0 : i32
    return %c0_i32, %c0_i32_0, %c0_i32_1 : i32, i32, i32
  }
  func.func @transform_17(%arg0: i32) -> (i32, i32, i32) {
    %c0_i32 = arith.constant 0 : i32
    %c0_i32_0 = arith.constant 0 : i32
    %c0_i32_1 = arith.constant 0 : i32
    %c0_i32_2 = arith.constant 0 : i32
    return %c0_i32, %c0_i32_0, %c0_i32_1 : i32, i32, i32
  }
  func.func @transform_18(%arg0: i32) -> (i32, i32, i32) {
    %c0_i32 = arith.constant 0 : i32
    %c0_i32_0 = arith.constant 0 : i32
    %c0_i32_1 = arith.constant 0 : i32
    %c0_i32_2 = arith.constant 0 : i32
    return %c0_i32, %c0_i32_0, %c0_i32_1 : i32, i32, i32
  }
  func.func @transform_19(%arg0: i32) -> (i32, i32, i32, i32) {
    %c0_i32 = arith.constant 0 : i32
    %c0_i32_0 = arith.constant 0 : i32
    %c0_i32_1 = arith.constant 0 : i32
    %c0_i32_2 = arith.constant 0 : i32
    %c0_i32_3 = arith.constant 0 : i32
    return %c0_i32, %c0_i32_0, %c0_i32_1, %c0_i32_2 : i32, i32, i32, i32
  }
  func.func @transform_20(%arg0: i32) -> (i32, i32, i32, i32) {
    %c0_i32 = arith.constant 0 : i32
    %c0_i32_0 = arith.constant 0 : i32
    %c0_i32_1 = arith.constant 0 : i32
    %c0_i32_2 = arith.constant 0 : i32
    %c0_i32_3 = arith.constant 0 : i32
    return %c0_i32, %c0_i32_0, %c0_i32_1, %c0_i32_2 : i32, i32, i32, i32
  }
  func.func @transform_21(%arg0: i32) -> (i32, i32, i32, i32) {
    %c0_i32 = arith.constant 0 : i32
    %c0_i32_0 = arith.constant 0 : i32
    %c0_i32_1 = arith.constant 0 : i32
    %c0_i32_2 = arith.constant 0 : i32
    %c0_i32_3 = arith.constant 0 : i32
    return %c0_i32, %c0_i32_0, %c0_i32_1, %c0_i32_2 : i32, i32, i32, i32
  }
  func.func @transform_22(%arg0: i32) -> (i32, i32, i32) {
    %c0_i32 = arith.constant 0 : i32
    %c0_i32_0 = arith.constant 0 : i32
    %c0_i32_1 = arith.constant 0 : i32
    %c0_i32_2 = arith.constant 0 : i32
    return %c0_i32, %c0_i32_0, %c0_i32_1 : i32, i32, i32
  }
  func.func @transform_23(%arg0: i32) -> (i32, i32, i32, i32) {
    %c0_i32 = arith.constant 0 : i32
    %c0_i32_0 = arith.constant 0 : i32
    %c0_i32_1 = arith.constant 0 : i32
    %c0_i32_2 = arith.constant 0 : i32
    %c0_i32_3 = arith.constant 0 : i32
    return %c0_i32, %c0_i32_0, %c0_i32_1, %c0_i32_2 : i32, i32, i32, i32
  }
  func.func @transform_24(%arg0: i32) -> (i32, i32, i32, i32) {
    %c0_i32 = arith.constant 0 : i32
    %c0_i32_0 = arith.constant 0 : i32
    %c0_i32_1 = arith.constant 0 : i32
    %c0_i32_2 = arith.constant 0 : i32
    %c0_i32_3 = arith.constant 0 : i32
    return %c0_i32, %c0_i32_0, %c0_i32_1, %c0_i32_2 : i32, i32, i32, i32
  }
  func.func @transform_25(%arg0: i32) -> (i32, i32, i32, i32) {
    %c0_i32 = arith.constant 0 : i32
    %c0_i32_0 = arith.constant 0 : i32
    %c0_i32_1 = arith.constant 0 : i32
    %c0_i32_2 = arith.constant 0 : i32
    %c0_i32_3 = arith.constant 0 : i32
    return %c0_i32, %c0_i32_0, %c0_i32_1, %c0_i32_2 : i32, i32, i32, i32
  }
  func.func @transform_26(%arg0: i32) -> (i32, i32, i32) {
    %c0_i32 = arith.constant 0 : i32
    %c0_i32_0 = arith.constant 0 : i32
    %c0_i32_1 = arith.constant 0 : i32
    %c0_i32_2 = arith.constant 0 : i32
    return %c0_i32, %c0_i32_0, %c0_i32_1 : i32, i32, i32
  }
  func.func @transform_27(%arg0: i32) -> (i32, i32, i32) {
    %c0_i32 = arith.constant 0 : i32
    %c0_i32_0 = arith.constant 0 : i32
    %c0_i32_1 = arith.constant 0 : i32
    %c0_i32_2 = arith.constant 0 : i32
    return %c0_i32, %c0_i32_0, %c0_i32_1 : i32, i32, i32
  }
  func.func @transform_28(%arg0: i32) -> (i32, i32, i32) {
    %c0_i32 = arith.constant 0 : i32
    %c0_i32_0 = arith.constant 0 : i32
    %c0_i32_1 = arith.constant 0 : i32
    %c0_i32_2 = arith.constant 0 : i32
    return %c0_i32, %c0_i32_0, %c0_i32_1 : i32, i32, i32
  }
  func.func @transform_29(%arg0: i32) -> (i32, i32, i32) {
    %c0_i32 = arith.constant 0 : i32
    %c0_i32_0 = arith.constant 0 : i32
    %c0_i32_1 = arith.constant 0 : i32
    %c0_i32_2 = arith.constant 0 : i32
    return %c0_i32, %c0_i32_0, %c0_i32_1 : i32, i32, i32
  }
  func.func @transform_30(%arg0: i32) -> (i32, i32, i32) {
    %c0_i32 = arith.constant 0 : i32
    %c0_i32_0 = arith.constant 0 : i32
    %c0_i32_1 = arith.constant 0 : i32
    %c0_i32_2 = arith.constant 0 : i32
    return %c0_i32, %c0_i32_0, %c0_i32_1 : i32, i32, i32
  }
  func.func @transform_31(%arg0: i32) -> (i32, i32, i32) {
    %c0_i32 = arith.constant 0 : i32
    %c0_i32_0 = arith.constant 0 : i32
    %c0_i32_1 = arith.constant 0 : i32
    %c0_i32_2 = arith.constant 0 : i32
    return %c0_i32, %c0_i32_0, %c0_i32_1 : i32, i32, i32
  }
  func.func @transform_32(%arg0: i32) -> (i32, i32, i32) {
    %c0_i32 = arith.constant 0 : i32
    %c0_i32_0 = arith.constant 0 : i32
    %c0_i32_1 = arith.constant 0 : i32
    %c0_i32_2 = arith.constant 0 : i32
    return %c0_i32, %c0_i32_0, %c0_i32_1 : i32, i32, i32
  }
  func.func @transform_33(%arg0: i32) -> (i32, i32, i32) {
    %c0_i32 = arith.constant 0 : i32
    %c0_i32_0 = arith.constant 0 : i32
    %c0_i32_1 = arith.constant 0 : i32
    %c0_i32_2 = arith.constant 0 : i32
    return %c0_i32, %c0_i32_0, %c0_i32_1 : i32, i32, i32
  }
  func.func @transform_34(%arg0: i32) -> (i32, i32) {
    %c0_i32 = arith.constant 0 : i32
    %c0_i32_0 = arith.constant 0 : i32
    %c0_i32_1 = arith.constant 0 : i32
    return %c0_i32, %c0_i32_0 : i32, i32
  }
  func.func @transform_35(%arg0: i32) -> (i32, i32) {
    %c0_i32 = arith.constant 0 : i32
    %c0_i32_0 = arith.constant 0 : i32
    %c0_i32_1 = arith.constant 0 : i32
    return %c0_i32, %c0_i32_0 : i32, i32
  }
  func.func @transform_36(%arg0: i32) -> (i32, i32) {
    %c0_i32 = arith.constant 0 : i32
    %c0_i32_0 = arith.constant 0 : i32
    %c0_i32_1 = arith.constant 0 : i32
    return %c0_i32, %c0_i32_0 : i32, i32
  }
  func.func @transform_37(%arg0: i32) -> (i32, i32, i32) {
    %c0_i32 = arith.constant 0 : i32
    %c0_i32_0 = arith.constant 0 : i32
    %c0_i32_1 = arith.constant 0 : i32
    return %arg0, %c0_i32, %c0_i32_0 : i32, i32, i32
  }
}

</mosaic_0001>

<bundles_post_ra>
// kernel: _lambda_.3
= control target key start
LH: loop header
LB: loop body
LE: loop exit
PB: predicated region body
PF: predicated region fallthrough
CT: control target
= control target key end

     0   :  { %s677_s18 = smov 0   ;;  %s719_s0 = inlined_call_operand.vmem [shape: f32[2,32,48], index: 0, kind: input, shape index: {}]   ;;  %s720_s1 = inlined_call_operand.vmem [shape: f32[2,48,8], index: 1, kind: input, shape index: {}]   ;;  %s721_s2 = inlined_call_operand.vmem [shape: f32[2,1,8], index: 2, kind: input, shape index: {}]   ;;  %s722_s3 = inlined_call_operand.vmem [shape: f32[8,32], index: 3, kind: input, shape index: {}]   ;;  %s723_s4 = inlined_call_operand.vmem [shape: f32[1,32], index: 4, kind: input, shape index: {}]   ;;  %s724_s5 = inlined_call_operand.vmem [shape: f32[2,32,32], index: 5, kind: output, shape index: {}]  }
   0x1 LB: > { %s565_s19 = sadd.s32 4294967295, %s645_s18   ;;  %p569_p0 = scmp.ge.s32.totalorder %s645_s18, 1  ;;  %s645_s18 = sphi %s677_s18, %s15_s18  }
   0x2   : > { %p205_p1 = scmp.lt.s32.totalorder %s645_s18, 3 }
   0x4   : > { %p206_p2 = pnand %p569_p0, %p205_p1 }
   0x5   : > { %p241_p3 = scmp.lt.s32.totalorder (!%p206_p2), %s565_s19, 1 }
   0x6   : > { %209 = sbr.rel (%p206_p2) target bundleno = 430 (0x1ae), region = 40 }
   0xb   : > { %s726_s19 = smov (!%p241_p3, %s565_s19), 1  ;;  %vm276_vm0 = vcmask 392192   ;;  %v378_v10 = vld [vmem:[%s722_s3] sm:$0xff]  ;;  %vm386_vm1 = vcmask 64512   ;;  %vm484_vm2 = vcmask 261120  }
   0xc   : > { %s630_s20 = smul.u32 48, %s726_s19  ;;  %s587_s21 = sshll.u32 %s726_s19, 5  ;;  %622 = vmatprep.subr.mxu1 %v378_v10  ;;  %v580_v24 = vld [vmem:[%s723_s4] ss:$0 sm:$0xff] }
   0xd   : > { %s245_s24 = scalar_lea.vmem %s719_s0, %s587_s21  ;;  %623 = vmatpush3.msra.mxu1 %v378_v10  ;;  %s253_s7 = scalar_lea.vmem %s721_s2, %s726_s19 }
   0xe   : > { %s250_s27 = scalar_lea.vmem %s720_s1, %s630_s20  ;;  %v259_v0 = vld [vmem:[%s245_s24] sm:$0xff]  ;;  %v260_v7 = vld [vmem:[%s245_s24 + $0x8] sm:$0xff]  ;;  %v261_v8 = vld [vmem:[%s245_s24 + $0x10] sm:$0xff]  ;;  %s258_s12 = scalar_lea.vmem %s724_s5, %s587_s21 }
   0xf   : > { %v268_v1 = vld [vmem:[%s250_s27 + $0x28] sm:$0xff]  ;;  %v267_v2 = vld [vmem:[%s250_s27 + $0x20] sm:$0xff]  ;;  %616 = vmatprep.mubr.msk.f32.mxu0 %vm276_vm0, %v259_v0  ;;  %v266_v3 = vld [vmem:[%s250_s27 + $0x18] sm:$0xff] }
  0x10   : > { %604 = vmatprep.subr.mxu0 %v268_v1  ;;  %v265_v4 = vld [vmem:[%s250_s27 + $0x10] sm:$0xff]  ;;  %v264_v5 = vld [vmem:[%s250_s27 + $0x8] sm:$0xff]  ;;  %v263_v6 = vld [vmem:[%s250_s27] sm:$0xff] }
  0x11   : > { %605 = vmatpush3.msra.mxu0 %v268_v1  ;;  %v262_v9 = vld [vmem:[%s245_s24 + $0x18] sm:$0xff]  ;;  %v575_v11 = vld [vmem:[%s253_s7] ss:$0 sm:$0xff] }
  0x12   : > { %606 = vmatprep.subr.mxu0 %v267_v2 }
  0x13   : > { %607 = vmatpush3.msra.mxu0 %v267_v2 }
  0x14   : > { %608 = vmatprep.subr.mxu0 %v266_v3 }
  0x15   : > { %609 = vmatpush3.msra.mxu0 %v266_v3 }
  0x16   : > { %610 = vmatprep.subr.mxu0 %v265_v4 }
  0x17   : > { %611 = vmatpush3.msra.mxu0 %v265_v4 }
  0x18   : > { %612 = vmatprep.subr.mxu0 %v264_v5 }
  0x19   : > { %613 = vmatpush3.msra.mxu0 %v264_v5 }
  0x1a   : > { %614 = vmatprep.subr.mxu0 %v263_v6 }
  0x1b   : > { %615 = vmatpush3.msra.mxu0 %v263_v6 }
  0x1c   : > { %617 = vmatmul.mubr.msk.f32.vlgmr.msra.gmra.mxu0 %vm276_vm0, %v260_v7 }
  0x1d   : > { %619 = vmatprep.mubr.msk.f32.mxu0 %vm276_vm0, %v261_v8 }
  0x20   : > { %620 = vmatmul.mubr.msk.f32.gmra.mxu0 %vm276_vm0, %v262_v9 }
  0xdc   : > { %v618_v12 = vpop.f32.mrf.mxu0 }
  0xdd   : > { %v361_v13 = vadd.f32 %v618_v12, %v575_v11 }
  0xde   : > { %v355_v14 = vpop.f32.mrf.mxu0 }
  0xdf   : > { %v356_v15 = vadd.f32 %v575_v11, %v355_v14  ;;  %v375_v18 = vmax.f32 %v361_v13, 0.0 }
  0xe0   : > { %v621_v16 = vpop.f32.mrf.mxu0 }
  0xe1   : > { %v374_v17 = vmax.f32 %v356_v15, 0.0  ;;  %v371_v19 = vadd.f32 %v621_v16, %v575_v11 }
  0xe2   : > { %v365_v20 = vpop.f32.mrf.mxu0 }
  0xe3   : > { %v366_v21 = vadd.f32 %v575_v11, %v365_v20  ;;  %624 = vmatprep.mubr.msk.f32.mxu1 %vm386_vm1, %v374_v17  ;;  %v377_v23 = vmax.f32 %v371_v19, 0.0 }
  0xe4   : > { %625 = vmatmul.mubr.msk.f32.vlgmr.msra.gmra.mxu1 %vm386_vm1, %v375_v18 }
  0xe5   : > { %v376_v22 = vmax.f32 %v366_v21, 0.0 }
  0xe7   : > { %627 = vmatprep.mubr.msk.f32.mxu1 %vm386_vm1, %v376_v22 }
  0xe8   : > { %628 = vmatmul.mubr.msk.f32.gmra.mxu1 %vm386_vm1, %v377_v23 }
 0x1a4   : > { %v626_v25 = vpop.f32.mrf.mxu1 }
 0x1a5   : > { %v471_v26 = vadd.f32 %v626_v25, %v580_v24 }
 0x1a6   : > { %v465_v27 = vpop.f32.mrf.mxu1 }
 0x1a7   : > { %486 = vst.msk [vmem:[%s258_s12 + $0x8] sm:$0xff] %vm484_vm2, %v471_v26  ;;  %v466_v28 = vadd.f32 %v580_v24, %v465_v27 }
 0x1a8   : > { %v629_v29 = vpop.f32.mrf.mxu1 }
 0x1a9   : > { %485 = vst.msk [vmem:[%s258_s12] sm:$0xff] %vm484_vm2, %v466_v28  ;;  %v481_v30 = vadd.f32 %v629_v29, %v580_v24 }
 0x1aa   : > { %v475_v31 = vpop.f32.mrf.mxu1 }
 0x1ab   : > { %488 = vst.msk [vmem:[%s258_s12 + $0x18] sm:$0xff] %vm484_vm2, %v481_v30  ;;  %v476_v32 = vadd.f32 %v580_v24, %v475_v31 }
 0x1ad   : > { %487 = vst.msk [vmem:[%s258_s12 + $0x10] sm:$0xff] %vm484_vm2, %v476_v32 }
 0x1ae PF: > { %s15_s18 = sadd.s32 1, %s645_s18  }
 0x1af   : > { %p12_p4 = scmp.ge.s32.totalorder %s15_s18, 4  }
 0x1b1   :  { %14 = sbr.rel (!%p12_p4) target bundleno = 1 (0x1), region = 76 }

// kernel: _lambda_.4
= control target key start
LH: loop header
LB: loop body
LE: loop exit
PB: predicated region body
PF: predicated region fallthrough
CT: control target
= control target key end

     0   :  { %s3296_s0 = inlined_call_operand.vmem [shape: f32[2,8,14], index: 0, kind: input, shape index: {}]   ;;  %s3297_s1 = inlined_call_operand.vmem [shape: f32[2,1,14], index: 1, kind: input, shape index: {}]   ;;  %s3298_s2 = inlined_call_operand.vmem [shape: f32[2,1,10], index: 2, kind: input, shape index: {}]   ;;  %s3299_s3 = inlined_call_operand.vmem [shape: f32[1,32], index: 3, kind: input, shape index: {}]   ;;  %s3300_s4 = inlined_call_operand.vmem [shape: f32[10,32], index: 4, kind: input, shape index: {}]   ;;  %s3301_s5 = inlined_call_operand.vmem [shape: f32[14,32], index: 5, kind: input, shape index: {}]   ;;  %s3302_s6 = inlined_call_operand.hbm [shape: f32[1,32], index: 6, kind: input, shape index: {}]   ;;  %s3303_s7 = inlined_call_operand.vmem [shape: f32[14,32], index: 7, kind: input, shape index: {}]   ;;  %s3304_s8 = inlined_call_operand.hbm [shape: f32[1,32], index: 8, kind: input, shape index: {}]   ;;  %s3305_s9 = inlined_call_operand.vmem [shape: f32[1,3,32,32], index: 9, kind: input, shape index: {}]   ;;  %s3306_s10 = inlined_call_operand.vmem [shape: f32[1,3,1,32], index: 10, kind: input, shape index: {}]   ;;  %s3307_s11 = inlined_call_operand.vmem [shape: f32[1,2,16,32], index: 11, kind: input, shape index: {}]   ;;  %s3308_s12 = inlined_call_operand.hbm [shape: f32[1,1,32], index: 12, kind: input, shape index: {}]   ;;  %s3309_s13 = inlined_call_operand.vmem [shape: f32[1,2,32], index: 13, kind: input, shape index: {}]   ;;  %s3310_s14 = inlined_call_operand.vmem [shape: f32[1,32,64], index: 14, kind: input, shape index: {}]   ;;  %s3311_s15 = inlined_call_operand.hbm [shape: f32[1,1,64], index: 15, kind: input, shape index: {}]   ;;  %s3312_s16 = inlined_call_operand.vmem [shape: f32[1,64,32], index: 16, kind: input, shape index: {}]   ;;  %s3313_s17 = inlined_call_operand.hbm [shape: f32[1,1,32], index: 17, kind: input, shape index: {}]   ;;  %s3314_s18 = inlined_call_operand.vmem [shape: f32[1,2,32], index: 18, kind: input, shape index: {}]   ;;  %s3315_s19 = inlined_call_operand.vmem [shape: f32[32,64], index: 19, kind: input, shape index: {}]   ;;  %s3316_s20 = inlined_call_operand.hbm [shape: f32[1,64], index: 20, kind: input, shape index: {}]   ;;  %s3317_s21 = inlined_call_operand.vmem [shape: f32[2,1,64], index: 21, kind: output, shape index: {}]  }
   0x1   :  { %3321 = sst [smem:[#allocation17_spill]] %s3296_s0 }
   0x2   :  { %3322 = sst [smem:[#allocation18_spill]] %s3297_s1 }
   0x3   :  { %3323 = sst [smem:[#allocation19_spill]] %s3298_s2 }
   0x4   :  { %3324 = sst [smem:[#allocation20_spill]] %s3299_s3 }
   0x5   :  { %3325 = sst [smem:[#allocation21_spill]] %s3300_s4 }
   0x6   :  { %3326 = sst [smem:[#allocation22_spill]] %s3301_s5 }
   0x7   :  { %3327 = sst [smem:[#allocation23_spill]] %s3302_s6 }
   0x8   :  { %3328 = sst [smem:[#allocation24_spill]] %s3304_s8 }
   0x9   :  { %3329 = sst [smem:[#allocation25_spill]] %s3308_s12 }
   0xa   :  { %26 = vsyncpa [#allocation4], 0 }
   0xb   :  { %27 = vsyncpa [#allocation6], 0 }
   0xc   :  { %28 = vsyncpa [#allocation9], 0 }
   0xd   :  { %29 = vsyncpa [#allocation12], 0  ;;  %s2928_s2 = smov 0  }
   0xe LB: > { %s2809_s25 = smov [#allocation5]   ;;  %s2934_s27 = sadd.s32 4294967295, %s2807_s2   ;;  %s2807_s2 = sphi %s2928_s2, %s35_s2  }
   0xf   : > { %s558_s26 = sshll.u32 %s2809_s25, 4  ;;  %p2265_p0 = scmp.ge.s32.totalorder %s2807_s2, 1  ;;  %s559_s26 = int_to_ptr.vmem [resolvable:$true] %s558_s26 }
  0x10   : > { %p522_p1 = scmp.lt.s32.totalorder %s2807_s2, 3  ;;  %p3320_p2 = scmp.eq.s32.totalorder %s2934_s27, 0 }
  0x11   : > { %s2810_s28 = smov [#allocation8]   ;;  %s2811_s0 = smov [#allocation3]  }
  0x12   : > { %p2939_p3 = pnand %p2265_p0, %p522_p1  ;;  %s595_s29 = sshll.u32 %s2810_s28, 4  ;;  %s2945_s29 = int_to_ptr.vmem [resolvable:$true] %s595_s29 }
  0x13   : > { %s544_s4 = sshll.u32 %s2811_s0, 4  ;;  %s2812_s5 = smov [#allocation7]   ;;  %s2953_s4 = int_to_ptr.vmem [resolvable:$true] %s544_s4 }
  0x14   : > { %p2559_p4 = pneg %p2939_p3  ;;  %s578_s22 = sshll.u32 %s2812_s5, 4  ;;  %s2955_s22 = int_to_ptr.vmem [resolvable:$true] %s578_s22 }
  0x15   : > { %s2640_s1 = scalar_lea.vmem %s559_s26, 16  ;;  %s2647_s24 = scalar_lea.vmem %s559_s26, 32 }
  0x16   : > { %p2949_p5 = pnand %p3320_p2, %p2559_p4  ;;  %p2641_p7 = scmp.ne.s32.totalorder %s559_s26, %s2640_s1 }
  0x17   : > { %p2648_p10 = scmp.lt.s32.totalorder %s559_s26, %s559_s26  ;;  %p2649_p11 = scmp.lt.s32.totalorder %s2647_s24, %s2640_s1 }
  0x18   : > { %p2959_p6 = pneg %p2949_p5 }
  0x19   : > { %p2650_p12 = por %p2649_p11, %p2648_p10 }
  0x1a   : > { %p2643_p8 = pnand %p2641_p7, %p2959_p6 }
  0x1c   : > { %p2644_p9 = pneg %p2643_p8 }
  0x1e   : > { %p2651_p13 = pnand %p2650_p12, %p2644_p9 }
  0x20   : > { %2654 = shalt.err (!%p2651_p13)
}
  0x21   : > { %s3333_s8 = sld [smem:[#allocation24_spill]]  ;;  %s2666_s0 = scalar_lea.vmem %s2945_s29, 16 }
  0x22   : > { %p2667_p0 = scmp.ne.s32.totalorder %s2945_s29, %s2666_s0  ;;  %s2673_s5 = scalar_lea.vmem %s2945_s29, 32 }
  0x23   : > { %p2674_p7 = scmp.lt.s32.totalorder %s2945_s29, %s2945_s29  ;;  %p2675_p8 = scmp.lt.s32.totalorder %s2673_s5, %s2666_s0 }
  0x24   : > { %p2669_p1 = pnand %p2667_p0, %p2959_p6 }
  0x25   : > { %p2676_p9 = por %p2675_p8, %p2674_p7 }
  0x26   : > { %p2670_p4 = pneg %p2669_p1 }
  0x27   : > { %2565 = dma.hbm_to_vmem [thread:$0]  (!%p2949_p5), %s3333_s8, 16, %s559_s26, [#allocation6]  }
  0x28   : > { %p2677_p10 = pnand %p2676_p9, %p2670_p4 }
  0x2a   : > { %2680 = shalt.err (!%p2677_p10)
}
  0x2b   : > { %2571 = dma.hbm_to_vmem [thread:$0]  (!%p2949_p5), %s3311_s15, 16, %s2945_s29, [#allocation9]  }
  0x2c   : > { %s2692_s26 = scalar_lea.vmem %s2953_s4, 16  ;;  %s2699_s25 = scalar_lea.vmem %s2953_s4, 32 }
  0x2d   : > { %p2693_p11 = scmp.ne.s32.totalorder %s2953_s4, %s2692_s26  ;;  %p2700_p0 = scmp.lt.s32.totalorder %s2953_s4, %s2953_s4 }
  0x2e   : > { %p2701_p1 = scmp.lt.s32.totalorder %s2699_s25, %s2692_s26 }
  0x2f   : > { %p2695_p12 = pnand %p2693_p11, %p2959_p6 }
  0x30   : > { %p2702_p4 = por %p2701_p1, %p2700_p0 }
  0x31   : > { %p2696_p13 = pneg %p2695_p12 }
  0x33   : > { %p2703_p7 = pnand %p2702_p4, %p2696_p13 }
  0x35   : > { %2706 = shalt.err (!%p2703_p7)
}
  0x36   : > { %s3334_s6 = sld [smem:[#allocation23_spill]]  ;;  %s2718_s29 = scalar_lea.vmem %s2955_s22, 16 }
  0x37   : > { %p2719_p8 = scmp.ne.s32.totalorder %s2955_s22, %s2718_s29  ;;  %s2725_s5 = scalar_lea.vmem %s2955_s22, 32 }
  0x38   : > { %p2726_p11 = scmp.lt.s32.totalorder %s2955_s22, %s2955_s22  ;;  %p2727_p12 = scmp.lt.s32.totalorder %s2725_s5, %s2718_s29 }
  0x39   : > { %p2721_p9 = pnand %p2719_p8, %p2959_p6 }
  0x3a   : > { %p2728_p13 = por %p2727_p12, %p2726_p11 }
  0x3b   : > { %p2722_p10 = pneg %p2721_p9 }
  0x3c   : > { %2562 = dma.hbm_to_vmem [thread:$0]  (!%p2949_p5), %s3334_s6, 16, %s2953_s4, [#allocation4]  }
  0x3d   : > { %p2729_p0 = pnand %p2728_p13, %p2722_p10 }
  0x3f   : > { %2732 = shalt.err (!%p2729_p0)
}
  0x40   : > { %s3335_s12 = sld [smem:[#allocation25_spill]]  ;;  %s2813_s4 = smov [#allocation10]  }
  0x41   : > { %s609_s26 = sshll.u32 %s2813_s4, 4  ;;  %s2814_s25 = smov [#allocation11]   ;;  %s610_s26 = int_to_ptr.vmem [resolvable:$true] %s609_s26 }
  0x42   : > { %s626_s28 = sshll.u32 %s2814_s25, 4  ;;  %s2744_s0 = scalar_lea.vmem %s610_s26, 16  ;;  %s627_s28 = int_to_ptr.vmem [resolvable:$true] %s626_s28 }
  0x43   : > { %p2745_p1 = scmp.ne.s32.totalorder %s610_s26, %s2744_s0  ;;  %s2751_s29 = scalar_lea.vmem %s610_s26, 32 }
  0x44   : > { %p2752_p8 = scmp.lt.s32.totalorder %s610_s26, %s610_s26  ;;  %p2753_p9 = scmp.lt.s32.totalorder %s2751_s29, %s2744_s0 }
  0x45   : > { %p2747_p4 = pnand %p2745_p1, %p2959_p6 }
  0x46   : > { %2568 = dma.hbm_to_vmem [thread:$0]  (!%p2949_p5), %s3335_s12, 16, %s2955_s22, [#allocation6]  }
  0x47   : > { %p2748_p7 = pneg %p2747_p4  ;;  %p2754_p10 = por %p2753_p9, %p2752_p8 }
  0x49   : > { %p2755_p11 = pnand %p2754_p10, %p2748_p7 }
  0x4b   : > { %2758 = shalt.err (!%p2755_p11)
}
  0x4c   : > { %2574 = dma.hbm_to_vmem [thread:$0]  (!%p2949_p5), %s3313_s17, 16, %s610_s26, [#allocation9]  }
  0x4d   : > { %s2770_s1 = scalar_lea.vmem %s627_s28, 16  ;;  %s2777_s24 = scalar_lea.vmem %s627_s28, 32 }
  0x4e   : > { %p2771_p12 = scmp.ne.s32.totalorder %s627_s28, %s2770_s1  ;;  %p2778_p1 = scmp.lt.s32.totalorder %s627_s28, %s627_s28 }
  0x4f   : > { %p2779_p4 = scmp.lt.s32.totalorder %s2777_s24, %s2770_s1 }
  0x50   : > { %p2773_p13 = pnand %p2771_p12, %p2959_p6 }
  0x51   : > { %p2780_p2 = por %p2779_p4, %p2778_p1 }
  0x52   : > { %p2774_p0 = pneg %p2773_p13 }
  0x54   : > { %p2781_p8 = pnand %p2780_p2, %p2774_p0 }
  0x56   : > { %2784 = shalt.err (!%p2781_p8)
}
  0x57   : > { %2577 = dma.hbm_to_vmem [thread:$0]  (!%p2949_p5), %s3316_s20, 16, %s627_s28, [#allocation12]  }
  0x58   : > { %658 = sbr.rel (%p2939_p3) target bundleno = 3175 (0xc67), region = 104  ;;  %p3336_p7 = scmp.eq.s32.totalorder (!%p2939_p3), %s2934_s27, 0 }
  0x5d   : > { %2790 = dma.done.wait (%p3336_p7), [#allocation4], 16   ;;  %p3337_p6 = pmov %p3336_p7 }
  0x5f   : > { %2792 = vsyncadd (%p3337_p6), [#allocation4], 4294967280  ;;  %p3338_p9 = pmov %p3337_p6 }
  0x60   : > { %p3339_p2 = pmov %p3337_p6 }
  0x61   : > { %2794 = dma.done.wait (%p3338_p9), [#allocation6], 32  }
  0x62   : > { %2796 = vsyncadd (%p3339_p2), [#allocation6], 4294967264  ;;  %p3340_p10 = pmov %p3339_p2 }
  0x63   : > { %p3341_p5 = pmov %p3339_p2 }
  0x64   : > { %2798 = dma.done.wait (%p3340_p10), [#allocation9], 32  }
  0x65   : > { %2800 = vsyncadd (%p3341_p5), [#allocation9], 4294967264  ;;  %p3342_p3 = pmov %p3339_p2 }
  0x66   : > { %p3343_p11 = pmov %p3339_p2 }
  0x67   : > { %2802 = dma.done.wait (%p3342_p3), [#allocation12], 16  }
  0x68   : > { %2804 = vsyncadd (%p3343_p11), [#allocation12], 4294967280  ;;  %p741_p12 = scmp.lt.s32.totalorder %s2934_s27, 1  ;;  %v2815_v0 = vmov 0.0   ;;  %vm2816_vm0 = vmmov 0   ;;  %vm768_vm1 = vcmask 1045504  }
  0x69   : > { %2405 = vmatprep.subr.mxu0 %v2815_v0  ;;  %2412 = vmatprep.subr.mxu1 %v2815_v0  ;;  %s3344_s26 = sld [smem:[#allocation17_spill]]  ;;  %v844_v2 = vld [vmem:[%s3303_s7 + $0x8] sm:$0x3f]  ;;  %v843_v4 = vld [vmem:[%s3303_s7] sm:$0xff]  ;;  %vm764_vm2 = vcmask 113664   ;;  %vm923_vm3 = vcmask 253952  }
  0x6a   : > { %2409 = vmatprep.mubr.msk.f32.mxu0 %vm2816_vm0, %v2815_v0  ;;  %2416 = vmatprep.mubr.msk.f32.mxu1 %vm2816_vm0, %v2815_v0  ;;  %s3351_s27 = smov (!%p741_p12, %s2934_s27), 1  ;;  %s3345_s5 = sld [smem:[#allocation18_spill]]  ;;  %v938_v8 = vld [vmem:[%s3305_s9 + $0x18] sm:$0xff]  ;;  %v937_v10 = vld [vmem:[%s3305_s9 + $0x10] sm:$0xff]  ;;  %v936_v12 = vld [vmem:[%s3305_s9 + $0x8] sm:$0xff]  ;;  %vm926_vm4 = vcmask 261120  }
  0x6b   : > { %s2280_s3 = sshll.u32 %s3351_s27, 3  ;;  %s3346_s4 = sld [smem:[#allocation22_spill]]  ;;  %2413 = vmatpush3.msk.msra.mxu1 %vm768_vm1, %v844_v2  ;;  %v2292_v9 = vld [vmem:[%s3305_s9 + $0x38] sm:$0xff]  ;;  %v2291_v11 = vld [vmem:[%s3305_s9 + $0x30] sm:$0xff]  ;;  %v2290_v13 = vld [vmem:[%s3305_s9 + $0x28] sm:$0xff]  ;;  %vm1210_vm5 = vcmask 130048  }
  0x6c   : > { %2414 = vmatprep.subr.mxu1 %v2815_v0  ;;  %s3347_s12 = sld [smem:[#allocation20_spill]]  ;;  %v935_v14 = vld [vmem:[%s3305_s9] sm:$0xff]  ;;  %v2300_v16 = vld [vmem:[%s3305_s9 + $0x58] sm:$0xff]  ;;  %v2281_v17 = vld [vmem:[#allocation3] ss:$0 sm:$0xff]  ;;  %s2817_s0 = smov 112  }
  0x6d   : > { %2415 = vmatpush3.msra.mxu1 %v843_v4  ;;  %v2289_v15 = vld [vmem:[%s3305_s9 + $0x20] sm:$0xff]  ;;  %v845_v18 = vld [vmem:[#allocation5] sm:$0x1]  ;;  %v2298_v32 = vld [vmem:[%s3305_s9 + $0x48] sm:$0xff]  ;;  %vm1338_vm6 = vcmask 1041408   ;;  %s3349_s25 = sld [smem:[#allocation19_spill]]  ;;  %s753_s23 = scalar_lea.vmem %s3317_s21, %s3351_s27 }
  0x6e   : > { %2430 = vmatprep.subr.mxu1 %v2292_v9  ;;  %v2299_v31 = vld [vmem:[%s3305_s9 + $0x50] sm:$0xff]  ;;  %v2297_v33 = vld [vmem:[%s3305_s9 + $0x40] sm:$0xff]  ;;  %vm1308_vm7 = vcmask 80896   ;;  %vm1312_vm8 = vcmask 74752   ;;  %vm1806_vm9 = vcmask 254976   ;;  %vm1952_vm10 = vcmask 523264  }
  0x6f   : > { %s744_s28 = scalar_lea.vmem %s3344_s26, %s2280_s3  ;;  %v2294_v34 = vld [vmem:[%s3306_s10 + $0x1] ss:$0 sm:$0xff]  ;;  %v2286_v38 = vld [vmem:[%s3306_s10] ss:$0 sm:$0xff]  ;;  %v2302_v43 = vld [vmem:[%s3306_s10 + $0x2] ss:$0 sm:$0xff] }
  0x70   : > { %s747_s22 = scalar_lea.vmem %s3345_s5, %s3351_s27  ;;  %v754_v5 = vld [vmem:[%s744_s28] sm:$0xff]  ;;  %s3348_s5 = sld [smem:[#allocation21_spill]]  ;;  %vm2136_vm11 = vcmask 516096  }
  0x71   : > { %v756_v1 = vld [vmem:[%s3346_s4 + $0x8] sm:$0x3f]  ;;  %v755_v3 = vld [vmem:[%s3346_s4] sm:$0xff] }
  0x72   : > { %2406 = vmatpush3.msk.msra.mxu0 %vm768_vm1, %v756_v1  ;;  %v842_v6 = vld [vmem:[%s747_s22] sm:$0x1] }
  0x73   : > { %2407 = vmatprep.subr.mxu0 %v2815_v0  ;;  %2417 = vmatmul.mubr.msk.f32.vlgmr.msra.gmra.mxu1 %vm764_vm2, %v842_v6  ;;  %v922_v7 = vld [vmem:[%s3347_s12] sm:$0x1]  ;;  %s750_s30 = scalar_lea.vmem %s3349_s25, %s3351_s27 }
  0x74   : > { %2408 = vmatpush3.msra.mxu0 %v755_v3  ;;  %924 = vst.msk [vmem:[#allocation2] sm:$0x1] %vm923_vm3, %v922_v7  ;;  %2431 = vmatpush3.msra.mxu1 %v2292_v9  ;;  %v2309_v53 = vld [vmem:[%s750_s30] ss:$0 sm:$0xff] }
  0x75   : > { %2410 = vmatmul.mubr.msk.f32.vlgmr.msra.gmra.mxu0 %vm764_vm2, %v754_v5  ;;  %2419 = vmatprep.subr.mxu0 %v938_v8 }
  0x76   : > { %2420 = vmatpush3.msra.mxu0 %v938_v8  ;;  %2432 = vmatprep.subr.mxu1 %v2291_v11  ;;  %v930_v25 = vld [vmem:[%s3348_s5] sm:$0xff]  ;;  %v931_v26 = vld [vmem:[%s3348_s5 + $0x8] sm:$0x3] }
  0x77   : > { %2421 = vmatprep.subr.mxu0 %v937_v10  ;;  %2433 = vmatpush3.msra.mxu1 %v2291_v11 }
  0x78   : > { %2422 = vmatpush3.msra.mxu0 %v937_v10  ;;  %2434 = vmatprep.subr.mxu1 %v2290_v13 }
  0x79   : > { %2423 = vmatprep.subr.mxu0 %v936_v12  ;;  %2435 = vmatpush3.msra.mxu1 %v2290_v13 }
  0x7a   : > { %2424 = vmatpush3.msra.mxu0 %v936_v12  ;;  %2436 = vmatprep.subr.mxu1 %v2289_v15 }
  0x7b   : > { %2425 = vmatprep.subr.mxu0 %v935_v14  ;;  %2437 = vmatpush3.msra.mxu1 %v2289_v15  ;;  %v1418_v15 = vld [vmem:[%s3307_s11 + $0x8] sm:$0xff] }
  0x7c   : > { %2426 = vmatpush3.msra.mxu0 %v935_v14 }
  0x7d   : > { %2441 = vmatprep.subr.mxu0 %v2300_v16 }
 0x133   : > { %v918_v20 = vpop.f32.mrf.mxu1 }
 0x134   : > { %v919_v22 = vadd.f32 %v918_v20, %v845_v18 }
 0x135   : > { %v838_v19 = vpop.f32.mrf.mxu0  ;;  %v2418_v24 = vpop.f32.mrf.mxu1 }
 0x136   : > { %v839_v21 = vadd.f32 %v2281_v17, %v838_v19  ;;  %925 = vst.msk [vmem:[#allocation2 + $0x1] sm:$0x1] %vm923_vm3, %v919_v22 }
 0x137   : > { %v2411_v23 = vpop.f32.mrf.mxu0 }
 0x138   : > { %927 = vst.msk [vmem:[#allocation2 + $0x2] sm:$0xff] %vm926_vm4, %v839_v21 }
 0x13f   : > { %v3112_v27 = vld [vmem:[#allocation2] sm:$0xff]  ;;  %v3114_v28 = vld [vmem:[#allocation2 + $0x8] sm:$0x3] }
 0x140   : > { %v933_v29 = vadd.f32 %v930_v25, %v3112_v27  ;;  %v934_v30 = vadd.f32 %v931_v26, %v3114_v28 }
 0x142   : > { %2427 = vmatprep.mubr.msk.f32.mxu0 %vm926_vm4, %v933_v29  ;;  %2438 = vmatprep.mubr.msk.f32.mxu1 %vm926_vm4, %v933_v29 }
 0x143   : > { %2428 = vmatmul.mubr.msk.f32.vlgmr.msra.gmra.mxu0 %vm926_vm4, %v934_v30  ;;  %2439 = vmatmul.mubr.msk.f32.vlgmr.msra.gmra.mxu1 %vm926_vm4, %v934_v30 }
 0x144   : > { %2442 = vmatpush3.msra.mxu0 %v2300_v16  ;;  %2449 = vmatprep.mubr.msk.f32.mxu0 %vm926_vm4, %v3112_v27  ;;  %v1417_v16 = vld [vmem:[%s3307_s11] sm:$0xff] }
 0x145   : > { %2443 = vmatprep.subr.mxu0 %v2299_v31 }
 0x146   : > { %2444 = vmatpush3.msra.mxu0 %v2299_v31 }
 0x147   : > { %2445 = vmatprep.subr.mxu0 %v2298_v32 }
 0x148   : > { %2446 = vmatpush3.msra.mxu0 %v2298_v32 }
 0x149   : > { %2447 = vmatprep.subr.mxu0 %v2297_v33 }
 0x14a   : > { %2448 = vmatpush3.msra.mxu0 %v2297_v33 }
 0x14b   : > { %2450 = vmatmul.mubr.msk.f32.vlgmr.msra.gmra.mxu0 %vm926_vm4, %v3114_v28 }
 0x203   : > { %v2429_v35 = vpop.f32.mrf.mxu0  ;;  %v2440_v36 = vpop.f32.mrf.mxu1 }
 0x204   : > { %v1112_v37 = vadd.f32 %v2440_v36, %v2294_v34  ;;  %v1024_v45 = vadd.f32 %v2429_v35, %v2286_v38 }
 0x205   : > { %v1018_v39 = vpop.f32.mrf.mxu0  ;;  %v1106_v40 = vpop.f32.mrf.mxu1 }
 0x206   : > { %v1019_v41 = vadd.f32 %v2286_v38, %v1018_v39  ;;  %v1107_v42 = vadd.f32 %v2294_v34, %v1106_v40  ;;  %2452 = vmatprep.subr.msk.mxu1 %vm1210_vm5, %v1112_v37 }
 0x207   : > { %2453 = vmatpush3.xpose.msk.msra.mxu1 %vm1210_vm5, %v1112_v37 }
 0x208   : > { %1512 = vrot.lane.b32.xlu1 %v1107_v42, %s2817_s0  ;;  %2454 = vmatprep.subr.msk.mxu1 %vm1210_vm5, %v1107_v42 }
 0x209   : > { %2456 = vmatprep.mubr.msk.f32.mxu1 %vm1210_vm5, %v1019_v41 }
 0x20b   : > { %v2451_v44 = vpop.f32.mrf.mxu0  ;;  %2455 = vmatpush3.xpose.msk.msra.mxu1 %vm1210_vm5, %v1107_v42 }
 0x20c   : > { %v3150_v46 = vadd.f32 %v2451_v44, %v2302_v43  ;;  %1508 = vrot.lane.b32.xlu1 %v1019_v41, %s2817_s0  ;;  %2466 = vmatprep.subr.mxu1 %v1418_v15 }
 0x20d   : > { %v1200_v47 = vpop.f32.mrf.mxu0 }
 0x20e   : > { %v3153_v48 = vadd.f32 %v2302_v43, %v1200_v47  ;;  %2459 = vmatprep.subr.msk.mxu0 %vm1338_vm6, %v3150_v46  ;;  %2457 = vmatmul.mubr.msk.f32.vlgmr.msra.gmra.mxu1 %vm1210_vm5, %v1024_v45  ;;  %v2324_v43 = vld [vmem:[%s3307_s11 + $0x18] sm:$0xff] }
 0x20f   : > { %2460 = vmatpush3.msk.msra.mxu0 %vm1338_vm6, %v3150_v46  ;;  %2467 = vmatpush3.msra.mxu1 %v1418_v15  ;;  %v1942_v15 = vld [vmem:[%s3312_s16 + $0x28] sm:$0xff] }
 0x210   : > { %2461 = vmatprep.subr.mxu0 %v3153_v48  ;;  %2468 = vmatprep.subr.mxu1 %v1417_v16 }
 0x211   : > { %2462 = vmatpush3.msra.mxu0 %v3153_v48  ;;  %2469 = vmatpush3.msra.mxu1 %v1417_v16  ;;  %v1941_v16 = vld [vmem:[%s3312_s16 + $0x20] sm:$0xff] }
 0x27a   : > { %v1513_v6 = vpop.permute.xlu1 %1512 }
 0x27e   : > { %v1509_v7 = vpop.permute.xlu1 %1508 }
 0x2ce   : > { %v2458_v49 = vpop.f32.mrf.mxu1 }
 0x2cf   : > { %v1299_v51 = vmul.f32 0.25, %v2458_v49 }
 0x2d0   : > { %v1289_v50 = vpop.f32.mrf.mxu1 }
 0x2d1   : > { %v1298_v52 = vmul.f32 0.25, %v1289_v50  ;;  %v1307_v56 = vadd.f32 %v2309_v53, %v1299_v51 }
 0x2d3   : > { %v1306_v54 = vadd.f32 %v2309_v53, %v1298_v52  ;;  %v1313_v57 = vsel %vm1312_vm8, %v1307_v56, -inf }
 0x2d5   : > { %v1309_v55 = vsel %vm1308_vm7, %v1306_v54, -inf }
 0x2d6   : > { %1310 = vmax.xlane.f32.xlu0 %v1309_v55 }
 0x2da   : > { %1314 = vmax.xlane.f32.xlu0 %v1313_v57 }
 0x2f0   : > { %1514 = vrot.lane.b32.xlu0 %v1112_v37, %s2817_s0 }
 0x35f   : > { %v1311_v58 = vpop.xlane.xlu0 %1310 }
 0x360   : > { %v1316_v59 = vsub.f32 %v1306_v54, %v1311_v58 }
 0x362   : > { %v1318_v62 = vmul.f32 1.442695, %v1316_v59 }
 0x363   : > { %v1315_v60 = vpop.xlane.xlu0 %1314 }
 0x364   : > { %v1317_v61 = vsub.f32 %v1307_v56, %v1315_v60 }
 0x366   : > { %v1320_v63 = vmul.f32 1.442695, %v1317_v61 }
 0x367   : > { %v1515_v1 = vpop.permute.xlu0 %1514 }
 0x368   : > { %2607 = vpow2.f32 %v1320_v63  ;;  %2473 = vmatprep.subr.msk.mxu0 %vm1210_vm5, %v1515_v1 }
 0x369   : > { %2609 = vpow2.f32 %v1318_v62 }
 0x375   : > { %v2608_v2 = vpop.eup %2607 }
 0x376   : > { %v1325_v3 = vsel %vm1312_vm8, %v2608_v2, 0.0  ;;  %v2610_v4 = vpop.eup %2609 }
 0x377   : > { %1326 = vadd.xlane.f32.xlu1 %v1325_v3  ;;  %v1322_v5 = vsel %vm1308_vm7, %v2610_v4, 0.0 }
 0x37b   : > { %1323 = vadd.xlane.f32.xlu1 %v1322_v5 }
 0x38c   : > { %1510 = vrot.lane.b32.xlu1 %v1024_v45, %s2817_s0 }
 0x400   : > { %v1327_v8 = vpop.xlane.xlu1 %1326 }
 0x401   : > { %2611 = vrcp.f32 %v1327_v8 }
 0x404   : > { %v1324_v9 = vpop.xlane.xlu1 %1323 }
 0x405   : > { %2613 = vrcp.f32 %v1324_v9 }
 0x408   : > { %v1511_v14 = vpop.permute.xlu1 %1510 }
 0x40e   : > { %v2612_v10 = vpop.eup %2611 }
 0x40f   : > { %v1331_v13 = vmul.f32 %v2612_v10, %v2608_v2 }
 0x412   : > { %v2614_v11 = vpop.eup %2613 }
 0x413   : > { %v1329_v12 = vmul.f32 %v2614_v11, %v2610_v4  ;;  %v1844_v11 = vld [vmem:[%s3310_s14 + $0x8] sm:$0xff] }
 0x415   : > { %2463 = vmatprep.mubr.msk.f32.mxu0 %vm1308_vm7, %v1329_v12  ;;  %v1843_v12 = vld [vmem:[%s3310_s14] sm:$0xff] }
 0x416   : > { %2464 = vmatmul.mubr.msk.f32.vlgmr.msra.gmra.mxu0 %vm1308_vm7, %v1331_v13  ;;  %v1944_v13 = vld [vmem:[%s3312_s16 + $0x38] sm:$0xff] }
 0x417   : > { %2474 = vmatpush3.xpose.msk.msra.mxu0 %vm1210_vm5, %v1515_v1  ;;  %2477 = vmatprep.mubr.msk.f32.mxu0 %vm1210_vm5, %v1509_v7 }
 0x418   : > { %2475 = vmatprep.subr.msk.mxu0 %vm1210_vm5, %v1513_v6 }
 0x41b   : > { %2476 = vmatpush3.xpose.msk.msra.mxu0 %vm1210_vm5, %v1513_v6 }
 0x41e   : > { %2478 = vmatmul.mubr.msk.f32.vlgmr.msra.gmra.mxu0 %vm1210_vm5, %v1511_v14  ;;  %v1943_v14 = vld [vmem:[%s3312_s16 + $0x30] sm:$0xff] }
 0x4d6   : > { %v2465_v17 = vpop.f32.mrf.mxu0 }
 0x4d8   : > { %v1408_v18 = vpop.f32.mrf.mxu0 }
 0x4d9   : > { %2470 = vmatprep.mubr.msk.f32.mxu1 %vm1210_vm5, %v1408_v18 }
 0x4da   : > { %2471 = vmatmul.mubr.msk.f32.vlgmr.msra.gmra.mxu1 %vm1210_vm5, %v2465_v17 }
 0x4de   : > { %v2479_v19 = vpop.f32.mrf.mxu0 }
 0x4df   : > { %v1600_v20 = vmul.f32 0.25, %v2479_v19 }
 0x4e0   : > { %v1590_v21 = vpop.f32.mrf.mxu0 }
 0x4e1   : > { %v1599_v22 = vmul.f32 0.25, %v1590_v21  ;;  %v1602_v23 = vadd.f32 %v2309_v53, %v1600_v20 }
 0x4e3   : > { %v1606_v24 = vsel %vm1312_vm8, %v1602_v23, -inf  ;;  %v1601_v25 = vadd.f32 %v2309_v53, %v1599_v22  ;;  %v2315_v53 = vld [vmem:[#allocation7] ss:$0 sm:$0xff] }
 0x4e4   : > { %1607 = vmax.xlane.f32.xlu1 %v1606_v24 }
 0x4e5   : > { %v1603_v26 = vsel %vm1308_vm7, %v1601_v25, -inf }
 0x4e6   : > { %1604 = vmax.xlane.f32.xlu0 %v1603_v26  ;;  %v1802_v26 = vld [vmem:[%s3309_s13] sm:$0x3] }
 0x4f5   : > { %1626 = vrot.lane.b32.xlu1 %v3153_v48, %s2817_s0  ;;  %v2323_v48 = vld [vmem:[%s3307_s11 + $0x10] sm:$0xff] }
 0x56d   : > { %v1608_v29 = vpop.xlane.xlu1 %1607 }
 0x56e   : > { %v1610_v30 = vsub.f32 %v1602_v23, %v1608_v29  ;;  %v1831_v23 = vlaneseq }
 0x56f   : > { %v1605_v31 = vpop.xlane.xlu0 %1604 }
 0x570   : > { %v1613_v32 = vmul.f32 1.442695, %v1610_v30  ;;  %v1609_v33 = vsub.f32 %v1601_v25, %v1605_v31  ;;  %v3237_v24 = vshrl.u32 %v1831_v23, 7 }
 0x571   : > { %v1627_v42 = vpop.permute.xlu1 %1626 }
 0x572   : > { %2615 = vpow2.f32 %v1613_v32  ;;  %v1611_v34 = vmul.f32 1.442695, %v1609_v33  ;;  %v1833_v25 = vsub.s32 0, %v3237_v24  ;;  %v1839_v31 = vsub.s32 1, %v3237_v24 }
 0x574   : > { %2617 = vpow2.f32 %v1611_v34  ;;  %v1834_v30 = vrot.slane %v1802_v26, %v1833_v25 }
 0x57f   : > { %v2616_v35 = vpop.eup %2615 }
 0x580   : > { %v1618_v36 = vsel %vm1312_vm8, %v2616_v35, 0.0 }
 0x581   : > { %v2618_v37 = vpop.eup %2617  ;;  %1619 = vadd.xlane.f32.xlu0 %v1618_v36  ;;  %v1840_v36 = vrot.slane %v1802_v26, %v1839_v31 }
 0x582   : > { %v1615_v38 = vsel %vm1308_vm7, %v2618_v37, 0.0 }
 0x585   : > { %1616 = vadd.xlane.f32.xlu0 %v1615_v38 }
 0x59a   : > { %v2472_v49 = vpop.f32.mrf.mxu1 }
 0x59b   : > { %1628 = vrot.lane.b32.xlu0 %v3150_v46, %s2817_s0  ;;  %v1507_v54 = vadd.f32 %v2472_v49, %v2315_v53 }
 0x59c   : > { %v1491_v50 = vpop.f32.mrf.mxu1 }
 0x59d   : > { %v1506_v56 = vadd.f32 %v2315_v53, %v1491_v50 }
 0x60a   : > { %v1620_v39 = vpop.xlane.xlu0 %1619 }
 0x60b   : > { %2619 = vrcp.f32 %v1620_v39 }
 0x60e   : > { %v1617_v40 = vpop.xlane.xlu0 %1616 }
 0x60f   : > { %2621 = vrcp.f32 %v1617_v40  ;;  %v1940_v40 = vld [vmem:[%s3312_s16 + $0x18] sm:$0xff] }
 0x612   : > { %v1629_v41 = vpop.permute.xlu0 %1628 }
 0x613   : > { %2480 = vmatprep.subr.msk.mxu1 %vm1338_vm6, %v1629_v41 }
 0x614   : > { %2481 = vmatpush3.msk.msra.mxu1 %vm1338_vm6, %v1629_v41  ;;  %v1939_v41 = vld [vmem:[%s3312_s16 + $0x10] sm:$0xff] }
 0x615   : > { %2482 = vmatprep.subr.mxu1 %v1627_v42 }
 0x616   : > { %2483 = vmatpush3.msra.mxu1 %v1627_v42  ;;  %v1938_v42 = vld [vmem:[%s3312_s16 + $0x8] sm:$0xff] }
 0x617   : > { %2487 = vmatprep.subr.mxu1 %v2324_v43 }
 0x618   : > { %v2620_v44 = vpop.eup %2619 }
 0x619   : > { %v1624_v47 = vmul.f32 %v2620_v44, %v2616_v35  ;;  %v2327_v44 = vld [vmem:[#allocation8] ss:$0 sm:$0xff] }
 0x61c   : > { %v2622_v45 = vpop.eup %2621 }
 0x61d   : > { %v1622_v46 = vmul.f32 %v2622_v45, %v2618_v37 }
 0x61f   : > { %2484 = vmatprep.mubr.msk.f32.mxu1 %vm1308_vm7, %v1622_v46 }
 0x620   : > { %2485 = vmatmul.mubr.msk.f32.vlgmr.msra.gmra.mxu1 %vm1308_vm7, %v1624_v47 }
 0x621   : > { %2488 = vmatpush3.msra.mxu1 %v2324_v43  ;;  %v1937_v43 = vld [vmem:[%s3312_s16] sm:$0xff] }
 0x622   : > { %2489 = vmatprep.subr.mxu1 %v2323_v48 }
 0x623   : > { %2490 = vmatpush3.msra.mxu1 %v2323_v48 }
 0x624   : > { %2505 = vmatprep.subr.mxu1 %v1944_v13 }
 0x6e0   : > { %v2486_v51 = vpop.f32.mrf.mxu1 }
 0x6e2   : > { %v1705_v52 = vpop.f32.mrf.mxu1 }
 0x6e3   : > { %2491 = vmatprep.mubr.msk.f32.mxu1 %vm1210_vm5, %v1705_v52  ;;  %v2330_v52 = vld [vmem:[#allocation10] ss:$0 sm:$0xff] }
 0x6e4   : > { %2492 = vmatmul.mubr.msk.f32.vlgmr.msra.gmra.mxu1 %vm1210_vm5, %v2486_v51 }
 0x6e5   : > { %2506 = vmatpush3.msra.mxu1 %v1944_v13 }
 0x6e6   : > { %2507 = vmatprep.subr.mxu1 %v1943_v14 }
 0x6e7   : > { %2508 = vmatpush3.msra.mxu1 %v1943_v14 }
 0x6e8   : > { %2509 = vmatprep.subr.mxu1 %v1942_v15 }
 0x6e9   : > { %2510 = vmatpush3.msra.mxu1 %v1942_v15 }
 0x6ea   : > { %2511 = vmatprep.subr.mxu1 %v1941_v16 }
 0x6eb   : > { %2512 = vmatpush3.msra.mxu1 %v1941_v16 }
 0x6ec   : > { %2513 = vmatprep.subr.mxu1 %v1940_v40 }
 0x6ed   : > { %2514 = vmatpush3.msra.mxu1 %v1940_v40 }
 0x6ee   : > { %2515 = vmatprep.subr.mxu1 %v1939_v41 }
 0x6ef   : > { %2516 = vmatpush3.msra.mxu1 %v1939_v41 }
 0x6f0   : > { %2517 = vmatprep.subr.mxu1 %v1938_v42 }
 0x6f1   : > { %2518 = vmatpush3.msra.mxu1 %v1938_v42 }
 0x6f2   : > { %2519 = vmatprep.subr.mxu1 %v1937_v43 }
 0x6f3   : > { %2520 = vmatpush3.msra.mxu1 %v1937_v43 }
 0x7a4   : > { %v2493_v55 = vpop.f32.mrf.mxu1 }
 0x7a5   : > { %v1799_v57 = vadd.f32 %v2493_v55, %v1507_v54 }
 0x7a6   : > { %v1789_v58 = vpop.f32.mrf.mxu1 }
 0x7a7   : > { %v1798_v59 = vadd.f32 %v1789_v58, %v1506_v56  ;;  %v1801_v60 = vadd.f32 %v1799_v57, %v3114_v28  ;;  %v1845_v28 = vld [vmem:[%s3310_s14 + $0x10] sm:$0xff] }
 0x7a9   : > { %v1807_v61 = vsel %vm1806_vm9, %v1801_v60, 0.0  ;;  %v1800_v62 = vadd.f32 %v1798_v59, %v3112_v27  ;;  %v1846_v27 = vld [vmem:[%s3310_s14 + $0x18] sm:$0xff] }
 0x7aa   : > { %1808 = vadd.xlane.f32.xlu0 %v1807_v61  ;;  %2494 = vmatprep.subr.mxu0 %v1846_v27 }
 0x7ab   : > { %v1803_v63 = vsel %vm926_vm4, %v1800_v62, 0.0  ;;  %2495 = vmatpush3.msra.mxu0 %v1846_v27 }
 0x7ac   : > { %1804 = vadd.xlane.f32.xlu1 %v1803_v63  ;;  %2496 = vmatprep.subr.mxu0 %v1845_v28  ;;  %v2060_v63 = vld [vmem:[%s3315_s19 + $0x10] sm:$0xff] }
 0x7ad   : > { %2497 = vmatpush3.msra.mxu0 %v1845_v28 }
 0x7ae   : > { %2498 = vmatprep.subr.mxu0 %v1844_v11 }
 0x7af   : > { %2499 = vmatpush3.msra.mxu0 %v1844_v11 }
 0x7b0   : > { %2500 = vmatprep.subr.mxu0 %v1843_v12 }
 0x7b1   : > { %2501 = vmatpush3.msra.mxu0 %v1843_v12 }
 0x7b2   : > { %2524 = vmatprep.subr.mxu0 %v2815_v0 }
 0x833   : > { %v1809_v1 = vpop.xlane.xlu0 %1808 }
 0x834   : > { %v1812_v2 = vmul.f32 0.03125, %v1809_v1  ;;  %v2059_v1 = vld [vmem:[%s3315_s19 + $0x8] sm:$0xff] }
 0x835   : > { %v1805_v3 = vpop.xlane.xlu1 %1804 }
 0x836   : > { %v1814_v4 = vsub.f32 %v1801_v60, %v1812_v2  ;;  %v1811_v5 = vmul.f32 0.03125, %v1805_v3  ;;  %v2058_v2 = vld [vmem:[%s3315_s19] sm:$0xff] }
 0x838   : > { %v1813_v6 = vsub.f32 %v1800_v62, %v1811_v5  ;;  %v1816_v7 = vmul.f32 %v1814_v4, %v1814_v4  ;;  %v2061_v62 = vld [vmem:[%s3315_s19 + $0x18] sm:$0xff] }
 0x83a   : > { %v1820_v8 = vsel %vm1806_vm9, %v1816_v7, 0.0  ;;  %v1815_v9 = vmul.f32 %v1813_v6, %v1813_v6 }
 0x83b   : > { %1821 = vadd.xlane.f32.xlu1 %v1820_v8 }
 0x83c   : > { %v1817_v10 = vsel %vm926_vm4, %v1815_v9, 0.0 }
 0x83d   : > { %1818 = vadd.xlane.f32.xlu0 %v1817_v10 }
 0x8c4   : > { %v1822_v17 = vpop.xlane.xlu1 %1821 }
 0x8c5   : > { %v1824_v18 = vmul.f32 0.03125, %v1822_v17 }
 0x8c6   : > { %v1819_v19 = vpop.xlane.xlu0 %1818 }
 0x8c7   : > { %v1826_v20 = vadd.f32 1e-05, %v1824_v18  ;;  %v1823_v21 = vmul.f32 0.03125, %v1819_v19 }
 0x8c9   : > { %2623 = vrsqrt.f32 %v1826_v20  ;;  %v1825_v22 = vadd.f32 1e-05, %v1823_v21 }
 0x8cb   : > { %2625 = vrsqrt.f32 %v1825_v22 }
 0x8d6   : > { %v2624_v29 = vpop.eup %2623 }
 0x8d7   : > { %v1830_v32 = vmul.f32 %v2624_v29, %v1814_v4 }
 0x8d8   : > { %v2626_v33 = vpop.eup %2625 }
 0x8d9   : > { %v1829_v34 = vmul.f32 %v2626_v33, %v1813_v6  ;;  %v1836_v35 = vmul.f32 %v1834_v30, %v1830_v32  ;;  %v2034_v6 = vld [vmem:[%s3314_s18] sm:$0x3] }
 0x8da   : > { %v2051_v7 = vrot.slane %v2034_v6, %v1833_v25  ;;  %v2056_v9 = vrot.slane %v2034_v6, %v1839_v31 }
 0x8db   : > { %v1835_v37 = vmul.f32 %v1834_v30, %v1829_v34  ;;  %v1842_v39 = vadd.f32 %v1840_v36, %v1836_v35 }
 0x8dd   : > { %v1841_v38 = vadd.f32 %v1840_v36, %v1835_v37 }
 0x8df   : > { %2502 = vmatprep.mubr.msk.f32.mxu0 %vm926_vm4, %v1841_v38 }
 0x8e0   : > { %2503 = vmatmul.mubr.msk.f32.vlgmr.msra.gmra.mxu0 %vm926_vm4, %v1842_v39 }
 0x8e1   : > { %2532 = vmatprep.mubr.msk.f32.mxu0 %vm2816_vm0, %v2815_v0  ;;  %2525 = vmatpush3.msra.mxu0 %v2061_v62 }
 0x8e2   : > { %2526 = vmatprep.subr.mxu0 %v2815_v0 }
 0x8e3   : > { %2527 = vmatpush3.msra.mxu0 %v2060_v63 }
 0x8e4   : > { %2528 = vmatprep.subr.mxu0 %v2815_v0 }
 0x8e5   : > { %2529 = vmatpush3.msra.mxu0 %v2059_v1 }
 0x8e6   : > { %2530 = vmatprep.subr.mxu0 %v2815_v0  ;;  %v2062_v0 = vld [vmem:[#allocation11] sm:$0x1] }
 0x8e7   : > { %2531 = vmatpush3.msra.mxu0 %v2058_v2 }
 0x9a0   : > { %v2504_v45 = vpop.f32.mrf.mxu0 }
 0x9a1   : > { %v1932_v46 = vadd.f32 %v2504_v45, %v2327_v44 }
 0x9a2   : > { %v1926_v47 = vpop.f32.mrf.mxu0 }
 0x9a3   : > { %v1927_v48 = vadd.f32 %v2327_v44, %v1926_v47  ;;  %v1936_v50 = vmax.f32 %v1932_v46, 0.0 }
 0x9a5   : > { %v1935_v49 = vmax.f32 %v1927_v48, 0.0 }
 0x9a7   : > { %2521 = vmatprep.mubr.msk.f32.mxu1 %vm1952_vm10, %v1935_v49 }
 0x9a8   : > { %2522 = vmatmul.mubr.msk.f32.vlgmr.msra.gmra.mxu1 %vm1952_vm10, %v1936_v50 }
 0xa68   : > { %v2523_v51 = vpop.f32.mrf.mxu1 }
 0xa6a   : > { %v2025_v53 = vpop.f32.mrf.mxu1 }
 0xa6b   : > { %v2026_v54 = vadd.f32 %v2330_v52, %v2025_v53 }
 0xa6d   : > { %v2033_v55 = vadd.f32 %v2026_v54, %v1841_v38 }
 0xa6f   : > { %v2035_v56 = vsel %vm926_vm4, %v2033_v55, 0.0 }
 0xa70   : > { %2036 = vadd.xlane.f32.xlu0 %v2035_v56 }
 0xaf9   : > { %v2037_v57 = vpop.xlane.xlu0 %2036 }
 0xafa   : > { %v2038_v58 = vmul.f32 0.03125, %v2037_v57 }
 0xafc   : > { %v2039_v59 = vsub.f32 %v2033_v55, %v2038_v58 }
 0xafe   : > { %v2040_v60 = vmul.f32 %v2039_v59, %v2039_v59 }
 0xb00   : > { %v2041_v61 = vsel %vm926_vm4, %v2040_v60, 0.0 }
 0xb01   : > { %2042 = vadd.xlane.f32.xlu1 %v2041_v61 }
 0xb8a   : > { %v2043_v3 = vpop.xlane.xlu1 %2042 }
 0xb8b   : > { %v2044_v4 = vmul.f32 0.03125, %v2043_v3 }
 0xb8d   : > { %v2045_v5 = vadd.f32 1e-05, %v2044_v4 }
 0xb8f   : > { %2627 = vrsqrt.f32 %v2045_v5 }
 0xb9c   : > { %v2628_v8 = vpop.eup %2627 }
 0xb9d   : > { %v2047_v10 = vmul.f32 %v2628_v8, %v2039_v59 }
 0xb9f   : > { %v2052_v27 = vmul.f32 %v2051_v7, %v2047_v10 }
 0xba1   : > { %v2057_v28 = vadd.f32 %v2056_v9, %v2052_v27 }
 0xba3   : > { %2533 = vmatmul.mubr.msk.f32.vlgmr.msra.gmra.mxu0 %vm926_vm4, %v2057_v28 }
 0xc63   : > { %v2132_v11 = vpop.f32.mrf.mxu0 }
 0xc64   : > { %v2133_v12 = vadd.f32 %v2132_v11, %v2062_v0 }
 0xc65   : > { %v2534_v13 = vpop.f32.mrf.mxu0 }
 0xc66   : > { %2137 = vst.msk [vmem:[%s753_s23] sm:$0x1] %vm2136_vm11, %v2133_v12 }
 0xc67 PF: > { %s35_s2 = sadd.s32 1, %s2807_s2  }
 0xc68   : > { %p32_p13 = scmp.ge.s32.totalorder %s35_s2, 4  }
 0xc6a   :  { %34 = sbr.rel (!%p32_p13) target bundleno = 14 (0xe), region = 170 }
 0xc6f   :  { %2155 = vsyncpa [#allocation4], 1 }
 0xc70   :  { %2157 = vsyncpa [#allocation4 + $0x1], 1 }
 0xc71   :  { %2158 = vsyncpa [#allocation6], 1 }
 0xc72   :  { %2159 = vsyncpa [#allocation9], 1 }
 0xc73   :  { %2160 = vsyncpa [#allocation12], 1 }

// kernel: _lambda_.5
= control target key start
LH: loop header
LB: loop body
LE: loop exit
PB: predicated region body
PF: predicated region fallthrough
CT: control target
= control target key end

     0   :  { %s6558_s6 = smov 1   ;;  %s6559_s10 = smov 2   ;;  %s7789_s0 = inlined_call_operand.smem [shape: u32[38], index: -1, kind: input, shape index: {}] }
   0x1   :  { %s6614_s5 = sld [smem:[%s7789_s0]]   ;;  %s6560_s14 = smov 3  }
   0x2   :  { %s6619_s9 = sld [smem:[%s7789_s0 + %s6558_s6]]   ;;  %s6561_s18 = smov 4  }
   0x3   :  { %s6624_s13 = sld [smem:[%s7789_s0 + %s6559_s10]]   ;;  %s6562_s22 = smov 5  }
   0x4   :  { %s6629_s17 = sld [smem:[%s7789_s0 + %s6560_s14]]   ;;  %s6563_s26 = smov 6  }
   0x5   :  { %s6634_s21 = sld [smem:[%s7789_s0 + %s6561_s18]]   ;;  %s6564_s30 = smov 7  }
   0x6   :  { %s6639_s25 = sld [smem:[%s7789_s0 + %s6562_s22]]   ;;  %s6565_s4 = smov 8  }
   0x7   :  { %s6644_s29 = sld [smem:[%s7789_s0 + %s6563_s26]]   ;;  %s6566_s10 = smov 9  }
   0x8   :  { %s6649_s3 = sld [smem:[%s7789_s0 + %s6564_s30]]   ;;  %s6567_s15 = smov 10  }
   0x9   :  { %s6654_s8 = sld [smem:[%s7789_s0 + %s6565_s4]]   ;;  %s6568_s20 = smov 11  }
   0xa   :  { %7808 = sst [smem:[#allocation21_spill]] %s6629_s17  ;;  %s6569_s26 = smov 12  }
   0xb   :  { %7809 = sst [smem:[#allocation22_spill]] %s6634_s21  ;;  %s6570_s1 = smov 13  }
   0xc   :  { %s6659_s14 = sld [smem:[%s7789_s0 + %s6566_s10]]   ;;  %s6571_s7 = smov 14  }
   0xd   :  { %s6664_s19 = sld [smem:[%s7789_s0 + %s6567_s15]]   ;;  %s6572_s15 = smov 15  }
   0xe   :  { %s6669_s24 = sld [smem:[%s7789_s0 + %s6568_s20]]   ;;  %s6573_s22 = smov 16  }
   0xf   :  { %7810 = sst [smem:[#allocation23_spill]] %s6654_s8  ;;  %s6574_s28 = smov 17  }
  0x10   :  { %s6674_s30 = sld [smem:[%s7789_s0 + %s6569_s26]]  }
  0x11   :  { %s6679_s6 = sld [smem:[%s7789_s0 + %s6570_s1]]  }
  0x12   :  { %s6684_s12 = sld [smem:[%s7789_s0 + %s6571_s7]]   ;;  %s6575_s7 = smov 18  }
  0x13   :  { %7811 = sst [smem:[#allocation24_spill]] %s6664_s19 }
  0x14   :  { %7812 = sst [smem:[#allocation25_spill]] %s6669_s24 }
  0x15   :  { %s6689_s20 = sld [smem:[%s7789_s0 + %s6572_s15]]   ;;  %s6576_s15 = smov 19  }
  0x16   :  { %s6694_s27 = sld [smem:[%s7789_s0 + %s6573_s22]]   ;;  %s6577_s22 = smov 20  }
  0x17   :  { %7813 = sst [smem:[#allocation26_spill]] %s6679_s6 }
  0x18   :  { %7814 = sst [smem:[#allocation27_spill]] %s6684_s12 }
  0x19   :  { %s6699_s4 = sld [smem:[%s7789_s0 + %s6574_s28]]   ;;  %s6578_s28 = smov 21  }
  0x1a   :  { %s6704_s21 = sld [smem:[%s7789_s0 + %s6575_s7]]   ;;  %s6579_s7 = smov 22  }
  0x1b   :  { %s6709_s6 = sld [smem:[%s7789_s0 + %s6576_s15]]   ;;  %s6580_s15 = smov 23  }
  0x1c   :  { %7815 = sst [smem:[#allocation28_spill]] %s6694_s27 }
  0x1d   :  { %s6714_s27 = sld [smem:[%s7789_s0 + %s6577_s22]]   ;;  %s6581_s22 = smov 24  }
  0x1e   :  { %s6719_s12 = sld [smem:[%s7789_s0 + %s6578_s28]]   ;;  %s6582_s28 = smov 25  }
  0x1f   :  { %7816 = sst [smem:[#allocation29_spill]] %s6699_s4 }
  0x20   :  { %7817 = sst [smem:[#allocation30_spill]] %s6704_s21 }
  0x21   :  { %7818 = sst [smem:[#allocation31_spill]] %s6709_s6 }
  0x22   :  { %s6724_s21 = sld [smem:[%s7789_s0 + %s6579_s7]]   ;;  %s6583_s7 = smov 26  }
  0x23   :  { %7819 = sst [smem:[#allocation32_spill]] %s6714_s27 }
  0x24   :  { %7820 = sst [smem:[#allocation33_spill]] %s6719_s12 }
  0x25   :  { %s6729_s6 = sld [smem:[%s7789_s0 + %s6580_s15]]   ;;  %s6584_s15 = smov 27  }
  0x26   :  { %s6734_s27 = sld [smem:[%s7789_s0 + %s6581_s22]]   ;;  %s6585_s22 = smov 28  }
  0x27   :  { %s6739_s12 = sld [smem:[%s7789_s0 + %s6582_s28]]   ;;  %s6586_s28 = smov 29  }
  0x28   :  { %s6744_s24 = sld [smem:[%s7789_s0 + %s6583_s7]]   ;;  %s6587_s7 = smov 30  }
  0x29   :  { %s6764_s19 = sld [smem:[%s7789_s0 + %s6587_s7]]   ;;  %s6591_s7 = smov 34  }
  0x2b   :  { %7821 = sst [smem:[#allocation34_spill]] %s6729_s6 }
  0x2c   :  { %7822 = sst [smem:[#allocation35_spill]] %s6734_s27 }
  0x2d   :  { %7823 = sst [smem:[#allocation36_spill]] %s6739_s12 }
  0x2e   :  { %s6749_s6 = sld [smem:[%s7789_s0 + %s6584_s15]]   ;;  %s6588_s15 = smov 31  }
  0x2f   :  { %s6754_s27 = sld [smem:[%s7789_s0 + %s6585_s22]]   ;;  %s6589_s22 = smov 32  }
  0x30   :  { %s6759_s12 = sld [smem:[%s7789_s0 + %s6586_s28]]   ;;  %s6590_s28 = smov 33  }
  0x31   :  { %7827 = sst [smem:[#allocation40_spill]] %s6764_s19 }
  0x32   :  { %s6784_s19 = sld [smem:[%s7789_s0 + %s6591_s7]]  }
  0x34   :  { %7824 = sst [smem:[#allocation37_spill]] %s6749_s6 }
  0x35   :  { %7825 = sst [smem:[#allocation38_spill]] %s6754_s27 }
  0x36   :  { %7826 = sst [smem:[#allocation39_spill]] %s6759_s12 }
  0x37   :  { %s6769_s6 = sld [smem:[%s7789_s0 + %s6588_s15]]   ;;  %s6592_s15 = smov 35  }
  0x38   :  { %s6774_s27 = sld [smem:[%s7789_s0 + %s6589_s22]]   ;;  %s6593_s22 = smov 36  }
  0x39   :  { %s6779_s12 = sld [smem:[%s7789_s0 + %s6590_s28]]   ;;  %s6594_s28 = smov 37  }
  0x3a   :  { %s6789_s17 = sld [smem:[%s7789_s0 + %s6592_s15]]  }
  0x3b   :  { %s6799_s8 = sld [smem:[%s7789_s0 + %s6594_s28]]  }
  0x3e   :  { %7828 = sst [smem:[#allocation41_spill]] %s6774_s27 }
  0x3f   :  { %s6794_s27 = sld [smem:[%s7789_s0 + %s6593_s22]]  }
  0x40   :  { %80 = vsyncpa [#allocation4], 0 }
  0x41   :  { %81 = vsyncpa [#allocation6], 0 }
  0x42   :  { %82 = vsyncpa [#allocation9], 0 }
  0x43   :  { %83 = vsyncpa [#allocation12], 0 }
  0x44   :  { %84 = vsyncpa [#allocation15], 0  ;;  %s6801_s7 = smov 0  }
  0x45 LB: > { %s6595_s10 = smov [#allocation5]   ;;  %s6807_s15 = sadd.s32 4294967295, %s6556_s7   ;;  %s6556_s7 = sphi %s6801_s7, %s90_s7  }
  0x46   : > { %s970_s11 = sshll.u32 %s6595_s10, 4  ;;  %p5192_p0 = scmp.ge.s32.totalorder %s6556_s7, 1  ;;  %s971_s11 = int_to_ptr.vmem [resolvable:$true] %s970_s11 }
  0x47   : > { %p913_p1 = scmp.lt.s32.totalorder %s6556_s7, 3  ;;  %p7803_p2 = scmp.eq.s32.totalorder %s6807_s15, 0 }
  0x48   : > { %s6596_s16 = smov [#allocation8]   ;;  %s6597_s22 = smov [#allocation11]  }
  0x49   : > { %p6812_p3 = pnand %p5192_p0, %p913_p1  ;;  %s1007_s18 = sshll.u32 %s6596_s16, 4  ;;  %s6818_s18 = int_to_ptr.vmem [resolvable:$true] %s1007_s18 }
  0x4a   : > { %s1050_s23 = sshll.u32 %s6597_s22, 4  ;;  %s6598_s28 = smov [#allocation3]   ;;  %s6826_s23 = int_to_ptr.vmem [resolvable:$true] %s1050_s23 }
  0x4b   : > { %s7829_s0 = scalar_select %p6812_p3, 1, 0 }
  0x4c   : > { %p6136_p4 = pneg %p6812_p3  ;;  %s953_s1 = sshll.u32 %s6598_s28, 4  ;;  %s6828_s1 = int_to_ptr.vmem [resolvable:$true] %s953_s1 }
  0x4d   : > { %s6333_s10 = scalar_lea.vmem %s971_s11, 16  ;;  %s6340_s16 = scalar_lea.vmem %s971_s11, 32 }
  0x4e   : > { %p6822_p5 = pnand %p7803_p2, %p6136_p4  ;;  %p6334_p7 = scmp.ne.s32.totalorder %s971_s11, %s6333_s10 }
  0x4f   : > { %p6341_p10 = scmp.lt.s32.totalorder %s971_s11, %s971_s11  ;;  %p6342_p11 = scmp.lt.s32.totalorder %s6340_s16, %s6333_s10 }
  0x50   : > { %p6832_p6 = pneg %p6822_p5 }
  0x51   : > { %p6343_p12 = por %p6342_p11, %p6341_p10 }
  0x52   : > { %p6336_p8 = pnand %p6334_p7, %p6832_p6 }
  0x54   : > { %p6337_p9 = pneg %p6336_p8 }
  0x56   : > { %p6344_p13 = pnand %p6343_p12, %p6337_p9 }
  0x58   : > { %6347 = shalt.err (!%p6344_p13)
}
  0x59   : > { %6142 = dma.hbm_to_vmem [thread:$0]  (!%p6822_p5), %s6689_s20, 16, %s971_s11, [#allocation6]  }
  0x5a   : > { %s6359_s22 = scalar_lea.vmem %s6818_s18, 16  ;;  %s6366_s28 = scalar_lea.vmem %s6818_s18, 32 }
  0x5b   : > { %p6360_p0 = scmp.ne.s32.totalorder %s6818_s18, %s6359_s22  ;;  %p6367_p7 = scmp.lt.s32.totalorder %s6818_s18, %s6818_s18 }
  0x5c   : > { %p6368_p8 = scmp.lt.s32.totalorder %s6366_s28, %s6359_s22 }
  0x5d   : > { %p6362_p1 = pnand %p6360_p0, %p6832_p6 }
  0x5e   : > { %p6369_p9 = por %p6368_p8, %p6367_p7 }
  0x5f   : > { %p6363_p4 = pneg %p6362_p1 }
  0x61   : > { %p6370_p10 = pnand %p6369_p9, %p6363_p4 }
  0x63   : > { %6373 = shalt.err (!%p6370_p10)
}
  0x64   : > { %6148 = dma.hbm_to_vmem [thread:$0]  (!%p6822_p5), %s6724_s21, 16, %s6818_s18, [#allocation9]  }
  0x65   : > { %s6385_s11 = scalar_lea.vmem %s6826_s23, 16  ;;  %s6392_s10 = scalar_lea.vmem %s6826_s23, 32 }
  0x66   : > { %p6386_p11 = scmp.ne.s32.totalorder %s6826_s23, %s6385_s11  ;;  %p6393_p0 = scmp.lt.s32.totalorder %s6826_s23, %s6826_s23 }
  0x67   : > { %p6394_p1 = scmp.lt.s32.totalorder %s6392_s10, %s6385_s11 }
  0x68   : > { %p6388_p12 = pnand %p6386_p11, %p6832_p6 }
  0x69   : > { %p6395_p4 = por %p6394_p1, %p6393_p0 }
  0x6a   : > { %p6389_p13 = pneg %p6388_p12 }
  0x6c   : > { %p6396_p7 = pnand %p6395_p4, %p6389_p13 }
  0x6e   : > { %6399 = shalt.err (!%p6396_p7)
}
  0x6f   : > { %6154 = dma.hbm_to_vmem [thread:$0]  (!%p6822_p5), %s6769_s6, 16, %s6826_s23, [#allocation12]  }
  0x70   : > { %s6411_s18 = scalar_lea.vmem %s6828_s1, 16  ;;  %s6418_s16 = scalar_lea.vmem %s6828_s1, 32 }
  0x71   : > { %p6412_p8 = scmp.ne.s32.totalorder %s6828_s1, %s6411_s18  ;;  %p6419_p11 = scmp.lt.s32.totalorder %s6828_s1, %s6828_s1 }
  0x72   : > { %p6420_p12 = scmp.lt.s32.totalorder %s6418_s16, %s6411_s18 }
  0x73   : > { %p6414_p9 = pnand %p6412_p8, %p6832_p6 }
  0x74   : > { %p6421_p13 = por %p6420_p12, %p6419_p11 }
  0x75   : > { %p6415_p10 = pneg %p6414_p9 }
  0x77   : > { %p6422_p0 = pnand %p6421_p13, %p6415_p10 }
  0x79   : > { %6425 = shalt.err (!%p6422_p0)
}
  0x7a   : > { %6139 = dma.hbm_to_vmem [thread:$0]  (!%p6822_p5), %s6674_s30, 16, %s6828_s1, [#allocation4]  }
  0x7b   : > { %s6599_s22 = smov [#allocation7]   ;;  %s6600_s28 = smov [#allocation10]  }
  0x7c   : > { %s984_s23 = sshll.u32 %s6599_s22, 4  ;;  %s1027_s11 = sshll.u32 %s6600_s28, 4  ;;  %s985_s23 = int_to_ptr.vmem [resolvable:$true] %s984_s23  ;;  %s1028_s11 = int_to_ptr.vmem [resolvable:$true] %s1027_s11 }
  0x7d   : > { %s6437_s10 = scalar_lea.vmem %s985_s23, 16  ;;  %s6444_s18 = scalar_lea.vmem %s985_s23, 32 }
  0x7e   : > { %p6438_p1 = scmp.ne.s32.totalorder %s985_s23, %s6437_s10  ;;  %p6445_p8 = scmp.lt.s32.totalorder %s985_s23, %s985_s23 }
  0x7f   : > { %p6446_p9 = scmp.lt.s32.totalorder %s6444_s18, %s6437_s10 }
  0x80   : > { %p6440_p4 = pnand %p6438_p1, %p6832_p6 }
  0x81   : > { %p6447_p10 = por %p6446_p9, %p6445_p8 }
  0x82   : > { %p6441_p7 = pneg %p6440_p4 }
  0x84   : > { %p6448_p11 = pnand %p6447_p10, %p6441_p7 }
  0x86   : > { %6451 = shalt.err (!%p6448_p11)
}
  0x87   : > { %s7832_s4 = sld [smem:[#allocation29_spill]]  ;;  %s6463_s1 = scalar_lea.vmem %s1028_s11, 16 }
  0x88   : > { %p6464_p12 = scmp.ne.s32.totalorder %s1028_s11, %s6463_s1  ;;  %s6470_s16 = scalar_lea.vmem %s1028_s11, 32 }
  0x89   : > { %p6471_p1 = scmp.lt.s32.totalorder %s1028_s11, %s1028_s11  ;;  %p6472_p4 = scmp.lt.s32.totalorder %s6470_s16, %s6463_s1 }
  0x8a   : > { %p6466_p13 = pnand %p6464_p12, %p6832_p6 }
  0x8b   : > { %p6473_p2 = por %p6472_p4, %p6471_p1 }
  0x8c   : > { %p6467_p0 = pneg %p6466_p13 }
  0x8d   : > { %6145 = dma.hbm_to_vmem [thread:$0]  (!%p6822_p5), %s7832_s4, 16, %s985_s23, [#allocation6]  }
  0x8e   : > { %p6474_p3 = pnand %p6473_p2, %p6467_p0 }
  0x90   : > { %6477 = shalt.err (!%p6474_p3)
}
  0x91   : > { %6151 = dma.hbm_to_vmem [thread:$0]  (!%p6822_p5), %s6744_s24, 16, %s1028_s11, [#allocation9]  }
  0x92   : > { %s6601_s22 = smov [#allocation13]   ;;  %s6602_s23 = smov [#allocation14]  }
  0x93   : > { %s1064_s28 = sshll.u32 %s6601_s22, 4  ;;  %s1081_s10 = sshll.u32 %s6602_s23, 4  ;;  %s1065_s28 = int_to_ptr.vmem [resolvable:$true] %s1064_s28  ;;  %s1082_s10 = int_to_ptr.vmem [resolvable:$true] %s1081_s10 }
  0x94   : > { %s6489_s18 = scalar_lea.vmem %s1065_s28, 16  ;;  %s6496_s4 = scalar_lea.vmem %s1065_s28, 32 }
  0x95   : > { %p6490_p7 = scmp.ne.s32.totalorder %s1065_s28, %s6489_s18  ;;  %p6497_p10 = scmp.lt.s32.totalorder %s1065_s28, %s1065_s28 }
  0x96   : > { %p6498_p11 = scmp.lt.s32.totalorder %s6496_s4, %s6489_s18 }
  0x97   : > { %p6492_p8 = pnand %p6490_p7, %p6832_p6 }
  0x98   : > { %p6499_p2 = por %p6498_p11, %p6497_p10 }
  0x99   : > { %p6493_p9 = pneg %p6492_p8 }
  0x9b   : > { %p6500_p3 = pnand %p6499_p2, %p6493_p9 }
  0x9d   : > { %6503 = shalt.err (!%p6500_p3)
}
  0x9e   : > { %6157 = dma.hbm_to_vmem [thread:$0]  (!%p6822_p5), %s6779_s12, 16, %s1065_s28, [#allocation12]  }
  0x9f   : > { %s6515_s11 = scalar_lea.vmem %s1082_s10, 16  ;;  %s6522_s1 = scalar_lea.vmem %s1082_s10, 32 }
  0xa0   : > { %p6516_p12 = scmp.ne.s32.totalorder %s1082_s10, %s6515_s11  ;;  %p6523_p1 = scmp.lt.s32.totalorder %s1082_s10, %s1082_s10 }
  0xa1   : > { %p6524_p4 = scmp.lt.s32.totalorder %s6522_s1, %s6515_s11 }
  0xa2   : > { %p6518_p13 = pnand %p6516_p12, %p6832_p6 }
  0xa3   : > { %p6525_p7 = por %p6524_p4, %p6523_p1 }
  0xa4   : > { %p6519_p0 = pneg %p6518_p13 }
  0xa6   : > { %p6526_p8 = pnand %p6525_p7, %p6519_p0 }
  0xa8   : > { %6529 = shalt.err (!%p6526_p8)
}
  0xa9   : > { %6160 = dma.hbm_to_vmem [thread:$0]  (!%p6822_p5), %s6794_s27, 16, %s1082_s10, [#allocation15]  }
  0xaa   : > { %p7833_p9 = scmp.ne.s32.totalorder %s7829_s0, 0 }
  0xab   : > { %p7834_p10 = scmp.eq.s32.totalorder (!%p7833_p9), %s6807_s15, 0 }
  0xac   : > { %1114 = sbr.rel (%p7833_p9) target bundleno = 7886 (0x1ece), region = 168 }
  0xb1   : > { %6535 = dma.done.wait (%p7834_p10), [#allocation4], 16   ;;  %p7835_p11 = pmov %p7834_p10 }
  0xb2   : > { %p7836_p6 = pmov %p7834_p10 }
  0xb3   : > { %6537 = vsyncadd (%p7835_p11), [#allocation4], 4294967280 }
  0xb4   : > { %6539 = dma.done.wait (%p7836_p6), [#allocation6], 32   ;;  %p7837_p2 = pmov %p7836_p6 }
  0xb6   : > { %6541 = vsyncadd (%p7837_p2), [#allocation6], 4294967264  ;;  %p7838_p3 = pmov %p7837_p2 }
  0xb7   : > { %p7839_p5 = pmov %p7837_p2 }
  0xb8   : > { %6543 = dma.done.wait (%p7838_p3), [#allocation9], 32  }
  0xb9   : > { %6545 = vsyncadd (%p7839_p5), [#allocation9], 4294967264  ;;  %p7840_p12 = pmov %p7837_p2 }
  0xba   : > { %p7841_p13 = pmov %p7837_p2 }
  0xbb   : > { %6547 = dma.done.wait (%p7840_p12), [#allocation12], 32  }
  0xbc   : > { %6549 = vsyncadd (%p7841_p13), [#allocation12], 4294967264  ;;  %p7842_p0 = pmov %p7837_p2 }
  0xbe   : > { %6551 = dma.done.wait (%p7842_p0), [#allocation15], 16   ;;  %p7843_p1 = pmov %p7842_p0 }
  0xbf   : > { %p1239_p4 = scmp.lt.s32.totalorder %s6807_s15, 1  ;;  %v6603_v0 = vmov 0.0   ;;  %vm6604_vm0 = vmmov 0   ;;  %v1263_v1 = vld [vmem:[%s6639_s25 + $0x18] sm:$0xff]  ;;  %v1262_v2 = vld [vmem:[%s6639_s25 + $0x10] sm:$0xff]  ;;  %v1261_v3 = vld [vmem:[%s6639_s25 + $0x8] sm:$0xff] }
  0xc0   : > { %6553 = vsyncadd (%p7843_p1), [#allocation15], 4294967280  ;;  %5594 = vmatprep.subr.mxu0 %v6603_v0  ;;  %5602 = vmatprep.mubr.msk.f32.mxu0 %vm6604_vm0, %v6603_v0  ;;  %vm1265_vm1 = vcmask 261120   ;;  %v1260_v8 = vld [vmem:[%s6639_s25] sm:$0xff]  ;;  %v1341_v10 = vld [vmem:[%s6649_s3 + $0x8] sm:$0x3f] }
  0xc1   : > { %s7865_s15 = smov (!%p1239_p4, %s6807_s15), 1  ;;  %5612 = vmatprep.subr.mxu1 %v6603_v0  ;;  %5620 = vmatprep.mubr.msk.f32.mxu1 %vm6604_vm0, %v6603_v0  ;;  %vm1347_vm2 = vcmask 1045504   ;;  %v1340_v11 = vld [vmem:[%s6649_s3] sm:$0xff]  ;;  %vm1343_vm3 = vcmask 113664   ;;  %v1445_v13 = vld [vmem:[%s6659_s14 + $0x18] sm:$0xff]  ;;  %v1444_v15 = vld [vmem:[%s6659_s14 + $0x10] sm:$0xff] }
  0xc2   : > { %s5381_s4 = sshll.u32 %s7865_s15, 5  ;;  %5595 = vmatpush3.msra.mxu0 %v1263_v1  ;;  %s1246_s26 = scalar_lea.vmem %s6619_s9, %s7865_s15  ;;  %v5226_v14 = vld [vmem:[%s6659_s14 + $0x38] sm:$0xff]  ;;  %5613 = vmatpush3.msra.mxu1 %v1445_v13  ;;  %v5225_v16 = vld [vmem:[%s6659_s14 + $0x30] sm:$0xff]  ;;  %v1443_v17 = vld [vmem:[%s6659_s14 + $0x8] sm:$0xff]  ;;  %vm1421_vm4 = vcmask 253952   ;;  %vm1780_vm5 = vcmask 130048  }
  0xc3   : > { %s1243_s0 = scalar_lea.vmem %s6614_s5, %s5381_s4  ;;  %5596 = vmatprep.subr.mxu0 %v6603_v0  ;;  %v1259_v9 = vld [vmem:[%s1246_s26] sm:$0x1]  ;;  %s1249_s2 = scalar_lea.vmem %s6624_s13, %s7865_s15  ;;  %5614 = vmatprep.subr.mxu1 %v6603_v0  ;;  %v5224_v18 = vld [vmem:[%s6659_s14 + $0x28] sm:$0xff]  ;;  %v5237_v34 = vld [vmem:[%s6659_s14 + $0x58] sm:$0xff]  ;;  %vm1978_vm6 = vcmask 1041408   ;;  %vm1906_vm7 = vcmask 277504  }
  0xc4   : > { %v1424_v4 = vld [vmem:[%s1243_s0] sm:$0xff]  ;;  %v1425_v5 = vld [vmem:[%s1243_s0 + $0x8] sm:$0xff]  ;;  %v1426_v6 = vld [vmem:[%s1243_s0 + $0x10] sm:$0xff]  ;;  %5597 = vmatpush3.msra.mxu0 %v1262_v2  ;;  %5615 = vmatpush3.msra.mxu1 %v1444_v15  ;;  %s7844_s16 = sld [smem:[#allocation23_spill]]  ;;  %vm1919_vm8 = vcmask 271360   ;;  %s6605_s23 = smov 112  }
  0xc5   : > { %v1427_v7 = vld [vmem:[%s1243_s0 + $0x18] sm:$0xff]  ;;  %1428 = vst.msk [vmem:[#allocation2 + $0x2] sm:$0xff] %vm1265_vm1, %v1424_v4  ;;  %1429 = vst.msk [vmem:[#allocation2 + $0xa] sm:$0xff] %vm1265_vm1, %v1425_v5  ;;  %5598 = vmatprep.subr.mxu0 %v6603_v0  ;;  %v1339_v12 = vld [vmem:[%s1249_s2] sm:$0x1]  ;;  %5616 = vmatprep.subr.mxu1 %v6603_v0  ;;  %s7845_s22 = sld [smem:[#allocation21_spill]] }
  0xc6   : > { %1430 = vst.msk [vmem:[#allocation2 + $0x12] sm:$0xff] %vm1265_vm1, %v1426_v6  ;;  %1431 = vst.msk [vmem:[#allocation2 + $0x1a] sm:$0xff] %vm1265_vm1, %v1427_v7  ;;  %5599 = vmatpush3.msra.mxu0 %v1261_v3  ;;  %v1442_v19 = vld [vmem:[%s6659_s14] sm:$0xff]  ;;  %5617 = vmatpush3.msra.mxu1 %v1443_v17  ;;  %v5236_v38 = vld [vmem:[%s6659_s14 + $0x50] sm:$0xff]  ;;  %s7846_s28 = sld [smem:[#allocation24_spill]]  ;;  %vm2636_vm9 = vcmask 254976  }
  0xc7   : > { %5600 = vmatprep.subr.mxu0 %v6603_v0  ;;  %v5223_v20 = vld [vmem:[%s6659_s14 + $0x20] sm:$0xff]  ;;  %5618 = vmatprep.subr.mxu1 %v6603_v0  ;;  %v5235_v42 = vld [vmem:[%s6659_s14 + $0x48] sm:$0xff]  ;;  %s7847_s10 = sld [smem:[#allocation25_spill]]  ;;  %vm2845_vm10 = vcmask 523264   ;;  %vm3373_vm11 = vcmask 64512   ;;  %vm5001_vm12 = vcmask 121856  }
  0xc8   : > { %5601 = vmatpush3.msra.mxu0 %v1260_v8  ;;  %5619 = vmatpush3.msra.mxu1 %v1442_v19  ;;  %v1264_v21 = vld [vmem:[%s6644_s29] sm:$0x1]  ;;  %s7848_s18 = sld [smem:[#allocation27_spill]] }
  0xc9   : > { %5603 = vmatmul.mubr.msk.f32.vlgmr.msra.gmra.mxu0 %vm1265_vm1, %v1259_v9  ;;  %5605 = vmatprep.subr.mxu0 %v6603_v0  ;;  %v5234_v46 = vld [vmem:[%s6659_s14 + $0x40] sm:$0xff]  ;;  %s7849_s11 = sld [smem:[#allocation28_spill]] }
  0xca   : > { %5606 = vmatpush3.msk.msra.mxu0 %vm1347_vm2, %v1341_v10  ;;  %5609 = vmatprep.mubr.msk.f32.mxu0 %vm6604_vm0, %v6603_v0  ;;  %v1342_v25 = vld [vmem:[%s7844_s16] sm:$0x1]  ;;  %s7850_s1 = sld [smem:[#allocation26_spill]] }
  0xcb   : > { %5607 = vmatprep.subr.mxu0 %v6603_v0  ;;  %5658 = vmatprep.subr.mxu1 %v6603_v0  ;;  %v1254_v29 = vld [vmem:[%s7845_s22] sm:$0xff]  ;;  %v1255_v31 = vld [vmem:[%s7845_s22 + $0x8] sm:$0xff]  ;;  %v1256_v36 = vld [vmem:[%s7845_s22 + $0x10] sm:$0xff]  ;;  %s7851_s4 = sld [smem:[#allocation31_spill]] }
  0xcc   : > { %5608 = vmatpush3.msra.mxu0 %v1340_v11  ;;  %v6975_v32 = vld [vmem:[#allocation2 + $0x8] sm:$0xff]  ;;  %v1257_v40 = vld [vmem:[%s7845_s22 + $0x18] sm:$0xff]  ;;  %v1258_v44 = vld [vmem:[%s7845_s22 + $0x20] sm:$0x3]  ;;  %s7852_s0 = sld [smem:[#allocation22_spill]] }
  0xcd   : > { %5610 = vmatmul.mubr.msk.f32.vlgmr.msra.gmra.mxu0 %vm1343_vm3, %v1339_v12  ;;  %5635 = vmatprep.subr.mxu0 %v6603_v0  ;;  %v1438_v35 = vadd.f32 %v6975_v32, %v1255_v31  ;;  %v6987_v37 = vld [vmem:[#allocation2 + $0x10] sm:$0xff]  ;;  %v6999_v41 = vld [vmem:[#allocation2 + $0x18] sm:$0xff]  ;;  %v7011_v45 = vld [vmem:[#allocation2 + $0x20] sm:$0x3]  ;;  %s7853_s26 = sld [smem:[#allocation32_spill]] }
  0xce   : > { %5643 = vmatprep.mubr.msk.f32.mxu0 %vm6604_vm0, %v6603_v0  ;;  %5636 = vmatpush3.msra.mxu0 %v5226_v14  ;;  %v1439_v39 = vadd.f32 %v6987_v37, %v1256_v36  ;;  %v1440_v43 = vadd.f32 %v6999_v41, %v1257_v40  ;;  %v1441_v47 = vadd.f32 %v7011_v45, %v1258_v44  ;;  %v5228_v1 = vld [vmem:[%s7846_s28 + $0x1] ss:$0 sm:$0xff]  ;;  %v5217_v17 = vld [vmem:[%s7846_s28] ss:$0 sm:$0xff]  ;;  %s7854_s2 = sld [smem:[#allocation33_spill]] }
  0xcf   : > { %5637 = vmatprep.subr.mxu0 %v6603_v0  ;;  %s7855_s16 = sld [smem:[#allocation34_spill]] }
  0xd0   : > { %5638 = vmatpush3.msra.mxu0 %v5225_v16 }
  0xd1   : > { %5639 = vmatprep.subr.mxu0 %v6603_v0 }
  0xd2   : > { %5640 = vmatpush3.msra.mxu0 %v5224_v18 }
  0xd3   : > { %5641 = vmatprep.subr.mxu0 %v6603_v0 }
  0xd4   : > { %5642 = vmatpush3.msra.mxu0 %v5223_v20 }
  0xd5   : > { %5681 = vmatprep.subr.mxu0 %v6603_v0 }
 0x189   : > { %v1335_v22 = vpop.f32.mrf.mxu0 }
 0x18a   : > { %v1336_v23 = vadd.f32 %v1335_v22, %v1264_v21  ;;  %v5239_v21 = vld [vmem:[%s7846_s28 + $0x2] ss:$0 sm:$0xff] }
 0x18b   : > { %v5604_v24 = vpop.f32.mrf.mxu0 }
 0x18c   : > { %1422 = vst.msk [vmem:[#allocation2] sm:$0x1] %vm1421_vm4, %v1336_v23 }
 0x18d   : > { %v1417_v26 = vpop.f32.mrf.mxu0 }
 0x18e   : > { %v1418_v27 = vadd.f32 %v1417_v26, %v1342_v25 }
 0x18f   : > { %v5611_v28 = vpop.f32.mrf.mxu0 }
 0x190   : > { %1423 = vst.msk [vmem:[#allocation2 + $0x1] sm:$0x1] %vm1421_vm4, %v1418_v27 }
 0x197   : > { %v6972_v30 = vld [vmem:[#allocation2] sm:$0xff] }
 0x198   : > { %v1437_v33 = vadd.f32 %v6972_v30, %v1254_v29 }
 0x19a   : > { %5621 = vmatmul.mubr.msk.f32.vlgmr.msra.gmra.mxu1 %vm1265_vm1, %v1437_v33  ;;  %5644 = vmatmul.mubr.msk.f32.vlgmr.msra.gmra.mxu0 %vm1265_vm1, %v1437_v33 }
 0x19b   : > { %5623 = vmatprep.mubr.msk.f32.mxu1 %vm6604_vm0, %v6603_v0  ;;  %5646 = vmatprep.mubr.msk.f32.mxu0 %vm6604_vm0, %v6603_v0 }
 0x19c   : > { %5659 = vmatpush3.msra.mxu1 %v5237_v34 }
 0x19d   : > { %5660 = vmatprep.subr.mxu1 %v6603_v0 }
 0x19e   : > { %5624 = vmatmul.mubr.msk.f32.gmra.mxu1 %vm1265_vm1, %v1438_v35  ;;  %5647 = vmatmul.mubr.msk.f32.gmra.mxu0 %vm1265_vm1, %v1438_v35 }
 0x19f   : > { %5626 = vmatprep.mubr.msk.f32.mxu1 %vm6604_vm0, %v6603_v0  ;;  %5649 = vmatprep.mubr.msk.f32.mxu0 %vm6604_vm0, %v6603_v0 }
 0x1a0   : > { %5661 = vmatpush3.msra.mxu1 %v5236_v38 }
 0x1a1   : > { %5662 = vmatprep.subr.mxu1 %v6603_v0 }
 0x1a2   : > { %5627 = vmatmul.mubr.msk.f32.gmra.mxu1 %vm1265_vm1, %v1439_v39  ;;  %5650 = vmatmul.mubr.msk.f32.gmra.mxu0 %vm1265_vm1, %v1439_v39 }
 0x1a3   : > { %5629 = vmatprep.mubr.msk.f32.mxu1 %vm6604_vm0, %v6603_v0  ;;  %5652 = vmatprep.mubr.msk.f32.mxu0 %vm6604_vm0, %v6603_v0 }
 0x1a4   : > { %5663 = vmatpush3.msra.mxu1 %v5235_v42 }
 0x1a5   : > { %5664 = vmatprep.subr.mxu1 %v6603_v0 }
 0x1a6   : > { %5630 = vmatmul.mubr.msk.f32.gmra.mxu1 %vm1265_vm1, %v1440_v43  ;;  %5653 = vmatmul.mubr.msk.f32.gmra.mxu0 %vm1265_vm1, %v1440_v43 }
 0x1a7   : > { %5632 = vmatprep.mubr.msk.f32.mxu1 %vm6604_vm0, %v6603_v0  ;;  %5655 = vmatprep.mubr.msk.f32.mxu0 %vm6604_vm0, %v6603_v0 }
 0x1a8   : > { %5665 = vmatpush3.msra.mxu1 %v5234_v46 }
 0x1a9   : > { %5706 = vmatprep.subr.mxu1 %v6603_v0 }
 0x1aa   : > { %5633 = vmatmul.mubr.msk.f32.gmra.mxu1 %vm1265_vm1, %v1441_v47  ;;  %5656 = vmatmul.mubr.msk.f32.gmra.mxu0 %vm1265_vm1, %v1441_v47 }
 0x1ab   : > { %5666 = vmatprep.mubr.msk.f32.mxu1 %vm6604_vm0, %v6603_v0  ;;  %5691 = vmatprep.mubr.msk.f32.mxu0 %vm6604_vm0, %v6603_v0 }
 0x1ae   : > { %5667 = vmatmul.mubr.msk.f32.vlgmr.msra.gmra.mxu1 %vm1265_vm1, %v6972_v30 }
 0x1af   : > { %5669 = vmatprep.mubr.msk.f32.mxu1 %vm6604_vm0, %v6603_v0 }
 0x1b2   : > { %5670 = vmatmul.mubr.msk.f32.gmra.mxu1 %vm1265_vm1, %v6975_v32 }
 0x1b3   : > { %5672 = vmatprep.mubr.msk.f32.mxu1 %vm6604_vm0, %v6603_v0 }
 0x1b6   : > { %5673 = vmatmul.mubr.msk.f32.gmra.mxu1 %vm1265_vm1, %v6987_v37 }
 0x1b7   : > { %5675 = vmatprep.mubr.msk.f32.mxu1 %vm6604_vm0, %v6603_v0 }
 0x1ba   : > { %5676 = vmatmul.mubr.msk.f32.gmra.mxu1 %vm1265_vm1, %v6999_v41 }
 0x1bb   : > { %5678 = vmatprep.mubr.msk.f32.mxu1 %vm6604_vm0, %v6603_v0 }
 0x1be   : > { %5679 = vmatmul.mubr.msk.f32.gmra.mxu1 %vm1265_vm1, %v7011_v45 }
 0x1bf   : > { %5716 = vmatprep.mubr.msk.f32.mxu1 %vm6604_vm0, %v6603_v0 }
 0x25a   : > { %v1534_v48 = vpop.f32.mrf.mxu1  ;;  %v1637_v49 = vpop.f32.mrf.mxu0 }
 0x25b   : > { %v7071_v18 = vadd.f32 %v5228_v1, %v1637_v49  ;;  %v7075_v20 = vadd.f32 %v5217_v17, %v1534_v48 }
 0x25c   : > { %v5622_v50 = vpop.f32.mrf.mxu1  ;;  %v5645_v51 = vpop.f32.mrf.mxu0 }
 0x25e   : > { %v1539_v52 = vpop.f32.mrf.mxu1  ;;  %v1642_v53 = vpop.f32.mrf.mxu0 }
 0x25f   : > { %v7065_v14 = vadd.f32 %v5228_v1, %v1642_v53  ;;  %v7083_v25 = vadd.f32 %v5217_v17, %v1539_v52 }
 0x260   : > { %v5625_v54 = vpop.f32.mrf.mxu1  ;;  %v5648_v55 = vpop.f32.mrf.mxu0 }
 0x262   : > { %v1544_v56 = vpop.f32.mrf.mxu1  ;;  %v1647_v57 = vpop.f32.mrf.mxu0 }
 0x263   : > { %v7060_v11 = vadd.f32 %v5228_v1, %v1647_v57  ;;  %v7097_v29 = vadd.f32 %v5217_v17, %v1544_v56 }
 0x264   : > { %v5628_v58 = vpop.f32.mrf.mxu1  ;;  %v5651_v59 = vpop.f32.mrf.mxu0 }
 0x266   : > { %v1549_v60 = vpop.f32.mrf.mxu1  ;;  %v1652_v61 = vpop.f32.mrf.mxu0 }
 0x267   : > { %v7055_v8 = vadd.f32 %v5228_v1, %v1652_v61  ;;  %v7109_v33 = vadd.f32 %v5217_v17, %v1549_v60 }
 0x268   : > { %v5631_v62 = vpop.f32.mrf.mxu1  ;;  %v5654_v63 = vpop.f32.mrf.mxu0 }
 0x26a   : > { %v1554_v2 = vpop.f32.mrf.mxu1  ;;  %v1657_v3 = vpop.f32.mrf.mxu0 }
 0x26b   : > { %v7050_v4 = vadd.f32 %v5228_v1, %v1657_v3  ;;  %v7118_v34 = vadd.f32 %v5217_v17, %v1554_v2 }
 0x26c   : > { %v5634_v5 = vpop.f32.mrf.mxu1  ;;  %v5657_v6 = vpop.f32.mrf.mxu0 }
 0x26d   : > { %5682 = vmatpush3.xpose.msk.msra.mxu0 %vm1780_vm5, %v7050_v4 }
 0x26e   : > { %v1755_v7 = vpop.f32.mrf.mxu1  ;;  %5683 = vmatprep.subr.mxu0 %v6603_v0 }
 0x26f   : > { %v7106_v31 = vadd.f32 %v5239_v21, %v1755_v7 }
 0x270   : > { %v5668_v9 = vpop.f32.mrf.mxu1 }
 0x271   : > { %5684 = vmatpush3.xpose.msk.msra.mxu0 %vm1780_vm5, %v7055_v8 }
 0x272   : > { %v1760_v10 = vpop.f32.mrf.mxu1  ;;  %5685 = vmatprep.subr.mxu0 %v6603_v0 }
 0x273   : > { %v7094_v28 = vadd.f32 %v5239_v21, %v1760_v10 }
 0x274   : > { %v5671_v12 = vpop.f32.mrf.mxu1 }
 0x275   : > { %5686 = vmatpush3.xpose.msk.msra.mxu0 %vm1780_vm5, %v7060_v11 }
 0x276   : > { %v1765_v13 = vpop.f32.mrf.mxu1  ;;  %5687 = vmatprep.subr.mxu0 %v6603_v0 }
 0x277   : > { %v7087_v27 = vadd.f32 %v5239_v21, %v1765_v13 }
 0x278   : > { %v5674_v15 = vpop.f32.mrf.mxu1 }
 0x279   : > { %5688 = vmatpush3.xpose.msk.msra.mxu0 %vm1780_vm5, %v7065_v14 }
 0x27a   : > { %v1770_v16 = vpop.f32.mrf.mxu1  ;;  %5689 = vmatprep.subr.mxu0 %v6603_v0 }
 0x27b   : > { %v7079_v23 = vadd.f32 %v5239_v21, %v1770_v16 }
 0x27c   : > { %v5677_v19 = vpop.f32.mrf.mxu1 }
 0x27d   : > { %5690 = vmatpush3.xpose.msk.msra.mxu0 %vm1780_vm5, %v7071_v18 }
 0x27e   : > { %v1775_v22 = vpop.f32.mrf.mxu1  ;;  %5731 = vmatprep.subr.mxu0 %v6603_v0 }
 0x27f   : > { %v7081_v24 = vadd.f32 %v5239_v21, %v1775_v22 }
 0x280   : > { %5692 = vmatmul.mubr.msk.f32.vlgmr.msra.gmra.mxu0 %vm1780_vm5, %v7075_v20  ;;  %v5680_v26 = vpop.f32.mrf.mxu1 }
 0x281   : > { %5707 = vmatpush3.msk.msra.mxu1 %vm1978_vm6, %v7081_v24  ;;  %5694 = vmatprep.mubr.msk.f32.mxu0 %vm6604_vm0, %v6603_v0 }
 0x282   : > { %5708 = vmatprep.subr.mxu1 %v6603_v0 }
 0x283   : > { %5709 = vmatpush3.msra.mxu1 %v7079_v23 }
 0x284   : > { %5695 = vmatmul.mubr.msk.f32.gmra.mxu0 %vm1780_vm5, %v7083_v25  ;;  %5710 = vmatprep.subr.mxu1 %v6603_v0 }
 0x285   : > { %5711 = vmatpush3.msra.mxu1 %v7087_v27  ;;  %5697 = vmatprep.mubr.msk.f32.mxu0 %vm6604_vm0, %v6603_v0 }
 0x286   : > { %5712 = vmatprep.subr.mxu1 %v6603_v0 }
 0x287   : > { %5713 = vmatpush3.msra.mxu1 %v7094_v28 }
 0x288   : > { %5698 = vmatmul.mubr.msk.f32.gmra.mxu0 %vm1780_vm5, %v7097_v29  ;;  %5714 = vmatprep.subr.mxu1 %v6603_v0 }
 0x289   : > { %5715 = vmatpush3.msra.mxu1 %v7106_v31  ;;  %5700 = vmatprep.mubr.msk.f32.mxu0 %vm6604_vm0, %v6603_v0 }
 0x28a   : > { %5750 = vmatprep.subr.mxu1 %v6603_v0 }
 0x28c   : > { %5701 = vmatmul.mubr.msk.f32.gmra.mxu0 %vm1780_vm5, %v7109_v33 }
 0x28d   : > { %5703 = vmatprep.mubr.msk.f32.mxu0 %vm6604_vm0, %v6603_v0 }
 0x290   : > { %5704 = vmatmul.mubr.msk.f32.gmra.mxu0 %vm1780_vm5, %v7118_v34 }
 0x291   : > { %5735 = vmatprep.mubr.msk.f32.mxu0 %vm6604_vm0, %v6603_v0 }
 0x340   : > { %v1877_v35 = vpop.f32.mrf.mxu0 }
 0x341   : > { %v1901_v36 = vmul.f32 0.25, %v1877_v35 }
 0x342   : > { %v5693_v38 = vpop.f32.mrf.mxu0 }
 0x343   : > { %v1907_v39 = vsel %vm1906_vm7, %v1901_v36, -inf }
 0x344   : > { %1908 = vmax.xlane.f32.xlu0 %v1907_v39  ;;  %v1882_v40 = vpop.f32.mrf.mxu0 }
 0x345   : > { %v1902_v42 = vmul.f32 0.25, %v1882_v40 }
 0x346   : > { %v5696_v43 = vpop.f32.mrf.mxu0 }
 0x347   : > { %v1910_v44 = vsel %vm1906_vm7, %v1902_v42, -inf }
 0x348   : > { %1911 = vmax.xlane.f32.xlu0 %v1910_v44  ;;  %v1887_v46 = vpop.f32.mrf.mxu0 }
 0x349   : > { %v1903_v47 = vmul.f32 0.25, %v1887_v46 }
 0x34a   : > { %v5699_v48 = vpop.f32.mrf.mxu0 }
 0x34b   : > { %v1913_v49 = vsel %vm1906_vm7, %v1903_v47, -inf }
 0x34c   : > { %1914 = vmax.xlane.f32.xlu1 %v1913_v49  ;;  %v1892_v50 = vpop.f32.mrf.mxu0  ;;  %v2072_v49 = vld [vmem:[%s7847_s10] sm:$0xff] }
 0x34d   : > { %v1904_v51 = vmul.f32 0.25, %v1892_v50 }
 0x34e   : > { %v5702_v52 = vpop.f32.mrf.mxu0 }
 0x34f   : > { %v1916_v53 = vsel %vm1906_vm7, %v1904_v51, -inf }
 0x350   : > { %1917 = vmax.xlane.f32.xlu1 %v1916_v53  ;;  %v1897_v54 = vpop.f32.mrf.mxu0 }
 0x351   : > { %v1905_v55 = vmul.f32 0.25, %v1897_v54 }
 0x352   : > { %v5705_v56 = vpop.f32.mrf.mxu0 }
 0x353   : > { %v1920_v57 = vsel %vm1919_vm8, %v1905_v55, -inf }
 0x354   : > { %1921 = vmax.xlane.f32.xlu0 %v1920_v57 }
 0x3cd   : > { %v1909_v58 = vpop.xlane.xlu0 %1908 }
 0x3ce   : > { %v1923_v59 = vsub.f32 %v1901_v36, %v1909_v58 }
 0x3d0   : > { %v1928_v60 = vmul.f32 1.442695, %v1923_v59 }
 0x3d1   : > { %v1912_v61 = vpop.xlane.xlu0 %1911 }
 0x3d2   : > { %6233 = vpow2.f32 %v1928_v60  ;;  %v1924_v62 = vsub.f32 %v1902_v42, %v1912_v61 }
 0x3d4   : > { %v1930_v63 = vmul.f32 1.442695, %v1924_v62 }
 0x3d5   : > { %v1915_v1 = vpop.xlane.xlu1 %1914 }
 0x3d6   : > { %6235 = vpow2.f32 %v1930_v63  ;;  %v1925_v2 = vsub.f32 %v1903_v47, %v1915_v1 }
 0x3d8   : > { %v1932_v3 = vmul.f32 1.442695, %v1925_v2 }
 0x3d9   : > { %v1918_v5 = vpop.xlane.xlu1 %1917 }
 0x3da   : > { %6237 = vpow2.f32 %v1932_v3  ;;  %v1926_v6 = vsub.f32 %v1904_v51, %v1918_v5 }
 0x3dc   : > { %v1934_v7 = vmul.f32 1.442695, %v1926_v6 }
 0x3dd   : > { %v1922_v21 = vpop.xlane.xlu0 %1921 }
 0x3de   : > { %6239 = vpow2.f32 %v1934_v7  ;;  %v1927_v22 = vsub.f32 %v1905_v55, %v1922_v21 }
 0x3df   : > { %v6234_v9 = vpop.eup %6233 }
 0x3e0   : > { %v1938_v10 = vsel %vm1906_vm7, %v6234_v9, 0.0 }
 0x3e1   : > { %1939 = vadd.xlane.f32.xlu1 %v1938_v10 }
 0x3e3   : > { %v6236_v12 = vpop.eup %6235 }
 0x3e4   : > { %v1941_v13 = vsel %vm1906_vm7, %v6236_v12, 0.0 }
 0x3e5   : > { %1942 = vadd.xlane.f32.xlu0 %v1941_v13 }
 0x3e7   : > { %v6238_v15 = vpop.eup %6237 }
 0x3e8   : > { %v1944_v16 = vsel %vm1906_vm7, %v6238_v15, 0.0 }
 0x3e9   : > { %1945 = vadd.xlane.f32.xlu1 %v1944_v16 }
 0x3eb   : > { %v6240_v17 = vpop.eup %6239 }
 0x3ec   : > { %v1947_v19 = vsel %vm1906_vm7, %v6240_v17, 0.0 }
 0x3ed   : > { %1948 = vadd.xlane.f32.xlu0 %v1947_v19 }
 0x3fa   : > { %2206 = vrot.lane.b32.xlu1 %v7055_v8, %s6605_s23  ;;  %v1936_v8 = vmul.f32 1.442695, %v1927_v22 }
 0x3fc   : > { %6241 = vpow2.f32 %v1936_v8 }
 0x3fe   : > { %2204 = vrot.lane.b32.xlu1 %v7060_v11, %s6605_s23 }
 0x402   : > { %2202 = vrot.lane.b32.xlu1 %v7065_v14, %s6605_s23 }
 0x403   : > { %2208 = vrot.lane.b32.xlu0 %v7050_v4, %s6605_s23  ;;  %v2073_v4 = vld [vmem:[%s7847_s10 + $0x8] sm:$0xff] }
 0x404   : > { %5732 = vmatpush3.msra.mxu0 %v2073_v4 }
 0x405   : > { %5733 = vmatprep.subr.mxu0 %v6603_v0 }
 0x406   : > { %5734 = vmatpush3.msra.mxu0 %v2072_v49 }
 0x407   : > { %2200 = vrot.lane.b32.xlu0 %v7071_v18, %s6605_s23  ;;  %5775 = vmatprep.subr.mxu0 %v6603_v0 }
 0x409   : > { %v6242_v11 = vpop.eup %6241 }
 0x40a   : > { %v1950_v26 = vsel %vm1919_vm8, %v6242_v11, 0.0 }
 0x40b   : > { %2192 = vrot.lane.b32.xlu0 %v7083_v25, %s6605_s23 }
 0x40f   : > { %2196 = vrot.lane.b32.xlu0 %v7109_v33, %s6605_s23 }
 0x426   : > { %1951 = vadd.xlane.f32.xlu1 %v1950_v26 }
 0x437   : > { %2190 = vrot.lane.b32.xlu1 %v7075_v20, %s6605_s23 }
 0x43b   : > { %2194 = vrot.lane.b32.xlu1 %v7097_v29, %s6605_s23 }
 0x43f   : > { %2198 = vrot.lane.b32.xlu1 %v7118_v34, %s6605_s23 }
 0x46a   : > { %v1940_v14 = vpop.xlane.xlu1 %1939 }
 0x46b   : > { %6243 = vrcp.f32 %v1940_v14 }
 0x46e   : > { %v1943_v18 = vpop.xlane.xlu0 %1942 }
 0x46f   : > { %6245 = vrcp.f32 %v1943_v18 }
 0x472   : > { %v1946_v25 = vpop.xlane.xlu1 %1945 }
 0x473   : > { %6247 = vrcp.f32 %v1946_v25 }
 0x476   : > { %v1949_v33 = vpop.xlane.xlu0 %1948  ;;  %v2207_v38 = vpop.permute.xlu1 %2206 }
 0x477   : > { %6249 = vrcp.f32 %v1949_v33 }
 0x478   : > { %v6244_v35 = vpop.eup %6243 }
 0x479   : > { %v1954_v20 = vmul.f32 %v6244_v35, %v6234_v9 }
 0x47a   : > { %v2209_v36 = vpop.permute.xlu0 %2208  ;;  %v2205_v40 = vpop.permute.xlu1 %2204 }
 0x47b   : > { %5717 = vmatmul.mubr.msk.f32.vlgmr.msra.gmra.mxu1 %vm1906_vm7, %v1954_v20 }
 0x47c   : > { %v6246_v29 = vpop.eup %6245  ;;  %5751 = vmatpush3.xpose.msk.msra.mxu1 %vm1780_vm5, %v2209_v36  ;;  %5719 = vmatprep.mubr.msk.f32.mxu1 %vm6604_vm0, %v6603_v0 }
 0x47d   : > { %5752 = vmatprep.subr.mxu1 %v6603_v0  ;;  %v1956_v34 = vmul.f32 %v6246_v29, %v6236_v12 }
 0x47e   : > { %v2203_v46 = vpop.permute.xlu1 %2202  ;;  %v2201_v47 = vpop.permute.xlu0 %2200 }
 0x47f   : > { %5720 = vmatmul.mubr.msk.f32.gmra.mxu1 %vm1906_vm7, %v1956_v34 }
 0x480   : > { %v6248_v39 = vpop.eup %6247  ;;  %5753 = vmatpush3.xpose.msk.msra.mxu1 %vm1780_vm5, %v2207_v38  ;;  %5722 = vmatprep.mubr.msk.f32.mxu1 %vm6604_vm0, %v6603_v0 }
 0x481   : > { %5754 = vmatprep.subr.mxu1 %v6603_v0  ;;  %v1958_v42 = vmul.f32 %v6248_v39, %v6238_v15 }
 0x482   : > { %v2193_v53 = vpop.permute.xlu0 %2192 }
 0x483   : > { %5723 = vmatmul.mubr.msk.f32.gmra.mxu1 %vm1906_vm7, %v1958_v42 }
 0x484   : > { %v6250_v43 = vpop.eup %6249  ;;  %5755 = vmatpush3.xpose.msk.msra.mxu1 %vm1780_vm5, %v2205_v40  ;;  %5725 = vmatprep.mubr.msk.f32.mxu1 %vm6604_vm0, %v6603_v0 }
 0x485   : > { %5756 = vmatprep.subr.mxu1 %v6603_v0  ;;  %v1960_v44 = vmul.f32 %v6250_v43, %v6240_v17 }
 0x486   : > { %v2197_v55 = vpop.permute.xlu0 %2196 }
 0x487   : > { %5726 = vmatmul.mubr.msk.f32.gmra.mxu1 %vm1906_vm7, %v1960_v44 }
 0x488   : > { %5757 = vmatpush3.xpose.msk.msra.mxu1 %vm1780_vm5, %v2203_v46  ;;  %5728 = vmatprep.mubr.msk.f32.mxu1 %vm6604_vm0, %v6603_v0 }
 0x489   : > { %5758 = vmatprep.subr.mxu1 %v6603_v0 }
 0x48c   : > { %5759 = vmatpush3.xpose.msk.msra.mxu1 %vm1780_vm5, %v2201_v47 }
 0x48d   : > { %5800 = vmatprep.subr.mxu1 %v6603_v0 }
 0x4af   : > { %v1952_v48 = vpop.xlane.xlu1 %1951 }
 0x4b0   : > { %6251 = vrcp.f32 %v1952_v48 }
 0x4b3   : > { %v2191_v52 = vpop.permute.xlu1 %2190 }
 0x4b7   : > { %v2195_v54 = vpop.permute.xlu1 %2194 }
 0x4bb   : > { %v2199_v56 = vpop.permute.xlu1 %2198 }
 0x4bd   : > { %v6252_v50 = vpop.eup %6251 }
 0x4be   : > { %v1962_v51 = vmul.f32 %v6252_v50, %v6242_v11 }
 0x4c0   : > { %5729 = vmatmul.mubr.msk.f32.gmra.mxu1 %vm1906_vm7, %v1962_v51 }
 0x4c1   : > { %5760 = vmatprep.mubr.msk.f32.mxu1 %vm6604_vm0, %v6603_v0 }
 0x4c4   : > { %5761 = vmatmul.mubr.msk.f32.vlgmr.msra.gmra.mxu1 %vm1780_vm5, %v2191_v52 }
 0x4c5   : > { %5763 = vmatprep.mubr.msk.f32.mxu1 %vm6604_vm0, %v6603_v0 }
 0x4c8   : > { %5764 = vmatmul.mubr.msk.f32.gmra.mxu1 %vm1780_vm5, %v2193_v53 }
 0x4c9   : > { %5766 = vmatprep.mubr.msk.f32.mxu1 %vm6604_vm0, %v6603_v0 }
 0x4cc   : > { %5767 = vmatmul.mubr.msk.f32.gmra.mxu1 %vm1780_vm5, %v2195_v54 }
 0x4cd   : > { %5769 = vmatprep.mubr.msk.f32.mxu1 %vm6604_vm0, %v6603_v0 }
 0x4d0   : > { %5770 = vmatmul.mubr.msk.f32.gmra.mxu1 %vm1780_vm5, %v2197_v55 }
 0x4d1   : > { %5772 = vmatprep.mubr.msk.f32.mxu1 %vm6604_vm0, %v6603_v0 }
 0x4d4   : > { %5773 = vmatmul.mubr.msk.f32.gmra.mxu1 %vm1780_vm5, %v2199_v56 }
 0x4d5   : > { %5804 = vmatprep.mubr.msk.f32.mxu1 %vm6604_vm0, %v6603_v0 }
 0x53b   : > { %v2048_v57 = vpop.f32.mrf.mxu1 }
 0x53c   : > { %5736 = vmatmul.mubr.msk.f32.vlgmr.msra.gmra.mxu0 %vm1780_vm5, %v2048_v57 }
 0x53d   : > { %v5718_v58 = vpop.f32.mrf.mxu1  ;;  %5738 = vmatprep.mubr.msk.f32.mxu0 %vm6604_vm0, %v6603_v0 }
 0x53f   : > { %v2053_v59 = vpop.f32.mrf.mxu1 }
 0x540   : > { %5739 = vmatmul.mubr.msk.f32.gmra.mxu0 %vm1780_vm5, %v2053_v59 }
 0x541   : > { %v5721_v60 = vpop.f32.mrf.mxu1  ;;  %5741 = vmatprep.mubr.msk.f32.mxu0 %vm6604_vm0, %v6603_v0 }
 0x543   : > { %v2058_v61 = vpop.f32.mrf.mxu1 }
 0x544   : > { %5742 = vmatmul.mubr.msk.f32.gmra.mxu0 %vm1780_vm5, %v2058_v61 }
 0x545   : > { %v5724_v62 = vpop.f32.mrf.mxu1  ;;  %5744 = vmatprep.mubr.msk.f32.mxu0 %vm6604_vm0, %v6603_v0 }
 0x547   : > { %v2063_v63 = vpop.f32.mrf.mxu1 }
 0x548   : > { %5745 = vmatmul.mubr.msk.f32.gmra.mxu0 %vm1780_vm5, %v2063_v63 }
 0x549   : > { %v5727_v1 = vpop.f32.mrf.mxu1  ;;  %5747 = vmatprep.mubr.msk.f32.mxu0 %vm6604_vm0, %v6603_v0 }
 0x580   : > { %v2068_v2 = vpop.f32.mrf.mxu1 }
 0x581   : > { %5748 = vmatmul.mubr.msk.f32.gmra.mxu0 %vm1780_vm5, %v2068_v2 }
 0x582   : > { %v5730_v3 = vpop.f32.mrf.mxu1  ;;  %5785 = vmatprep.mubr.msk.f32.mxu0 %vm6604_vm0, %v6603_v0 }
 0x584   : > { %v2296_v5 = vpop.f32.mrf.mxu1 }
 0x585   : > { %v2320_v6 = vmul.f32 0.25, %v2296_v5 }
 0x586   : > { %v5762_v7 = vpop.f32.mrf.mxu1 }
 0x587   : > { %v2325_v9 = vsel %vm1906_vm7, %v2320_v6, -inf  ;;  %v5284_v7 = vld [vmem:[%s7847_s10 + $0x18] sm:$0xff] }
 0x588   : > { %2326 = vmax.xlane.f32.xlu0 %v2325_v9  ;;  %v2301_v10 = vpop.f32.mrf.mxu1  ;;  %v5283_v9 = vld [vmem:[%s7847_s10 + $0x10] sm:$0xff]  ;;  %5801 = vmatpush3.msra.mxu1 %v5284_v7 }
 0x589   : > { %v2321_v12 = vmul.f32 0.25, %v2301_v10  ;;  %5802 = vmatprep.subr.mxu1 %v6603_v0 }
 0x58a   : > { %v5765_v13 = vpop.f32.mrf.mxu1  ;;  %5803 = vmatpush3.msra.mxu1 %v5283_v9 }
 0x58b   : > { %v2328_v15 = vsel %vm1906_vm7, %v2321_v12, -inf  ;;  %5842 = vmatprep.subr.mxu1 %v6603_v0 }
 0x58c   : > { %2329 = vmax.xlane.f32.xlu1 %v2328_v15  ;;  %v2306_v16 = vpop.f32.mrf.mxu1 }
 0x58d   : > { %v2322_v17 = vmul.f32 0.25, %v2306_v16 }
 0x58e   : > { %v5768_v19 = vpop.f32.mrf.mxu1 }
 0x58f   : > { %v2331_v21 = vsel %vm1906_vm7, %v2322_v17, -inf }
 0x590   : > { %2332 = vmax.xlane.f32.xlu0 %v2331_v21  ;;  %v2311_v22 = vpop.f32.mrf.mxu1 }
 0x591   : > { %v2323_v8 = vmul.f32 0.25, %v2311_v22 }
 0x592   : > { %v5771_v11 = vpop.f32.mrf.mxu1 }
 0x593   : > { %v2334_v26 = vsel %vm1906_vm7, %v2323_v8, -inf }
 0x594   : > { %2335 = vmax.xlane.f32.xlu0 %v2334_v26  ;;  %v2316_v4 = vpop.f32.mrf.mxu1 }
 0x595   : > { %v2324_v14 = vmul.f32 0.25, %v2316_v4 }
 0x596   : > { %v5774_v18 = vpop.f32.mrf.mxu1 }
 0x597   : > { %v2337_v25 = vsel %vm1919_vm8, %v2324_v14, -inf }
 0x598   : > { %2338 = vmax.xlane.f32.xlu0 %v2337_v25 }
 0x59d   : > { %2390 = vrot.lane.b32.xlu1 %v7079_v23, %s6605_s23 }
 0x5a1   : > { %2388 = vrot.lane.b32.xlu1 %v7087_v27, %s6605_s23 }
 0x5ae   : > { %2392 = vrot.lane.b32.xlu0 %v7081_v24, %s6605_s23 }
 0x5fc   : > { %v7228_v33 = vpop.f32.mrf.mxu0 }
 0x5fe   : > { %v5737_v35 = vpop.f32.mrf.mxu0 }
 0x600   : > { %v7230_v20 = vpop.f32.mrf.mxu0 }
 0x602   : > { %v5740_v36 = vpop.f32.mrf.mxu0 }
 0x604   : > { %v7232_v38 = vpop.f32.mrf.mxu0 }
 0x606   : > { %v5743_v29 = vpop.f32.mrf.mxu0 }
 0x608   : > { %v7234_v34 = vpop.f32.mrf.mxu0 }
 0x60a   : > { %v5746_v39 = vpop.f32.mrf.mxu0 }
 0x611   : > { %v2327_v40 = vpop.xlane.xlu0 %2326 }
 0x612   : > { %v2340_v23 = vsub.f32 %v2320_v6, %v2327_v40 }
 0x614   : > { %v2345_v42 = vmul.f32 1.442695, %v2340_v23 }
 0x615   : > { %v2330_v43 = vpop.xlane.xlu1 %2329 }
 0x616   : > { %6253 = vpow2.f32 %v2345_v42  ;;  %v2341_v27 = vsub.f32 %v2321_v12, %v2330_v43 }
 0x618   : > { %v2347_v44 = vmul.f32 1.442695, %v2341_v27 }
 0x619   : > { %v2333_v24 = vpop.xlane.xlu0 %2332  ;;  %v2391_v54 = vpop.permute.xlu1 %2390 }
 0x61a   : > { %6255 = vpow2.f32 %v2347_v44  ;;  %v2342_v46 = vsub.f32 %v2322_v17, %v2333_v24  ;;  %v5266_v44 = vld [vmem:[#allocation3] ss:$0 sm:$0xff] }
 0x61b   : > { %v2185_v24 = vadd.f32 %v5266_v44, %v7228_v33 }
 0x61c   : > { %v2349_v47 = vmul.f32 1.442695, %v2342_v46 }
 0x61d   : > { %v2336_v48 = vpop.xlane.xlu0 %2335  ;;  %v2389_v60 = vpop.permute.xlu1 %2388 }
 0x61e   : > { %6257 = vpow2.f32 %v2349_v47  ;;  %v2343_v49 = vsub.f32 %v2323_v8, %v2336_v48 }
 0x620   : > { %v2351_v50 = vmul.f32 1.442695, %v2343_v49  ;;  %v2186_v49 = vadd.f32 %v5266_v44, %v7230_v20  ;;  %v2188_v20 = vadd.f32 %v5266_v44, %v7234_v34 }
 0x621   : > { %v2339_v51 = vpop.xlane.xlu0 %2338 }
 0x622   : > { %6259 = vpow2.f32 %v2351_v50  ;;  %v2344_v52 = vsub.f32 %v2324_v14, %v2339_v51 }
 0x623   : > { %v6254_v53 = vpop.eup %6253 }
 0x624   : > { %v2353_v55 = vmul.f32 1.442695, %v2344_v52  ;;  %v2355_v56 = vsel %vm1906_vm7, %v6254_v53, 0.0 }
 0x625   : > { %2356 = vadd.xlane.f32.xlu1 %v2355_v56  ;;  %v2393_v57 = vpop.permute.xlu0 %2392 }
 0x626   : > { %6261 = vpow2.f32 %v2353_v55  ;;  %5776 = vmatpush3.msk.msra.mxu0 %vm1978_vm6, %v2393_v57  ;;  %v2187_v55 = vadd.f32 %v5266_v44, %v7232_v38 }
 0x627   : > { %v6256_v58 = vpop.eup %6255  ;;  %5777 = vmatprep.subr.mxu0 %v6603_v0 }
 0x628   : > { %5778 = vmatpush3.msra.mxu0 %v2391_v54  ;;  %v2358_v59 = vsel %vm1906_vm7, %v6256_v58, 0.0 }
 0x629   : > { %2359 = vadd.xlane.f32.xlu0 %v2358_v59  ;;  %5779 = vmatprep.subr.mxu0 %v6603_v0 }
 0x62a   : > { %5780 = vmatpush3.msra.mxu0 %v2389_v60 }
 0x62b   : > { %v6258_v61 = vpop.eup %6257  ;;  %5781 = vmatprep.subr.mxu0 %v6603_v0 }
 0x62c   : > { %v2361_v62 = vsel %vm1906_vm7, %v6258_v61, 0.0 }
 0x62d   : > { %2362 = vadd.xlane.f32.xlu1 %v2361_v62 }
 0x62f   : > { %v6260_v63 = vpop.eup %6259 }
 0x630   : > { %v2364_v1 = vsel %vm1906_vm7, %v6260_v63, 0.0 }
 0x631   : > { %2365 = vadd.xlane.f32.xlu0 %v2364_v1 }
 0x633   : > { %v6262_v2 = vpop.eup %6261 }
 0x634   : > { %v2367_v3 = vsel %vm1919_vm8, %v6262_v2, 0.0 }
 0x635   : > { %2368 = vadd.xlane.f32.xlu1 %v2367_v3 }
 0x641   : > { %v7245_v5 = vpop.f32.mrf.mxu0 }
 0x642   : > { %v2189_v38 = vadd.f32 %v5266_v44, %v7245_v5  ;;  %v2834_v44 = vld [vmem:[%s7849_s11 + $0x20] sm:$0xff] }
 0x643   : > { %v5749_v6 = vpop.f32.mrf.mxu0 }
 0x646   : > { %2386 = vrot.lane.b32.xlu1 %v7094_v28, %s6605_s23 }
 0x647   : > { %2384 = vrot.lane.b32.xlu0 %v7106_v31, %s6605_s23 }
 0x6ae   : > { %v2357_v10 = vpop.xlane.xlu1 %2356 }
 0x6af   : > { %6263 = vrcp.f32 %v2357_v10 }
 0x6b2   : > { %v2360_v12 = vpop.xlane.xlu0 %2359 }
 0x6b3   : > { %6265 = vrcp.f32 %v2360_v12 }
 0x6b6   : > { %v2363_v13 = vpop.xlane.xlu1 %2362 }
 0x6b7   : > { %6267 = vrcp.f32 %v2363_v13 }
 0x6ba   : > { %v2366_v15 = vpop.xlane.xlu0 %2365 }
 0x6bb   : > { %6269 = vrcp.f32 %v2366_v15 }
 0x6bc   : > { %v6264_v28 = vpop.eup %6263 }
 0x6bd   : > { %v2371_v31 = vmul.f32 %v6264_v28, %v6254_v53 }
 0x6be   : > { %v2369_v16 = vpop.xlane.xlu1 %2368  ;;  %v2385_v19 = vpop.permute.xlu0 %2384 }
 0x6bf   : > { %6271 = vrcp.f32 %v2369_v16 }
 0x6c0   : > { %v6266_v21 = vpop.eup %6265 }
 0x6c1   : > { %v2373_v22 = vmul.f32 %v6266_v21, %v6256_v58 }
 0x6c2   : > { %v2387_v17 = vpop.permute.xlu1 %2386 }
 0x6c3   : > { %5782 = vmatpush3.msra.mxu0 %v2387_v17 }
 0x6c4   : > { %5783 = vmatprep.subr.mxu0 %v6603_v0  ;;  %v6268_v8 = vpop.eup %6267 }
 0x6c5   : > { %5784 = vmatpush3.msra.mxu0 %v2385_v19  ;;  %v2375_v11 = vmul.f32 %v6268_v8, %v6258_v61 }
 0x6c6   : > { %5786 = vmatmul.mubr.msk.f32.vlgmr.msra.gmra.mxu0 %vm1906_vm7, %v2371_v31  ;;  %5819 = vmatprep.subr.mxu0 %v6603_v0 }
 0x6c7   : > { %5788 = vmatprep.mubr.msk.f32.mxu0 %vm6604_vm0, %v6603_v0 }
 0x6c8   : > { %v6270_v26 = vpop.eup %6269 }
 0x6c9   : > { %v2377_v4 = vmul.f32 %v6270_v26, %v6260_v63 }
 0x6ca   : > { %5789 = vmatmul.mubr.msk.f32.gmra.mxu0 %vm1906_vm7, %v2373_v22 }
 0x6cb   : > { %5791 = vmatprep.mubr.msk.f32.mxu0 %vm6604_vm0, %v6603_v0 }
 0x6cc   : > { %v6272_v14 = vpop.eup %6271 }
 0x6cd   : > { %v2379_v18 = vmul.f32 %v6272_v14, %v6262_v2 }
 0x6ce   : > { %5792 = vmatmul.mubr.msk.f32.gmra.mxu0 %vm1906_vm7, %v2375_v11 }
 0x6cf   : > { %5794 = vmatprep.mubr.msk.f32.mxu0 %vm6604_vm0, %v6603_v0 }
 0x6d2   : > { %5795 = vmatmul.mubr.msk.f32.gmra.mxu0 %vm1906_vm7, %v2377_v4 }
 0x6d3   : > { %5797 = vmatprep.mubr.msk.f32.mxu0 %vm6604_vm0, %v6603_v0 }
 0x6d6   : > { %5798 = vmatmul.mubr.msk.f32.gmra.mxu0 %vm1906_vm7, %v2379_v18 }
 0x6d7   : > { %5827 = vmatprep.mubr.msk.f32.mxu0 %vm6604_vm0, %v6603_v0 }
 0x786   : > { %v2481_v25 = vpop.f32.mrf.mxu0 }
 0x787   : > { %5805 = vmatmul.mubr.msk.f32.vlgmr.msra.gmra.mxu1 %vm1780_vm5, %v2481_v25 }
 0x788   : > { %v5787_v35 = vpop.f32.mrf.mxu0  ;;  %5807 = vmatprep.mubr.msk.f32.mxu1 %vm6604_vm0, %v6603_v0 }
 0x78a   : > { %v2486_v36 = vpop.f32.mrf.mxu0 }
 0x78b   : > { %5808 = vmatmul.mubr.msk.f32.gmra.mxu1 %vm1780_vm5, %v2486_v36 }
 0x78c   : > { %v5790_v29 = vpop.f32.mrf.mxu0  ;;  %5810 = vmatprep.mubr.msk.f32.mxu1 %vm6604_vm0, %v6603_v0 }
 0x78d   : > { %v2712_v29 = vld [vmem:[%s7848_s18 + $0x18] sm:$0xff] }
 0x78e   : > { %v2491_v39 = vpop.f32.mrf.mxu0  ;;  %5820 = vmatpush3.msra.mxu0 %v2712_v29 }
 0x78f   : > { %5811 = vmatmul.mubr.msk.f32.gmra.mxu1 %vm1780_vm5, %v2491_v39  ;;  %5821 = vmatprep.subr.mxu0 %v6603_v0  ;;  %v2711_v39 = vld [vmem:[%s7848_s18 + $0x10] sm:$0xff] }
 0x790   : > { %v5793_v40 = vpop.f32.mrf.mxu0  ;;  %5813 = vmatprep.mubr.msk.f32.mxu1 %vm6604_vm0, %v6603_v0  ;;  %5822 = vmatpush3.msra.mxu0 %v2711_v39  ;;  %v3045_v39 = vld [vmem:[%s7851_s4 + $0x18] sm:$0xff] }
 0x791   : > { %v2710_v40 = vld [vmem:[%s7848_s18 + $0x8] sm:$0xff]  ;;  %5823 = vmatprep.subr.mxu0 %v6603_v0 }
 0x792   : > { %v2496_v23 = vpop.f32.mrf.mxu0  ;;  %5824 = vmatpush3.msra.mxu0 %v2710_v40 }
 0x793   : > { %5814 = vmatmul.mubr.msk.f32.gmra.mxu1 %vm1780_vm5, %v2496_v23  ;;  %v2709_v23 = vld [vmem:[%s7848_s18] sm:$0xff]  ;;  %5825 = vmatprep.subr.mxu0 %v6603_v0 }
 0x794   : > { %v5796_v42 = vpop.f32.mrf.mxu0  ;;  %5816 = vmatprep.mubr.msk.f32.mxu1 %vm6604_vm0, %v6603_v0  ;;  %5826 = vmatpush3.msra.mxu0 %v2709_v23 }
 0x795   : > { %5884 = vmatprep.subr.mxu0 %v6603_v0  ;;  %v2837_v42 = vld [vmem:[%s7849_s11 + $0x38] sm:$0xff] }
 0x796   : > { %v2501_v43 = vpop.f32.mrf.mxu0  ;;  %5843 = vmatpush3.msra.mxu1 %v2837_v42  ;;  %v3044_v42 = vld [vmem:[%s7851_s4 + $0x10] sm:$0xff] }
 0x797   : > { %5817 = vmatmul.mubr.msk.f32.gmra.mxu1 %vm1780_vm5, %v2501_v43  ;;  %v2836_v43 = vld [vmem:[%s7849_s11 + $0x30] sm:$0xff]  ;;  %5844 = vmatprep.subr.mxu1 %v6603_v0 }
 0x798   : > { %v5799_v27 = vpop.f32.mrf.mxu0  ;;  %5858 = vmatprep.mubr.msk.f32.mxu1 %vm6604_vm0, %v6603_v0  ;;  %5845 = vmatpush3.msra.mxu1 %v2836_v43 }
 0x799   : > { %v2835_v27 = vld [vmem:[%s7849_s11 + $0x28] sm:$0xff]  ;;  %5846 = vmatprep.subr.mxu1 %v6603_v0 }
 0x79a   : > { %5847 = vmatpush3.msra.mxu1 %v2835_v27 }
 0x79b   : > { %5848 = vmatprep.subr.mxu1 %v6603_v0 }
 0x79c   : > { %5849 = vmatpush3.msra.mxu1 %v2834_v44  ;;  %v3043_v44 = vld [vmem:[%s7851_s4 + $0x8] sm:$0xff] }
 0x79d   : > { %5850 = vmatprep.subr.mxu1 %v6603_v0 }
 0x847   : > { %v2589_v46 = vpop.f32.mrf.mxu1 }
 0x848   : > { %v2613_v47 = vadd.f32 %v2589_v46, %v2185_v24  ;;  %v2833_v24 = vld [vmem:[%s7849_s11 + $0x18] sm:$0xff] }
 0x849   : > { %v5806_v48 = vpop.f32.mrf.mxu1  ;;  %5851 = vmatpush3.msra.mxu1 %v2833_v24 }
 0x84a   : > { %v2618_v50 = vadd.f32 %v2613_v47, %v6972_v30  ;;  %5852 = vmatprep.subr.mxu1 %v6603_v0 }
 0x84b   : > { %v2594_v51 = vpop.f32.mrf.mxu1 }
 0x84c   : > { %v2614_v52 = vadd.f32 %v2594_v51, %v2186_v49  ;;  %v2624_v53 = vsel %vm1265_vm1, %v2618_v50, 0.0 }
 0x84d   : > { %2625 = vadd.xlane.f32.xlu1 %v2624_v53  ;;  %v5809_v54 = vpop.f32.mrf.mxu1 }
 0x84e   : > { %v2619_v56 = vadd.f32 %v2614_v52, %v6975_v32 }
 0x84f   : > { %v2599_v57 = vpop.f32.mrf.mxu1 }
 0x850   : > { %v2615_v58 = vadd.f32 %v2599_v57, %v2187_v55  ;;  %v2627_v33 = vsel %vm1265_vm1, %v2619_v56, 0.0 }
 0x851   : > { %2628 = vadd.xlane.f32.xlu0 %v2627_v33  ;;  %v5812_v59 = vpop.f32.mrf.mxu1 }
 0x852   : > { %v2620_v30 = vadd.f32 %v2615_v58, %v6987_v37  ;;  %v2623_v59 = vld [vmem:[%s7850_s1] sm:$0x3]  ;;  %s7856_s1 = sld [smem:[#allocation30_spill]] }
 0x853   : > { %v2604_v60 = vpop.f32.mrf.mxu1 }
 0x854   : > { %v2616_v61 = vadd.f32 %v2604_v60, %v2188_v20  ;;  %v2630_v62 = vsel %vm1265_vm1, %v2620_v30, 0.0 }
 0x855   : > { %2631 = vadd.xlane.f32.xlu0 %v2630_v62  ;;  %v5815_v63 = vpop.f32.mrf.mxu1 }
 0x856   : > { %v2621_v32 = vadd.f32 %v2616_v61, %v6999_v41 }
 0x857   : > { %v2609_v1 = vpop.f32.mrf.mxu1 }
 0x858   : > { %v2617_v2 = vadd.f32 %v2609_v1, %v2189_v38  ;;  %v2633_v3 = vsel %vm1265_vm1, %v2621_v32, 0.0 }
 0x859   : > { %2634 = vadd.xlane.f32.xlu0 %v2633_v3  ;;  %v5818_v6 = vpop.f32.mrf.mxu1 }
 0x85a   : > { %v2622_v34 = vadd.f32 %v2617_v2, %v7011_v45 }
 0x85c   : > { %v2637_v37 = vsel %vm2636_vm9, %v2622_v34, 0.0 }
 0x85d   : > { %2638 = vadd.xlane.f32.xlu1 %v2637_v37 }
 0x8d6   : > { %v2626_v7 = vpop.xlane.xlu1 %2625 }
 0x8d7   : > { %v2641_v9 = vmul.f32 0.03125, %v2626_v7 }
 0x8d9   : > { %v7302_v10 = vsub.f32 %v2618_v50, %v2641_v9  ;;  %v2691_v50 = vlaneseq }
 0x8da   : > { %v2629_v12 = vpop.xlane.xlu0 %2628 }
 0x8db   : > { %v2642_v5 = vmul.f32 0.03125, %v2629_v12  ;;  %v2651_v41 = vmul.f32 %v7302_v10, %v7302_v10  ;;  %v2692_v54 = vshrl.u32 %v2691_v50, 7 }
 0x8dd   : > { %v7306_v13 = vsub.f32 %v2619_v56, %v2642_v5  ;;  %v2656_v15 = vsel %vm1265_vm1, %v2651_v41, 0.0  ;;  %v7345_v58 = vsub.s32 0, %v2692_v54 }
 0x8de   : > { %v2632_v16 = vpop.xlane.xlu0 %2631  ;;  %2657 = vadd.xlane.f32.xlu0 %v2656_v15 }
 0x8df   : > { %v2643_v28 = vmul.f32 0.03125, %v2632_v16  ;;  %v2652_v45 = vmul.f32 %v7306_v13, %v7306_v13  ;;  %v2694_v61 = vrot.slane %v2623_v59, %v7345_v58 }
 0x8e1   : > { %v7311_v17 = vsub.f32 %v2620_v30, %v2643_v28  ;;  %v2659_v31 = vsel %vm1265_vm1, %v2652_v45, 0.0  ;;  %v7348_v30 = vsub.s32 1, %v2692_v54 }
 0x8e2   : > { %v2635_v19 = vpop.xlane.xlu0 %2634  ;;  %2660 = vadd.xlane.f32.xlu1 %v2659_v31 }
 0x8e3   : > { %v2644_v21 = vmul.f32 0.03125, %v2635_v19  ;;  %v2653_v22 = vmul.f32 %v7311_v17, %v7311_v17  ;;  %v2703_v1 = vrot.slane %v2623_v59, %v7348_v30  ;;  %v2832_v19 = vld [vmem:[%s7849_s11 + $0x10] sm:$0xff]  ;;  %v5309_v59 = vld [vmem:[%s7853_s26 + $0x1] ss:$0 sm:$0xff] }
 0x8e4   : > { %5853 = vmatpush3.msra.mxu1 %v2832_v19  ;;  %v5314_v19 = vld [vmem:[%s7851_s4 + $0x58] sm:$0xff] }
 0x8e5   : > { %v7316_v8 = vsub.f32 %v2621_v32, %v2644_v21  ;;  %v2662_v11 = vsel %vm1265_vm1, %v2653_v22, 0.0  ;;  %5854 = vmatprep.subr.mxu1 %v6603_v0  ;;  %v2831_v21 = vld [vmem:[%s7849_s11 + $0x8] sm:$0xff]  ;;  %v2830_v22 = vld [vmem:[%s7849_s11] sm:$0xff] }
 0x8e6   : > { %2663 = vadd.xlane.f32.xlu0 %v2662_v11  ;;  %v2639_v26 = vpop.xlane.xlu1 %2638  ;;  %5855 = vmatpush3.msra.mxu1 %v2831_v21  ;;  %v5306_v11 = vld [vmem:[%s7851_s4 + $0x30] sm:$0xff] }
 0x8e7   : > { %v2645_v4 = vmul.f32 0.03125, %v2639_v26  ;;  %v2654_v14 = vmul.f32 %v7316_v8, %v7316_v8  ;;  %5856 = vmatprep.subr.mxu1 %v6603_v0  ;;  %v5305_v26 = vld [vmem:[%s7851_s4 + $0x28] sm:$0xff]  ;;  %v5313_v21 = vld [vmem:[%s7851_s4 + $0x50] sm:$0xff] }
 0x8e8   : > { %5857 = vmatpush3.msra.mxu1 %v2830_v22  ;;  %v5312_v22 = vld [vmem:[%s7851_s4 + $0x48] sm:$0xff] }
 0x8e9   : > { %v7321_v18 = vsub.f32 %v2622_v34, %v2645_v4  ;;  %v2665_v25 = vsel %vm1265_vm1, %v2654_v14, 0.0  ;;  %5873 = vmatprep.subr.mxu1 %v6603_v0  ;;  %v5304_v4 = vld [vmem:[%s7851_s4 + $0x20] sm:$0xff] }
 0x8ea   : > { %2666 = vadd.xlane.f32.xlu1 %v2665_v25  ;;  %v7401_v14 = vld [vmem:[%s7852_s0] sm:$0xff]  ;;  %s7857_s0 = sld [smem:[#allocation37_spill]] }
 0x8eb   : > { %v2655_v35 = vmul.f32 %v7321_v18, %v7321_v18 }
 0x8ed   : > { %v2668_v36 = vsel %vm2636_vm9, %v2655_v35, 0.0 }
 0x8ee   : > { %2669 = vadd.xlane.f32.xlu0 %v2668_v36 }
 0x967   : > { %v2658_v46 = vpop.xlane.xlu0 %2657 }
 0x968   : > { %v2671_v47 = vmul.f32 0.03125, %v2658_v46 }
 0x96a   : > { %v2676_v48 = vadd.f32 1e-05, %v2671_v47  ;;  %v3042_v47 = vld [vmem:[%s7851_s4] sm:$0xff] }
 0x96b   : > { %v2661_v49 = vpop.xlane.xlu1 %2660 }
 0x96c   : > { %6273 = vrsqrt.f32 %v2676_v48  ;;  %v2672_v51 = vmul.f32 0.03125, %v2661_v49 }
 0x96e   : > { %v2677_v52 = vadd.f32 1e-05, %v2672_v51 }
 0x96f   : > { %v2664_v53 = vpop.xlane.xlu0 %2663 }
 0x970   : > { %6275 = vrsqrt.f32 %v2677_v52  ;;  %v2673_v55 = vmul.f32 0.03125, %v2664_v53 }
 0x972   : > { %v2678_v56 = vadd.f32 1e-05, %v2673_v55 }
 0x973   : > { %v2667_v57 = vpop.xlane.xlu1 %2666 }
 0x974   : > { %6277 = vrsqrt.f32 %v2678_v56  ;;  %v2674_v33 = vmul.f32 0.03125, %v2667_v57 }
 0x976   : > { %v2679_v20 = vadd.f32 1e-05, %v2674_v33 }
 0x977   : > { %v2670_v60 = vpop.xlane.xlu0 %2669 }
 0x978   : > { %6279 = vrsqrt.f32 %v2679_v20  ;;  %v2675_v62 = vmul.f32 0.03125, %v2670_v60 }
 0x979   : > { %v6274_v63 = vpop.eup %6273 }
 0x97a   : > { %v2686_v38 = vmul.f32 %v6274_v63, %v7302_v10  ;;  %v2680_v32 = vadd.f32 1e-05, %v2675_v62 }
 0x97c   : > { %v2695_v2 = vmul.f32 %v2694_v61, %v2686_v38  ;;  %6281 = vrsqrt.f32 %v2680_v32 }
 0x97d   : > { %v6276_v3 = vpop.eup %6275 }
 0x97e   : > { %v7353_v6 = vadd.f32 %v2703_v1, %v2695_v2  ;;  %v2687_v34 = vmul.f32 %v6276_v3, %v7306_v13 }
 0x980   : > { %5828 = vmatmul.mubr.msk.f32.vlgmr.msra.gmra.mxu0 %vm1265_vm1, %v7353_v6  ;;  %v2696_v37 = vmul.f32 %v2694_v61, %v2687_v34 }
 0x981   : > { %v6278_v7 = vpop.eup %6277  ;;  %5830 = vmatprep.mubr.msk.f32.mxu0 %vm6604_vm0, %v6603_v0 }
 0x982   : > { %v7360_v9 = vadd.f32 %v2703_v1, %v2696_v37  ;;  %v2688_v10 = vmul.f32 %v6278_v7, %v7311_v17 }
 0x984   : > { %5831 = vmatmul.mubr.msk.f32.gmra.mxu0 %vm1265_vm1, %v7360_v9  ;;  %v2697_v12 = vmul.f32 %v2694_v61, %v2688_v10 }
 0x985   : > { %v6280_v5 = vpop.eup %6279  ;;  %5833 = vmatprep.mubr.msk.f32.mxu0 %vm6604_vm0, %v6603_v0 }
 0x986   : > { %v7367_v41 = vadd.f32 %v2703_v1, %v2697_v12  ;;  %v2689_v13 = vmul.f32 %v6280_v5, %v7316_v8  ;;  %v5307_v8 = vld [vmem:[%s7851_s4 + $0x38] sm:$0xff] }
 0x987   : > { %5885 = vmatpush3.msra.mxu0 %v5307_v8  ;;  %v5311_v8 = vld [vmem:[%s7851_s4 + $0x40] sm:$0xff] }
 0x988   : > { %5834 = vmatmul.mubr.msk.f32.gmra.mxu0 %vm1265_vm1, %v7367_v41  ;;  %v2698_v15 = vmul.f32 %v2694_v61, %v2689_v13  ;;  %5886 = vmatprep.subr.mxu0 %v6603_v0 }
 0x989   : > { %v6282_v16 = vpop.eup %6281  ;;  %5836 = vmatprep.mubr.msk.f32.mxu0 %vm6604_vm0, %v6603_v0  ;;  %5887 = vmatpush3.msra.mxu0 %v5306_v11 }
 0x98a   : > { %v7374_v28 = vadd.f32 %v2703_v1, %v2698_v15  ;;  %v2690_v45 = vmul.f32 %v6282_v16, %v7321_v18  ;;  %5888 = vmatprep.subr.mxu0 %v6603_v0  ;;  %v5290_v18 = vld [vmem:[#allocation5] ss:$0 sm:$0xff]  ;;  %v5302_v15 = vld [vmem:[%s7853_s26] ss:$0 sm:$0xff] }
 0x98b   : > { %5889 = vmatpush3.msra.mxu0 %v5305_v26 }
 0x98c   : > { %5837 = vmatmul.mubr.msk.f32.gmra.mxu0 %vm1265_vm1, %v7374_v28  ;;  %v2699_v17 = vmul.f32 %v2694_v61, %v2690_v45  ;;  %5890 = vmatprep.subr.mxu0 %v6603_v0  ;;  %v7438_v61 = vld [vmem:[#allocation7] ss:$0 sm:$0xff] }
 0x98d   : > { %5839 = vmatprep.mubr.msk.f32.mxu0 %vm6604_vm0, %v6603_v0  ;;  %5891 = vmatpush3.msra.mxu0 %v5304_v4 }
 0x98e   : > { %v7381_v31 = vadd.f32 %v2703_v1, %v2699_v17  ;;  %5895 = vmatprep.subr.mxu0 %v6603_v0 }
 0x990   : > { %5840 = vmatmul.mubr.msk.f32.gmra.mxu0 %vm1265_vm1, %v7381_v31 }
 0x991   : > { %5892 = vmatprep.mubr.msk.f32.mxu0 %vm6604_vm0, %v6603_v0 }
 0x994   : > { %5893 = vmatmul.mubr.msk.f32.vlgmr.msra.gmra.mxu0 %vm1265_vm1, %v7401_v14 }
 0x995   : > { %5903 = vmatprep.mubr.msk.f32.mxu0 %vm6604_vm0, %v6603_v0  ;;  %5896 = vmatpush3.msra.mxu0 %v5314_v19 }
 0x996   : > { %5897 = vmatprep.subr.mxu0 %v6603_v0 }
 0x997   : > { %5898 = vmatpush3.msra.mxu0 %v5313_v21 }
 0x998   : > { %5899 = vmatprep.subr.mxu0 %v6603_v0 }
 0x999   : > { %5900 = vmatpush3.msra.mxu0 %v5312_v22 }
 0x99a   : > { %5901 = vmatprep.subr.mxu0 %v6603_v0 }
 0x99b   : > { %5902 = vmatpush3.msra.mxu0 %v5311_v8 }
 0x99c   : > { %5904 = vmatmul.mubr.f32.vlgmr.msra.gmra.mxu0 %v6603_v0  ;;  %5911 = vmatprep.subr.mxu0 %v6603_v0 }
 0x99d   : > { %5913 = vmatprep.mubr.msk.f32.mxu0 %vm6604_vm0, %v6603_v0 }
 0xa40   : > { %v2801_v25 = vpop.f32.mrf.mxu0 }
 0xa41   : > { %v2802_v35 = vadd.f32 %v5290_v18, %v2801_v25 }
 0xa42   : > { %v5829_v36 = vpop.f32.mrf.mxu0 }
 0xa43   : > { %v2825_v29 = vmax.f32 %v2802_v35, 0.0 }
 0xa44   : > { %v2806_v40 = vpop.f32.mrf.mxu0 }
 0xa45   : > { %v2807_v23 = vadd.f32 %v5290_v18, %v2806_v40  ;;  %5859 = vmatmul.mubr.msk.f32.vlgmr.msra.gmra.mxu1 %vm2845_vm10, %v2825_v29  ;;  %v5316_v40 = vld [vmem:[%s7853_s26 + $0x2] ss:$0 sm:$0xff] }
 0xa46   : > { %v5832_v43 = vpop.f32.mrf.mxu0  ;;  %5861 = vmatprep.mubr.msk.f32.mxu1 %vm6604_vm0, %v6603_v0  ;;  %5874 = vmatpush3.msra.mxu1 %v3045_v39 }
 0xa47   : > { %v2826_v27 = vmax.f32 %v2807_v23, 0.0  ;;  %5875 = vmatprep.subr.mxu1 %v6603_v0 }
 0xa48   : > { %v2811_v24 = vpop.f32.mrf.mxu0  ;;  %5876 = vmatpush3.msra.mxu1 %v3044_v42 }
 0xa49   : > { %v2812_v46 = vadd.f32 %v5290_v18, %v2811_v24  ;;  %5862 = vmatmul.mubr.msk.f32.gmra.mxu1 %vm2845_vm10, %v2826_v27  ;;  %5877 = vmatprep.subr.mxu1 %v6603_v0  ;;  %v3459_v27 = vld [vmem:[%s7854_s2 + $0x8] sm:$0xff] }
 0xa4a   : > { %v5835_v48 = vpop.f32.mrf.mxu0  ;;  %5864 = vmatprep.mubr.msk.f32.mxu1 %vm6604_vm0, %v6603_v0  ;;  %5878 = vmatpush3.msra.mxu1 %v3043_v44 }
 0xa4b   : > { %v2827_v49 = vmax.f32 %v2812_v46, 0.0  ;;  %5879 = vmatprep.subr.mxu1 %v6603_v0 }
 0xa4c   : > { %v2816_v50 = vpop.f32.mrf.mxu0  ;;  %5880 = vmatpush3.msra.mxu1 %v3042_v47 }
 0xa4d   : > { %v2817_v51 = vadd.f32 %v5290_v18, %v2816_v50  ;;  %5865 = vmatmul.mubr.msk.f32.gmra.mxu1 %vm2845_vm10, %v2827_v49  ;;  %5906 = vmatprep.subr.mxu1 %v6603_v0  ;;  %v3458_v49 = vld [vmem:[%s7854_s2] sm:$0xff] }
 0xa4e   : > { %v5838_v52 = vpop.f32.mrf.mxu0  ;;  %5867 = vmatprep.mubr.msk.f32.mxu1 %vm6604_vm0, %v6603_v0 }
 0xa4f   : > { %v2828_v53 = vmax.f32 %v2817_v51, 0.0 }
 0xa50   : > { %v2821_v54 = vpop.f32.mrf.mxu0 }
 0xa51   : > { %v2822_v55 = vadd.f32 %v5290_v18, %v2821_v54  ;;  %5868 = vmatmul.mubr.msk.f32.gmra.mxu1 %vm2845_vm10, %v2828_v53 }
 0xa52   : > { %v5841_v56 = vpop.f32.mrf.mxu0  ;;  %5870 = vmatprep.mubr.msk.f32.mxu1 %vm6604_vm0, %v6603_v0 }
 0xa53   : > { %v2829_v57 = vmax.f32 %v2822_v55, 0.0 }
 0xa54   : > { %v3205_v33 = vpop.f32.mrf.mxu0 }
 0xa55   : > { %5871 = vmatmul.mubr.msk.f32.gmra.mxu1 %vm2845_vm10, %v2829_v57  ;;  %v3206_v20 = vadd.f32 %v5309_v59, %v3205_v33 }
 0xa56   : > { %5881 = vmatprep.mubr.msk.f32.mxu1 %vm6604_vm0, %v6603_v0  ;;  %v5894_v60 = vpop.f32.mrf.mxu0 }
 0xa59   : > { %5882 = vmatmul.mubr.msk.f32.vlgmr.msra.gmra.mxu1 %vm1265_vm1, %v7401_v14 }
 0xa5a   : > { %5908 = vmatprep.mubr.msk.f32.mxu1 %vm6604_vm0, %v6603_v0  ;;  %5907 = vmatpush3.xpose.msk.msra.mxu1 %vm1780_vm5, %v3206_v20 }
 0xa5b   : > { %5916 = vmatprep.subr.mxu1 %v6603_v0 }
 0xa5c   : > { %v3291_v23 = vpop.f32.mrf.mxu0 }
 0xa5d   : > { %v3292_v42 = vadd.f32 %v5316_v40, %v3291_v23 }
 0xa5e   : > { %v5905_v43 = vpop.f32.mrf.mxu0 }
 0xa5f   : > { %5912 = vmatpush3.msra.mxu0 %v3292_v42 }
 0xa60   : > { %5923 = vmatprep.subr.mxu0 %v6603_v0 }
 0xb05   : > { %v2927_v62 = vpop.f32.mrf.mxu1 }
 0xb06   : > { %v7441_v63 = vadd.f32 %v7438_v61, %v2927_v62 }
 0xb07   : > { %v5860_v38 = vpop.f32.mrf.mxu1 }
 0xb09   : > { %v2932_v32 = vpop.f32.mrf.mxu1 }
 0xb0a   : > { %v7444_v1 = vadd.f32 %v7438_v61, %v2932_v32 }
 0xb0b   : > { %v5863_v2 = vpop.f32.mrf.mxu1 }
 0xb0c   : > { %v2952_v2 = vadd.f32 %v7444_v1, %v7360_v9 }
 0xb0d   : > { %v2937_v3 = vpop.f32.mrf.mxu1 }
 0xb0e   : > { %v7447_v34 = vadd.f32 %v7438_v61, %v2937_v3  ;;  %v2960_v3 = vsel %vm1265_vm1, %v2952_v2, 0.0 }
 0xb0f   : > { %v5866_v37 = vpop.f32.mrf.mxu1 }
 0xb10   : > { %v2953_v37 = vadd.f32 %v7447_v34, %v7367_v41 }
 0xb11   : > { %v2942_v7 = vpop.f32.mrf.mxu1 }
 0xb12   : > { %v7450_v10 = vadd.f32 %v7438_v61, %v2942_v7  ;;  %v2963_v7 = vsel %vm1265_vm1, %v2953_v37, 0.0 }
 0xb13   : > { %v5869_v12 = vpop.f32.mrf.mxu1 }
 0xb14   : > { %v2954_v12 = vadd.f32 %v7450_v10, %v7374_v28  ;;  %v5325_v28 = vld [vmem:[%s7854_s2 + $0x10] sm:$0xff] }
 0xb15   : > { %v7452_v5 = vpop.f32.mrf.mxu1 }
 0xb16   : > { %v2948_v56 = vadd.f32 %v7438_v61, %v7452_v5  ;;  %v5326_v5 = vld [vmem:[%s7854_s2 + $0x18] sm:$0xff] }
 0xb17   : > { %v5872_v13 = vpop.f32.mrf.mxu1 }
 0xb18   : > { %v7495_v57 = vadd.f32 %v2948_v56, %v7381_v31  ;;  %v2951_v31 = vadd.f32 %v7441_v63, %v7353_v6  ;;  %v2966_v6 = vsel %vm1265_vm1, %v2954_v12, 0.0  ;;  %v5330_v56 = vld [vmem:[%s7855_s16 + $0x20] sm:$0xff] }
 0xb19   : > { %v3122_v16 = vpop.f32.mrf.mxu1 }
 0xb1a   : > { %v3123_v45 = vadd.f32 %v5302_v15, %v3122_v16  ;;  %v2969_v33 = vsel %vm2636_vm9, %v7495_v57, 0.0  ;;  %v2957_v61 = vsel %vm1265_vm1, %v2951_v31, 0.0 }
 0xb1b   : > { %v5883_v17 = vpop.f32.mrf.mxu1 }
 0xb1c   : > { %5909 = vmatmul.mubr.msk.f32.vlgmr.msra.gmra.mxu1 %vm1780_vm5, %v3123_v45  ;;  %v5321_v17 = vld [vmem:[#allocation8] ss:$0 sm:$0xff] }
 0xb1d   : > { %5920 = vmatprep.mubr.msk.f32.mxu1 %vm6604_vm0, %v6603_v0  ;;  %5917 = vmatpush3.msra.mxu1 %v3459_v27 }
 0xb1e   : > { %5918 = vmatprep.subr.mxu1 %v6603_v0 }
 0xb1f   : > { %5919 = vmatpush3.msra.mxu1 %v3458_v49 }
 0xb20   : > { %5928 = vmatprep.subr.mxu1 %v6603_v0 }
 0xbdc   : > { %v3368_v11 = vpop.f32.mrf.mxu1 }
 0xbdd   : > { %v3372_v26 = vmul.f32 0.25, %v3368_v11 }
 0xbde   : > { %v5910_v4 = vpop.f32.mrf.mxu1 }
 0xbdf   : > { %v3374_v18 = vsel %vm3373_vm11, %v3372_v26, -inf }
 0xbe0   : > { %3375 = vmax.xlane.f32.xlu1 %v3374_v18 }
 0xbf1   : > { %3542 = vrot.lane.b32.xlu1 %v3206_v20, %s6605_s23 }
 0xc69   : > { %v3376_v25 = vpop.xlane.xlu1 %3375 }
 0xc6a   : > { %v3377_v35 = vsub.f32 %v3372_v26, %v3376_v25 }
 0xc6c   : > { %v3378_v36 = vmul.f32 1.442695, %v3377_v35 }
 0xc6d   : > { %v3543_v47 = vpop.permute.xlu1 %3542 }
 0xc6e   : > { %6283 = vpow2.f32 %v3378_v36 }
 0xc7b   : > { %v6284_v29 = vpop.eup %6283 }
 0xc7c   : > { %v3380_v39 = vsel %vm3373_vm11, %v6284_v29, 0.0 }
 0xc7d   : > { %3381 = vadd.xlane.f32.xlu0 %v3380_v39 }
 0xc93   : > { %3540 = vrot.lane.b32.xlu0 %v3123_v45, %s6605_s23 }
 0xd06   : > { %v3382_v44 = vpop.xlane.xlu0 %3381 }
 0xd07   : > { %6285 = vrcp.f32 %v3382_v44 }
 0xd0a   : > { %v3541_v48 = vpop.permute.xlu0 %3540 }
 0xd14   : > { %v6286_v24 = vpop.eup %6285 }
 0xd15   : > { %v3384_v46 = vmul.f32 %v6286_v24, %v6284_v29 }
 0xd17   : > { %5914 = vmatmul.mubr.msk.f32.vlgmr.msra.gmra.mxu0 %vm3373_vm11, %v3384_v46 }
 0xd18   : > { %5924 = vmatpush3.xpose.msk.msra.mxu0 %vm1780_vm5, %v3543_v47  ;;  %5925 = vmatprep.mubr.msk.f32.mxu0 %vm6604_vm0, %v6603_v0 }
 0xd19   : > { %5933 = vmatprep.subr.mxu0 %v6603_v0 }
 0xd1b   : > { %5926 = vmatmul.mubr.msk.f32.vlgmr.msra.gmra.mxu0 %vm1780_vm5, %v3541_v48 }
 0xd1c   : > { %5937 = vmatprep.mubr.msk.f32.mxu0 %vm6604_vm0, %v6603_v0  ;;  %5934 = vmatpush3.msra.mxu0 %v5326_v5 }
 0xd1d   : > { %5935 = vmatprep.subr.mxu0 %v6603_v0 }
 0xd1e   : > { %5936 = vmatpush3.msra.mxu0 %v5325_v28 }
 0xd1f   : > { %5951 = vmatprep.subr.mxu0 %v6603_v0 }
 0xdd7   : > { %v3454_v50 = vpop.f32.mrf.mxu0 }
 0xdd8   : > { %5921 = vmatmul.mubr.msk.f32.vlgmr.msra.gmra.mxu1 %vm1780_vm5, %v3454_v50 }
 0xdd9   : > { %v5915_v51 = vpop.f32.mrf.mxu0  ;;  %5930 = vmatprep.mubr.msk.f32.mxu1 %vm6604_vm0, %v6603_v0 }
 0xddb   : > { %v3614_v52 = vpop.f32.mrf.mxu0 }
 0xddc   : > { %v3618_v53 = vmul.f32 0.25, %v3614_v52 }
 0xddd   : > { %v5927_v54 = vpop.f32.mrf.mxu0 }
 0xdde   : > { %v3619_v55 = vsel %vm3373_vm11, %v3618_v53, -inf  ;;  %v5332_v54 = vld [vmem:[%s7855_s16 + $0x30] sm:$0xff] }
 0xddf   : > { %3620 = vmax.xlane.f32.xlu1 %v3619_v55  ;;  %v5331_v55 = vld [vmem:[%s7855_s16 + $0x28] sm:$0xff] }
 0xdf0   : > { %3631 = vrot.lane.b32.xlu1 %v3292_v42, %s6605_s23 }
 0xe14   : > { %2970 = vadd.xlane.f32.xlu1 %v2969_v33 }
 0xe68   : > { %v3621_v59 = vpop.xlane.xlu1 %3620 }
 0xe69   : > { %v3622_v20 = vsub.f32 %v3618_v53, %v3621_v59  ;;  %v5333_v53 = vld [vmem:[%s7855_s16 + $0x38] sm:$0xff] }
 0xe6b   : > { %v3623_v60 = vmul.f32 1.442695, %v3622_v20 }
 0xe6c   : > { %v3632_v62 = vpop.permute.xlu1 %3631 }
 0xe6d   : > { %6287 = vpow2.f32 %v3623_v60  ;;  %5929 = vmatpush3.msra.mxu1 %v3632_v62 }
 0xe6e   : > { %5940 = vmatprep.subr.mxu1 %v6603_v0 }
 0xe7a   : > { %v6288_v38 = vpop.eup %6287 }
 0xe7b   : > { %v3625_v32 = vsel %vm3373_vm11, %v6288_v38, 0.0 }
 0xe7c   : > { %3626 = vadd.xlane.f32.xlu0 %v3625_v32 }
 0xe80   : > { %2958 = vadd.xlane.f32.xlu0 %v2957_v61 }
 0xe84   : > { %2961 = vadd.xlane.f32.xlu0 %v2960_v3 }
 0xe88   : > { %2964 = vadd.xlane.f32.xlu0 %v2963_v7 }
 0xe8c   : > { %2967 = vadd.xlane.f32.xlu0 %v2966_v6 }
 0xe98   : > { %v3529_v63 = vpop.f32.mrf.mxu1 }
 0xe99   : > { %v3539_v21 = vadd.f32 %v5321_v17, %v3529_v63  ;;  %v2956_v63 = vld [vmem:[%s7856_s1] sm:$0x3]  ;;  %s7858_s1 = sld [smem:[#allocation35_spill]] }
 0xe9a   : > { %v5922_v9 = vpop.f32.mrf.mxu1 }
 0xe9d   : > { %v2971_v43 = vpop.xlane.xlu1 %2970 }
 0xe9e   : > { %v2976_v27 = vmul.f32 0.03125, %v2971_v43 }
 0xea0   : > { %v7541_v47 = vsub.f32 %v7495_v57, %v2976_v27 }
 0xea2   : > { %v2986_v51 = vmul.f32 %v7541_v47, %v7541_v47 }
 0xea4   : > { %v2999_v52 = vsel %vm2636_vm9, %v2986_v51, 0.0 }
 0xf05   : > { %v3627_v1 = vpop.xlane.xlu0 %3626 }
 0xf06   : > { %6289 = vrcp.f32 %v3627_v1 }
 0xf09   : > { %v2959_v15 = vpop.xlane.xlu0 %2958 }
 0xf0a   : > { %v2972_v45 = vmul.f32 0.03125, %v2959_v15 }
 0xf0c   : > { %v7523_v22 = vsub.f32 %v2951_v31, %v2972_v45 }
 0xf0d   : > { %v2962_v16 = vpop.xlane.xlu0 %2961 }
 0xf0e   : > { %v2973_v8 = vmul.f32 0.03125, %v2962_v16  ;;  %v2982_v36 = vmul.f32 %v7523_v22, %v7523_v22 }
 0xf10   : > { %v7525_v18 = vsub.f32 %v2952_v2, %v2973_v8  ;;  %v2987_v23 = vsel %vm1265_vm1, %v2982_v36, 0.0 }
 0xf11   : > { %v2965_v19 = vpop.xlane.xlu0 %2964 }
 0xf12   : > { %v2974_v25 = vmul.f32 0.03125, %v2965_v19  ;;  %v2983_v42 = vmul.f32 %v7525_v18, %v7525_v18  ;;  %v6317_v19 = vld [vmem:[%s7845_s22] sm:$0xff] }
 0xf13   : > { %v6290_v41 = vpop.eup %6289 }
 0xf14   : > { %v3629_v34 = vmul.f32 %v6290_v41, %v6288_v38  ;;  %v7530_v39 = vsub.f32 %v2953_v37, %v2974_v25  ;;  %v2990_v24 = vsel %vm1265_vm1, %v2983_v42, 0.0  ;;  %v3025_v41 = vrot.slane %v2956_v63, %v7345_v58 }
 0xf15   : > { %v2968_v29 = vpop.xlane.xlu0 %2967 }
 0xf16   : > { %5931 = vmatmul.mubr.msk.f32.vlgmr.msra.gmra.mxu1 %vm3373_vm11, %v3629_v34  ;;  %v2975_v40 = vmul.f32 0.03125, %v2968_v29  ;;  %v2984_v46 = vmul.f32 %v7530_v39, %v7530_v39 }
 0xf17   : > { %5948 = vmatprep.mubr.msk.f32.mxu1 %vm6604_vm0, %v6603_v0 }
 0xf18   : > { %v7535_v44 = vsub.f32 %v2954_v12, %v2975_v40  ;;  %v2993_v48 = vsel %vm1265_vm1, %v2984_v46, 0.0  ;;  %v3817_v40 = vld [vmem:[%s7855_s16 + $0x10] sm:$0xff] }
 0xf1a   : > { %v2985_v49 = vmul.f32 %v7535_v44, %v7535_v44 }
 0xf1c   : > { %v2996_v50 = vsel %vm1265_vm1, %v2985_v49, 0.0  ;;  %v6320_v49 = vld [vmem:[%s7845_s22 + $0x18] sm:$0xff] }
 0xfd6   : > { %v3703_v10 = vpop.f32.mrf.mxu1 }
 0xfd7   : > { %5938 = vmatmul.mubr.msk.f32.vlgmr.msra.gmra.mxu0 %vm1780_vm5, %v3703_v10 }
 0xfd8   : > { %v5932_v13 = vpop.f32.mrf.mxu1  ;;  %5959 = vmatprep.mubr.msk.f32.mxu0 %vm6604_vm0, %v6603_v0  ;;  %5952 = vmatpush3.msra.mxu0 %v5333_v53 }
 0xfd9   : > { %5953 = vmatprep.subr.mxu0 %v6603_v0  ;;  %v3034_v13 = vrot.slane %v2956_v63, %v7348_v30 }
 0xfda   : > { %5954 = vmatpush3.msra.mxu0 %v5332_v54 }
 0xfdb   : > { %5955 = vmatprep.subr.mxu0 %v6603_v0 }
 0xfdc   : > { %5956 = vmatpush3.msra.mxu0 %v5331_v55 }
 0xfdd   : > { %5957 = vmatprep.subr.mxu0 %v6603_v0 }
 0xfde   : > { %5958 = vmatpush3.msra.mxu0 %v5330_v56 }
 0xfdf   : > { %5997 = vmatprep.subr.mxu0 %v6603_v0 }
0x1097   : > { %v3779_v11 = vpop.f32.mrf.mxu0 }
0x1098   : > { %v3783_v26 = vadd.f32 %v3779_v11, %v3539_v21 }
0x1099   : > { %v5939_v4 = vpop.f32.mrf.mxu0 }
0x109a   : > { %v3786_v35 = vsel %vm1265_vm1, %v3783_v26, 0.0  ;;  %v6318_v4 = vld [vmem:[%s7845_s22 + $0x8] sm:$0xff] }
0x109b   : > { %3787 = vadd.xlane.f32.xlu0 %v3786_v35 }
0x109f   : > { %2988 = vadd.xlane.f32.xlu0 %v2987_v23  ;;  %v6319_v23 = vld [vmem:[%s7845_s22 + $0x10] sm:$0xff] }
0x10a3   : > { %2991 = vadd.xlane.f32.xlu0 %v2990_v24  ;;  %v3816_v24 = vld [vmem:[%s7855_s16 + $0x8] sm:$0xff] }
0x10a7   : > { %2994 = vadd.xlane.f32.xlu0 %v2993_v48  ;;  %v3815_v48 = vld [vmem:[%s7855_s16] sm:$0xff] }
0x10ab   : > { %2997 = vadd.xlane.f32.xlu0 %v2996_v50 }
0x10af   : > { %3000 = vadd.xlane.f32.xlu0 %v2999_v52 }
0x1124   : > { %v3788_v57 = vpop.xlane.xlu0 %3787 }
0x1125   : > { %v3789_v33 = vmul.f32 0.03125, %v3788_v57  ;;  %v3785_v57 = vld [vmem:[%s7857_s0] sm:$0x3]  ;;  %s7859_s0 = sld [smem:[#allocation36_spill]] }
0x1127   : > { %v7558_v59 = vsub.f32 %v3783_v26, %v3789_v33  ;;  %v3802_v33 = vrot.slane %v3785_v57, %v7345_v58 }
0x1128   : > { %v2989_v20 = vpop.xlane.xlu0 %2988 }
0x1129   : > { %v3002_v60 = vmul.f32 0.03125, %v2989_v20  ;;  %v3791_v62 = vmul.f32 %v7558_v59, %v7558_v59 }
0x112b   : > { %v3007_v38 = vadd.f32 1e-05, %v3002_v60  ;;  %v3792_v32 = vsel %vm1265_vm1, %v3791_v62, 0.0  ;;  %v3807_v62 = vrot.slane %v3785_v57, %v7348_v30 }
0x112c   : > { %3793 = vadd.xlane.f32.xlu0 %v3792_v32  ;;  %v2992_v31 = vpop.xlane.xlu0 %2991 }
0x112d   : > { %6291 = vrsqrt.f32 %v3007_v38  ;;  %v3003_v61 = vmul.f32 0.03125, %v2992_v31 }
0x112f   : > { %v3008_v2 = vadd.f32 1e-05, %v3003_v61  ;;  %v5344_v61 = vld [vmem:[%s7855_s16 + $0x58] sm:$0xff] }
0x1130   : > { %v2995_v3 = vpop.xlane.xlu0 %2994 }
0x1131   : > { %6293 = vrsqrt.f32 %v3008_v2  ;;  %v3004_v37 = vmul.f32 0.03125, %v2995_v3  ;;  %v5343_v2 = vld [vmem:[%s7855_s16 + $0x50] sm:$0xff]  ;;  %v5342_v3 = vld [vmem:[%s7855_s16 + $0x48] sm:$0xff] }
0x1133   : > { %v3009_v7 = vadd.f32 1e-05, %v3004_v37 }
0x1134   : > { %v2998_v12 = vpop.xlane.xlu0 %2997 }
0x1135   : > { %6295 = vrsqrt.f32 %v3009_v7  ;;  %v3005_v6 = vmul.f32 0.03125, %v2998_v12 }
0x1137   : > { %v3010_v5 = vadd.f32 1e-05, %v3005_v6 }
0x1138   : > { %v3001_v9 = vpop.xlane.xlu0 %3000 }
0x1139   : > { %6297 = vrsqrt.f32 %v3010_v5  ;;  %v3006_v1 = vmul.f32 0.03125, %v3001_v9 }
0x113a   : > { %v6292_v34 = vpop.eup %6291 }
0x113b   : > { %v3017_v28 = vmul.f32 %v6292_v34, %v7523_v22  ;;  %v3011_v10 = vadd.f32 1e-05, %v3006_v1  ;;  %v5335_v1 = vld [vmem:[%s7858_s1 + $0x1] ss:$0 sm:$0xff] }
0x113d   : > { %6299 = vrsqrt.f32 %v3011_v10  ;;  %v3026_v15 = vmul.f32 %v3025_v41, %v3017_v28 }
0x113e   : > { %v6294_v16 = vpop.eup %6293 }
0x113f   : > { %v7567_v45 = vadd.f32 %v3034_v13, %v3026_v15  ;;  %v3018_v17 = vmul.f32 %v6294_v16, %v7525_v18 }
0x1141   : > { %v3810_v21 = vadd.f32 %v6317_v19, %v7567_v45  ;;  %v3027_v8 = vmul.f32 %v3025_v41, %v3018_v17 }
0x1142   : > { %v6296_v11 = vpop.eup %6295 }
0x1143   : > { %5960 = vmatmul.mubr.msk.f32.vlgmr.msra.gmra.mxu0 %vm1265_vm1, %v3810_v21  ;;  %v7573_v22 = vadd.f32 %v3034_v13, %v3027_v8  ;;  %v3019_v26 = vmul.f32 %v6296_v11, %v7530_v39  ;;  %v3818_v39 = vld [vmem:[%s7855_s16 + $0x18] sm:$0xff] }
0x1144   : > { %5962 = vmatprep.mubr.msk.f32.mxu0 %vm6604_vm0, %v6603_v0  ;;  %5941 = vmatpush3.msra.mxu1 %v3818_v39 }
0x1145   : > { %v3811_v18 = vadd.f32 %v6318_v4, %v7573_v22  ;;  %v3028_v25 = vmul.f32 %v3025_v41, %v3019_v26  ;;  %5942 = vmatprep.subr.mxu1 %v6603_v0 }
0x1146   : > { %v6298_v35 = vpop.eup %6297  ;;  %5943 = vmatpush3.msra.mxu1 %v3817_v40 }
0x1147   : > { %5963 = vmatmul.mubr.msk.f32.gmra.mxu0 %vm1265_vm1, %v3811_v18  ;;  %v7581_v36 = vadd.f32 %v3034_v13, %v3028_v25  ;;  %v3020_v29 = vmul.f32 %v6298_v35, %v7535_v44  ;;  %5944 = vmatprep.subr.mxu1 %v6603_v0  ;;  %v5346_v25 = vld [vmem:[%s7858_s1 + $0x2] ss:$0 sm:$0xff] }
0x1148   : > { %5965 = vmatprep.mubr.msk.f32.mxu0 %vm6604_vm0, %v6603_v0  ;;  %5945 = vmatpush3.msra.mxu1 %v3816_v24 }
0x1149   : > { %v3812_v42 = vadd.f32 %v6319_v23, %v7581_v36  ;;  %v3029_v43 = vmul.f32 %v3025_v41, %v3020_v29  ;;  %5946 = vmatprep.subr.mxu1 %v6603_v0 }
0x114a   : > { %v6300_v27 = vpop.eup %6299  ;;  %5947 = vmatpush3.msra.mxu1 %v3815_v48 }
0x114b   : > { %5966 = vmatmul.mubr.msk.f32.gmra.mxu0 %vm1265_vm1, %v3812_v42  ;;  %v3038_v46 = vadd.f32 %v3034_v13, %v3029_v43  ;;  %v3021_v44 = vmul.f32 %v6300_v27, %v7541_v47  ;;  %5974 = vmatprep.subr.mxu1 %v6603_v0  ;;  %v6321_v47 = vld [vmem:[%s7845_s22 + $0x20] sm:$0x3] }
0x114c   : > { %5968 = vmatprep.mubr.msk.f32.mxu0 %vm6604_vm0, %v6603_v0 }
0x114d   : > { %v3813_v50 = vadd.f32 %v6320_v49, %v3038_v46  ;;  %v3030_v51 = vmul.f32 %v3025_v41, %v3021_v44 }
0x114f   : > { %5969 = vmatmul.mubr.msk.f32.gmra.mxu0 %vm1265_vm1, %v3813_v50  ;;  %v3039_v52 = vadd.f32 %v3034_v13, %v3030_v51 }
0x1150   : > { %5971 = vmatprep.mubr.msk.f32.mxu0 %vm6604_vm0, %v6603_v0 }
0x1151   : > { %v3814_v53 = vadd.f32 %v6321_v47, %v3039_v52 }
0x1153   : > { %5972 = vmatmul.mubr.msk.f32.gmra.mxu0 %vm1265_vm1, %v3814_v53  ;;  %v4313_v53 = vld [vmem:[%s7859_s0 + $0x8] sm:$0xff] }
0x1154   : > { %6007 = vmatprep.mubr.msk.f32.mxu0 %vm6604_vm0, %v6603_v0 }
0x11b5   : > { %v3794_v54 = vpop.xlane.xlu0 %3793 }
0x11b6   : > { %v3795_v55 = vmul.f32 0.03125, %v3794_v54  ;;  %v4312_v54 = vld [vmem:[%s7859_s0] sm:$0xff] }
0x11b8   : > { %v3796_v56 = vadd.f32 1e-05, %v3795_v55 }
0x11ba   : > { %6301 = vrsqrt.f32 %v3796_v56 }
0x11c7   : > { %v6302_v20 = vpop.eup %6301 }
0x11c8   : > { %v3798_v60 = vmul.f32 %v6302_v20, %v7558_v59  ;;  %v5341_v59 = vld [vmem:[%s7855_s16 + $0x40] sm:$0xff] }
0x11ca   : > { %v3803_v38 = vmul.f32 %v3802_v33, %v3798_v60 }
0x11cc   : > { %v7612_v32 = vadd.f32 %v3807_v62, %v3803_v38 }
0x11ce   : > { %v3809_v31 = vadd.f32 %v7612_v32, %v7401_v14 }
0x11d0   : > { %5949 = vmatmul.mubr.msk.f32.vlgmr.msra.gmra.mxu1 %vm1265_vm1, %v3809_v31 }
0x11d1   : > { %5975 = vmatpush3.msra.mxu1 %v5344_v61  ;;  %5982 = vmatprep.mubr.msk.f32.mxu1 %vm6604_vm0, %v6603_v0 }
0x11d2   : > { %5976 = vmatprep.subr.mxu1 %v6603_v0 }
0x11d3   : > { %5977 = vmatpush3.msra.mxu1 %v5343_v2 }
0x11d4   : > { %5978 = vmatprep.subr.mxu1 %v6603_v0 }
0x11d5   : > { %5979 = vmatpush3.msra.mxu1 %v5342_v3 }
0x11d6   : > { %5980 = vmatprep.subr.mxu1 %v6603_v0 }
0x11d7   : > { %5981 = vmatpush3.msra.mxu1 %v5341_v59 }
0x11d8   : > { %5983 = vmatmul.mubr.msk.f32.vlgmr.msra.gmra.mxu1 %vm1265_vm1, %v7567_v45  ;;  %6010 = vmatprep.subr.mxu1 %v6603_v0  ;;  %v5328_v45 = vld [vmem:[%s7858_s1] ss:$0 sm:$0xff]  ;;  %s7862_s1 = sld [smem:[#allocation38_spill]] }
0x11d9   : > { %5985 = vmatprep.mubr.msk.f32.mxu1 %vm6604_vm0, %v6603_v0 }
0x11dc   : > { %5986 = vmatmul.mubr.msk.f32.gmra.mxu1 %vm1265_vm1, %v7573_v22 }
0x11dd   : > { %5988 = vmatprep.mubr.msk.f32.mxu1 %vm6604_vm0, %v6603_v0 }
0x11e0   : > { %5989 = vmatmul.mubr.msk.f32.gmra.mxu1 %vm1265_vm1, %v7581_v36 }
0x11e1   : > { %5991 = vmatprep.mubr.msk.f32.mxu1 %vm6604_vm0, %v6603_v0 }
0x11e4   : > { %5992 = vmatmul.mubr.msk.f32.gmra.mxu1 %vm1265_vm1, %v3038_v46 }
0x11e5   : > { %5994 = vmatprep.mubr.msk.f32.mxu1 %vm6604_vm0, %v6603_v0 }
0x11e8   : > { %5995 = vmatmul.mubr.msk.f32.gmra.mxu1 %vm1265_vm1, %v3039_v52 }
0x11e9   : > { %6020 = vmatprep.mubr.msk.f32.mxu1 %vm6604_vm0, %v6603_v0 }
0x1203   : > { %v3993_v14 = vpop.f32.mrf.mxu0 }
0x1204   : > { %v3994_v16 = vadd.f32 %v5335_v1, %v3993_v14 }
0x1205   : > { %v5961_v37 = vpop.f32.mrf.mxu0 }
0x1207   : > { %v3998_v7 = vpop.f32.mrf.mxu0 }
0x1208   : > { %v3999_v15 = vadd.f32 %v5335_v1, %v3998_v7 }
0x1209   : > { %v5964_v12 = vpop.f32.mrf.mxu0 }
0x120b   : > { %v4003_v6 = vpop.f32.mrf.mxu0 }
0x120c   : > { %v4004_v10 = vadd.f32 %v5335_v1, %v4003_v6 }
0x120d   : > { %v5967_v63 = vpop.f32.mrf.mxu0 }
0x120f   : > { %v4008_v5 = vpop.f32.mrf.mxu0 }
0x1210   : > { %v4009_v13 = vadd.f32 %v5335_v1, %v4008_v5 }
0x1211   : > { %v5970_v9 = vpop.f32.mrf.mxu0 }
0x1213   : > { %v4013_v41 = vpop.f32.mrf.mxu0 }
0x1214   : > { %v4014_v34 = vadd.f32 %v5335_v1, %v4013_v41 }
0x1215   : > { %v5973_v28 = vpop.f32.mrf.mxu0 }
0x1216   : > { %4404 = vrot.lane.b32.xlu1 %v4014_v34, %s6605_s23  ;;  %5998 = vmatpush3.xpose.msk.msra.mxu0 %vm1780_vm5, %v4014_v34 }
0x1217   : > { %5999 = vmatprep.subr.mxu0 %v6603_v0 }
0x121a   : > { %4400 = vrot.lane.b32.xlu1 %v4004_v10, %s6605_s23  ;;  %6000 = vmatpush3.xpose.msk.msra.mxu0 %vm1780_vm5, %v4009_v13 }
0x121b   : > { %6001 = vmatprep.subr.mxu0 %v6603_v0 }
0x121e   : > { %4398 = vrot.lane.b32.xlu1 %v3999_v15, %s6605_s23  ;;  %6002 = vmatpush3.xpose.msk.msra.mxu0 %vm1780_vm5, %v4004_v10 }
0x121f   : > { %6003 = vmatprep.subr.mxu0 %v6603_v0 }
0x1222   : > { %6004 = vmatpush3.xpose.msk.msra.mxu0 %vm1780_vm5, %v3999_v15 }
0x1223   : > { %6005 = vmatprep.subr.mxu0 %v6603_v0 }
0x1226   : > { %6006 = vmatpush3.xpose.msk.msra.mxu0 %vm1780_vm5, %v3994_v16 }
0x1227   : > { %6023 = vmatprep.subr.mxu0 %v6603_v0 }
0x1288   : > { %v4405_v20 = vpop.permute.xlu1 %4404 }
0x128c   : > { %v4401_v38 = vpop.permute.xlu1 %4400 }
0x1290   : > { %v3895_v17 = vpop.f32.mrf.mxu1  ;;  %v4399_v31 = vpop.permute.xlu1 %4398 }
0x1291   : > { %v3896_v19 = vadd.f32 %v5328_v45, %v3895_v17  ;;  %v5371_v17 = vld [vmem:[%s7859_s0 + $0x18] sm:$0xff] }
0x1292   : > { %v5950_v21 = vpop.f32.mrf.mxu1 }
0x1293   : > { %4394 = vrot.lane.b32.xlu1 %v3896_v19, %s6605_s23  ;;  %6008 = vmatmul.mubr.msk.f32.vlgmr.msra.gmra.mxu0 %vm1780_vm5, %v3896_v19  ;;  %v5370_v19 = vld [vmem:[%s7859_s0 + $0x10] sm:$0xff]  ;;  %s7861_s0 = sld [smem:[#allocation41_spill]] }
0x1294   : > { %6027 = vmatprep.mubr.msk.f32.mxu0 %vm6604_vm0, %v6603_v0  ;;  %6024 = vmatpush3.msra.mxu0 %v4313_v53 }
0x1295   : > { %6025 = vmatprep.subr.mxu0 %v6603_v0 }
0x1296   : > { %6026 = vmatpush3.msra.mxu0 %v4312_v54 }
0x1297   : > { %6030 = vmatprep.subr.mxu0 %v6603_v0 }
0x1298   : > { %v4111_v8 = vpop.f32.mrf.mxu1 }
0x1299   : > { %v4112_v27 = vadd.f32 %v5346_v25, %v4111_v8 }
0x129a   : > { %v5984_v11 = vpop.f32.mrf.mxu1 }
0x129b   : > { %v5361_v11 = vld [vmem:[#allocation10] ss:$0 sm:$0xff] }
0x129c   : > { %v4116_v22 = vpop.f32.mrf.mxu1 }
0x129d   : > { %v7674_v43 = vadd.f32 %v5346_v25, %v4116_v22 }
0x129e   : > { %v5987_v26 = vpop.f32.mrf.mxu1 }
0x12a0   : > { %v4121_v4 = vpop.f32.mrf.mxu1 }
0x12a1   : > { %v7671_v42 = vadd.f32 %v5346_v25, %v4121_v4 }
0x12a2   : > { %v5990_v18 = vpop.f32.mrf.mxu1 }
0x12a4   : > { %v4126_v35 = vpop.f32.mrf.mxu1 }
0x12a5   : > { %v4127_v36 = vadd.f32 %v5346_v25, %v4126_v35 }
0x12a6   : > { %v5993_v29 = vpop.f32.mrf.mxu1 }
0x12a7   : > { %4510 = vrot.lane.b32.xlu1 %v4127_v36, %s6605_s23 }
0x12a8   : > { %v4131_v39 = vpop.f32.mrf.mxu1 }
0x12a9   : > { %v7666_v40 = vadd.f32 %v5346_v25, %v4131_v39 }
0x12aa   : > { %v5996_v23 = vpop.f32.mrf.mxu1 }
0x12ab   : > { %6011 = vmatpush3.msk.msra.mxu1 %vm1978_vm6, %v7666_v40 }
0x12ac   : > { %6012 = vmatprep.subr.mxu1 %v6603_v0 }
0x12ad   : > { %6013 = vmatpush3.msra.mxu1 %v4127_v36 }
0x12ae   : > { %6014 = vmatprep.subr.mxu1 %v6603_v0 }
0x12af   : > { %6015 = vmatpush3.msra.mxu1 %v7671_v42 }
0x12b0   : > { %6016 = vmatprep.subr.mxu1 %v6603_v0 }
0x12b1   : > { %6017 = vmatpush3.msra.mxu1 %v7674_v43 }
0x12b2   : > { %6018 = vmatprep.subr.mxu1 %v6603_v0 }
0x12b3   : > { %6019 = vmatpush3.msra.mxu1 %v4112_v27 }
0x12b4   : > { %6043 = vmatprep.subr.mxu1 %v6603_v0 }
0x1305   : > { %v4395_v2 = vpop.permute.xlu1 %4394 }
0x1319   : > { %v4511_v1 = vpop.permute.xlu1 %4510 }
0x1353   : > { %v4220_v24 = vpop.f32.mrf.mxu0 }
0x1354   : > { %v4224_v46 = vmul.f32 0.25, %v4220_v24  ;;  %v4787_v24 = vld [vmem:[%s7861_s0 + $0x38] sm:$0xff] }
0x1355   : > { %v6009_v44 = vpop.f32.mrf.mxu0 }
0x1356   : > { %v4225_v48 = vsel %vm1906_vm7, %v4224_v46, -inf  ;;  %v4785_v44 = vld [vmem:[%s7861_s0 + $0x28] sm:$0xff] }
0x1357   : > { %4226 = vmax.xlane.f32.xlu0 %v4225_v48  ;;  %v4784_v48 = vld [vmem:[%s7861_s0 + $0x20] sm:$0xff] }
0x13e0   : > { %v4227_v49 = vpop.xlane.xlu0 %4226 }
0x13e1   : > { %v4228_v50 = vsub.f32 %v4224_v46, %v4227_v49  ;;  %v4786_v46 = vld [vmem:[%s7861_s0 + $0x30] sm:$0xff]  ;;  %v4783_v49 = vld [vmem:[%s7861_s0 + $0x18] sm:$0xff] }
0x13e3   : > { %v4229_v51 = vmul.f32 1.442695, %v4228_v50 }
0x13e5   : > { %6303 = vpow2.f32 %v4229_v51 }
0x13f2   : > { %v6304_v52 = vpop.eup %6303 }
0x13f3   : > { %v4231_v47 = vsel %vm1906_vm7, %v6304_v52, 0.0 }
0x13f4   : > { %4232 = vadd.xlane.f32.xlu0 %v4231_v47  ;;  %v4671_v47 = vld [vmem:[%s7862_s1] sm:$0x3]  ;;  %s7863_s1 = sld [smem:[#allocation39_spill]] }
0x13f5   : > { %v4688_v53 = vrot.slane %v4671_v47, %v7345_v58 }
0x140a   : > { %4402 = vrot.lane.b32.xlu0 %v4009_v13, %s6605_s23 }
0x140e   : > { %4396 = vrot.lane.b32.xlu0 %v3994_v16, %s6605_s23 }
0x147d   : > { %v4233_v55 = vpop.xlane.xlu0 %4232 }
0x147e   : > { %6305 = vrcp.f32 %v4233_v55 }
0x1481   : > { %v4403_v62 = vpop.permute.xlu0 %4402 }
0x1485   : > { %v4397_v61 = vpop.permute.xlu0 %4396 }
0x148b   : > { %v6306_v56 = vpop.eup %6305 }
0x148c   : > { %v4235_v57 = vmul.f32 %v6306_v56, %v6304_v52  ;;  %v4693_v56 = vrot.slane %v4671_v47, %v7348_v30 }
0x148e   : > { %6021 = vmatmul.mubr.msk.f32.vlgmr.msra.gmra.mxu1 %vm1906_vm7, %v4235_v57 }
0x148f   : > { %6053 = vmatprep.mubr.msk.f32.mxu1 %vm6604_vm0, %v6603_v0 }
0x154e   : > { %v4308_v33 = vpop.f32.mrf.mxu1 }
0x154f   : > { %6028 = vmatmul.mubr.msk.f32.vlgmr.msra.gmra.mxu0 %vm1780_vm5, %v4308_v33 }
0x1550   : > { %6031 = vmatpush3.xpose.msk.msra.mxu0 %vm1780_vm5, %v4405_v20  ;;  %v6022_v60 = vpop.f32.mrf.mxu1  ;;  %6040 = vmatprep.mubr.msk.f32.mxu0 %vm6604_vm0, %v6603_v0  ;;  %v4782_v20 = vld [vmem:[%s7861_s0 + $0x10] sm:$0xff] }
0x1551   : > { %6032 = vmatprep.subr.mxu0 %v6603_v0  ;;  %v4781_v60 = vld [vmem:[%s7861_s0 + $0x8] sm:$0xff] }
0x1554   : > { %6033 = vmatpush3.xpose.msk.msra.mxu0 %vm1780_vm5, %v4403_v62  ;;  %v4780_v62 = vld [vmem:[%s7861_s0] sm:$0xff] }
0x1555   : > { %6034 = vmatprep.subr.mxu0 %v6603_v0 }
0x1558   : > { %6035 = vmatpush3.xpose.msk.msra.mxu0 %vm1780_vm5, %v4401_v38  ;;  %v5373_v38 = vld [vmem:[#allocation11] ss:$0 sm:$0xff] }
0x1559   : > { %6036 = vmatprep.subr.mxu0 %v6603_v0 }
0x155c   : > { %6037 = vmatpush3.xpose.msk.msra.mxu0 %vm1780_vm5, %v4399_v31 }
0x155d   : > { %6038 = vmatprep.subr.mxu0 %v6603_v0 }
0x1560   : > { %6039 = vmatpush3.xpose.msk.msra.mxu0 %vm1780_vm5, %v4397_v61 }
0x1561   : > { %6074 = vmatprep.subr.mxu0 %v6603_v0 }
0x1563   : > { %6041 = vmatmul.mubr.msk.f32.vlgmr.msra.gmra.mxu0 %vm1780_vm5, %v4395_v2 }
0x1564   : > { %6090 = vmatprep.mubr.msk.f32.mxu0 %vm6604_vm0, %v6603_v0  ;;  %6075 = vmatpush3.msra.mxu0 %v4787_v24 }
0x1565   : > { %6076 = vmatprep.subr.mxu0 %v6603_v0 }
0x1566   : > { %6077 = vmatpush3.msra.mxu0 %v4786_v46 }
0x1567   : > { %6078 = vmatprep.subr.mxu0 %v6603_v0 }
0x1568   : > { %6079 = vmatpush3.msra.mxu0 %v4785_v44 }
0x1569   : > { %6080 = vmatprep.subr.mxu0 %v6603_v0 }
0x156a   : > { %6081 = vmatpush3.msra.mxu0 %v4784_v48  ;;  %v5377_v48 = vld [vmem:[#allocation14] ss:$0 sm:$0xff] }
0x156b   : > { %6082 = vmatprep.subr.mxu0 %v6603_v0 }
0x156c   : > { %6083 = vmatpush3.msra.mxu0 %v4783_v49 }
0x156d   : > { %6084 = vmatprep.subr.mxu0 %v6603_v0 }
0x156e   : > { %6085 = vmatpush3.msra.mxu0 %v4782_v20 }
0x156f   : > { %6086 = vmatprep.subr.mxu0 %v6603_v0 }
0x1570   : > { %6087 = vmatpush3.msra.mxu0 %v4781_v60 }
0x1571   : > { %6088 = vmatprep.subr.mxu0 %v6603_v0 }
0x1572   : > { %6089 = vmatpush3.msra.mxu0 %v4780_v62 }
0x160f   : > { %v4383_v3 = vpop.f32.mrf.mxu0 }
0x1610   : > { %v4393_v22 = vadd.f32 %v5361_v11, %v4383_v3 }
0x1611   : > { %v6029_v59 = vpop.f32.mrf.mxu0 }
0x1612   : > { %v5375_v59 = vld [vmem:[#allocation13] ss:$0 sm:$0xff] }
0x1623   : > { %v4484_v14 = vpop.f32.mrf.mxu0 }
0x1624   : > { %v4488_v37 = vmul.f32 0.25, %v4484_v14 }
0x1625   : > { %v6042_v7 = vpop.f32.mrf.mxu0 }
0x1626   : > { %v4489_v12 = vsel %vm1906_vm7, %v4488_v37, -inf }
0x1627   : > { %4490 = vmax.xlane.f32.xlu0 %v4489_v12 }
0x163d   : > { %4512 = vrot.lane.b32.xlu0 %v7666_v40, %s6605_s23 }
0x1641   : > { %4508 = vrot.lane.b32.xlu0 %v7671_v42, %s6605_s23 }
0x1645   : > { %4504 = vrot.lane.b32.xlu0 %v4112_v27, %s6605_s23 }
0x16b0   : > { %v4491_v6 = vpop.xlane.xlu0 %4490 }
0x16b1   : > { %v4492_v63 = vsub.f32 %v4488_v37, %v4491_v6 }
0x16b3   : > { %v4493_v5 = vmul.f32 1.442695, %v4492_v63 }
0x16b4   : > { %v4513_v9 = vpop.permute.xlu0 %4512 }
0x16b5   : > { %6307 = vpow2.f32 %v4493_v5  ;;  %6044 = vmatpush3.msk.msra.mxu1 %vm1978_vm6, %v4513_v9 }
0x16b6   : > { %6045 = vmatprep.subr.mxu1 %v6603_v0 }
0x16b7   : > { %6046 = vmatpush3.msra.mxu1 %v4511_v1 }
0x16b8   : > { %6047 = vmatprep.subr.mxu1 %v6603_v0  ;;  %v4509_v41 = vpop.permute.xlu0 %4508 }
0x16b9   : > { %6048 = vmatpush3.msra.mxu1 %v4509_v41 }
0x16ba   : > { %6049 = vmatprep.subr.mxu1 %v6603_v0 }
0x16bc   : > { %v4505_v15 = vpop.permute.xlu0 %4504 }
0x16c2   : > { %v6308_v34 = vpop.eup %6307 }
0x16c3   : > { %v4495_v28 = vsel %vm1906_vm7, %v6308_v34, 0.0 }
0x16c4   : > { %4496 = vadd.xlane.f32.xlu1 %v4495_v28 }
0x16d5   : > { %4506 = vrot.lane.b32.xlu1 %v7674_v43, %s6605_s23  ;;  %s7860_s23 = sld [smem:[#allocation40_spill]] }
0x16db   : > { %v4698_v42 = vld [vmem:[%s7860_s23 + $0x18] sm:$0xff]  ;;  %v4697_v43 = vld [vmem:[%s7860_s23 + $0x10] sm:$0xff]  ;;  %v4695_v27 = vld [vmem:[%s7860_s23] sm:$0xff] }
0x174d   : > { %v4497_v10 = vpop.xlane.xlu1 %4496 }
0x174e   : > { %6309 = vrcp.f32 %v4497_v10 }
0x1751   : > { %v4507_v13 = vpop.permute.xlu1 %4506 }
0x1752   : > { %6050 = vmatpush3.msra.mxu1 %v4507_v13  ;;  %v4869_v13 = vld [vmem:[%s7863_s1] sm:$0x3]  ;;  %s5213_s1 = sshll.u32 %s7865_s15, 3 }
0x1753   : > { %6051 = vmatprep.subr.mxu1 %v6603_v0  ;;  %s1253_s0 = scalar_lea.vmem %s6799_s8, %s5213_s1 }
0x1754   : > { %6052 = vmatpush3.msra.mxu1 %v4505_v15  ;;  %v4886_v15 = vrot.slane %v4869_v13, %v7345_v58 }
0x1755   : > { %6056 = vmatprep.subr.mxu1 %v6603_v0 }
0x175b   : > { %v6310_v16 = vpop.eup %6309 }
0x175c   : > { %v4499_v45 = vmul.f32 %v6310_v16, %v6308_v34 }
0x175e   : > { %6054 = vmatmul.mubr.msk.f32.vlgmr.msra.gmra.mxu1 %vm1906_vm7, %v4499_v45 }
0x175f   : > { %6057 = vmatpush3.msra.mxu1 %v5371_v17  ;;  %6060 = vmatprep.mubr.msk.f32.mxu1 %vm6604_vm0, %v6603_v0  ;;  %v4891_v17 = vrot.slane %v4869_v13, %v7348_v30 }
0x1760   : > { %6058 = vmatprep.subr.mxu1 %v6603_v0 }
0x1761   : > { %6059 = vmatpush3.msra.mxu1 %v5370_v19 }
0x1762   : > { %6063 = vmatprep.subr.mxu1 %v6603_v0 }
0x181e   : > { %v4589_v21 = vpop.f32.mrf.mxu1 }
0x181f   : > { %6061 = vmatmul.mubr.msk.f32.vlgmr.msra.gmra.mxu1 %vm1780_vm5, %v4589_v21 }
0x1820   : > { %v6055_v8 = vpop.f32.mrf.mxu1  ;;  %6071 = vmatprep.mubr.msk.f32.mxu1 %vm6604_vm0, %v6603_v0  ;;  %6064 = vmatpush3.msra.mxu1 %v4698_v42  ;;  %v4893_v42 = vld [vmem:[%s6784_s19] sm:$0x3] }
0x1821   : > { %6065 = vmatprep.subr.mxu1 %v6603_v0  ;;  %v4915_v24 = vrot.slane %v4893_v42, %v7348_v30 }
0x1822   : > { %6066 = vmatpush3.msra.mxu1 %v4697_v43  ;;  %v4910_v43 = vrot.slane %v4893_v42, %v7345_v58 }
0x1823   : > { %6067 = vmatprep.subr.mxu1 %v6603_v0 }
0x18df   : > { %v4665_v26 = vpop.f32.mrf.mxu1 }
0x18e0   : > { %v4669_v4 = vadd.f32 %v4665_v26, %v4393_v22 }
0x18e1   : > { %v6062_v18 = vpop.f32.mrf.mxu1 }
0x18e2   : > { %v4670_v25 = vadd.f32 %v4669_v4, %v7612_v32  ;;  %v4696_v32 = vld [vmem:[%s7860_s23 + $0x8] sm:$0xff] }
0x18e3   : > { %6068 = vmatpush3.msra.mxu1 %v4696_v32 }
0x18e4   : > { %v4672_v35 = vsel %vm1265_vm1, %v4670_v25, 0.0  ;;  %6069 = vmatprep.subr.mxu1 %v6603_v0 }
0x18e5   : > { %4673 = vadd.xlane.f32.xlu1 %v4672_v35  ;;  %6070 = vmatpush3.msra.mxu1 %v4695_v27  ;;  %v4919_v35 = vld [vmem:[%s6789_s17 + $0x10] sm:$0xff] }
0x18e6   : > { %6093 = vmatprep.subr.mxu1 %v6603_v0 }
0x196e   : > { %v4674_v36 = vpop.xlane.xlu1 %4673 }
0x196f   : > { %v4675_v29 = vmul.f32 0.03125, %v4674_v36  ;;  %v4918_v36 = vld [vmem:[%s6789_s17 + $0x8] sm:$0xff] }
0x1971   : > { %v4676_v39 = vsub.f32 %v4670_v25, %v4675_v29  ;;  %v4920_v25 = vld [vmem:[%s6789_s17 + $0x18] sm:$0xff]  ;;  %v4917_v29 = vld [vmem:[%s6789_s17] sm:$0xff] }
0x1973   : > { %v4677_v40 = vmul.f32 %v4676_v39, %v4676_v39 }
0x1975   : > { %v4678_v23 = vsel %vm1265_vm1, %v4677_v40, 0.0 }
0x1976   : > { %4679 = vadd.xlane.f32.xlu0 %v4678_v23 }
0x19ff   : > { %v4680_v50 = vpop.xlane.xlu0 %4679 }
0x1a00   : > { %v4681_v51 = vmul.f32 0.03125, %v4680_v50 }
0x1a02   : > { %v4682_v52 = vadd.f32 1e-05, %v4681_v51 }
0x1a04   : > { %6311 = vrsqrt.f32 %v4682_v52 }
0x1a11   : > { %v6312_v54 = vpop.eup %6311 }
0x1a12   : > { %v4684_v55 = vmul.f32 %v6312_v54, %v4676_v39 }
0x1a14   : > { %v4689_v57 = vmul.f32 %v4688_v53, %v4684_v55 }
0x1a16   : > { %v4694_v33 = vadd.f32 %v4693_v56, %v4689_v57 }
0x1a18   : > { %6072 = vmatmul.mubr.msk.f32.vlgmr.msra.gmra.mxu1 %vm1265_vm1, %v4694_v33 }
0x1a19   : > { %6101 = vmatprep.mubr.msk.f32.mxu1 %vm6604_vm0, %v6603_v0  ;;  %6094 = vmatpush3.msra.mxu1 %v4920_v25 }
0x1a1a   : > { %6095 = vmatprep.subr.mxu1 %v6603_v0 }
0x1a1b   : > { %6096 = vmatpush3.msra.mxu1 %v4919_v35 }
0x1a1c   : > { %6097 = vmatprep.subr.mxu1 %v6603_v0 }
0x1a1d   : > { %6098 = vmatpush3.msra.mxu1 %v4918_v36 }
0x1a1e   : > { %6099 = vmatprep.subr.mxu1 %v6603_v0 }
0x1a1f   : > { %6100 = vmatpush3.msra.mxu1 %v4917_v29 }
0x1ad8   : > { %v4775_v31 = vpop.f32.mrf.mxu1 }
0x1ad9   : > { %v4776_v61 = vadd.f32 %v5373_v38, %v4775_v31 }
0x1ada   : > { %v6073_v2 = vpop.f32.mrf.mxu1 }
0x1adb   : > { %v4779_v3 = vmax.f32 %v4776_v61, 0.0 }
0x1add   : > { %6091 = vmatmul.mubr.msk.f32.vlgmr.msra.gmra.mxu0 %vm2845_vm10, %v4779_v3 }
0x1b9d   : > { %v4864_v14 = vpop.f32.mrf.mxu0 }
0x1b9e   : > { %v4865_v37 = vadd.f32 %v5375_v59, %v4864_v14 }
0x1b9f   : > { %v6092_v7 = vpop.f32.mrf.mxu0 }
0x1ba0   : > { %v4868_v12 = vadd.f32 %v4865_v37, %v4694_v33 }
0x1ba2   : > { %v4870_v6 = vsel %vm1265_vm1, %v4868_v12, 0.0 }
0x1ba3   : > { %4871 = vadd.xlane.f32.xlu0 %v4870_v6 }
0x1c2c   : > { %v4872_v63 = vpop.xlane.xlu0 %4871 }
0x1c2d   : > { %v4873_v5 = vmul.f32 0.03125, %v4872_v63 }
0x1c2f   : > { %v4874_v9 = vsub.f32 %v4868_v12, %v4873_v5 }
0x1c31   : > { %v4875_v1 = vmul.f32 %v4874_v9, %v4874_v9 }
0x1c33   : > { %v4876_v41 = vsel %vm1265_vm1, %v4875_v1, 0.0 }
0x1c34   : > { %4877 = vadd.xlane.f32.xlu1 %v4876_v41 }
0x1cbd   : > { %v4878_v34 = vpop.xlane.xlu1 %4877 }
0x1cbe   : > { %v4879_v28 = vmul.f32 0.03125, %v4878_v34 }
0x1cc0   : > { %v4880_v10 = vadd.f32 1e-05, %v4879_v28 }
0x1cc2   : > { %6313 = vrsqrt.f32 %v4880_v10 }
0x1ccf   : > { %v6314_v16 = vpop.eup %6313 }
0x1cd0   : > { %v4882_v45 = vmul.f32 %v6314_v16, %v4874_v9 }
0x1cd2   : > { %v4887_v19 = vmul.f32 %v4886_v15, %v4882_v45 }
0x1cd4   : > { %v4892_v21 = vadd.f32 %v4891_v17, %v4887_v19 }
0x1cd6   : > { %v4894_v8 = vsel %vm1265_vm1, %v4892_v21, 0.0 }
0x1cd7   : > { %4895 = vadd.xlane.f32.xlu0 %v4894_v8 }
0x1d60   : > { %v4896_v11 = vpop.xlane.xlu0 %4895 }
0x1d61   : > { %v4897_v22 = vmul.f32 0.03125, %v4896_v11 }
0x1d63   : > { %v4898_v26 = vsub.f32 %v4892_v21, %v4897_v22 }
0x1d65   : > { %v4899_v4 = vmul.f32 %v4898_v26, %v4898_v26 }
0x1d67   : > { %v4900_v18 = vsel %vm1265_vm1, %v4899_v4, 0.0 }
0x1d68   : > { %4901 = vadd.xlane.f32.xlu1 %v4900_v18 }
0x1df1   : > { %v4902_v39 = vpop.xlane.xlu1 %4901 }
0x1df2   : > { %v4903_v40 = vmul.f32 0.03125, %v4902_v39 }
0x1df4   : > { %v4904_v23 = vadd.f32 1e-05, %v4903_v40 }
0x1df6   : > { %6315 = vrsqrt.f32 %v4904_v23 }
0x1e03   : > { %v6316_v32 = vpop.eup %6315 }
0x1e04   : > { %v4906_v27 = vmul.f32 %v6316_v32, %v4898_v26 }
0x1e06   : > { %v4911_v46 = vmul.f32 %v4910_v43, %v4906_v27 }
0x1e08   : > { %v4916_v44 = vadd.f32 %v4915_v24, %v4911_v46 }
0x1e0a   : > { %6102 = vmatmul.mubr.msk.f32.vlgmr.msra.gmra.mxu1 %vm1265_vm1, %v4916_v44 }
0x1eca   : > { %v4997_v0 = vpop.f32.mrf.mxu1 }
0x1ecb   : > { %v4998_v49 = vadd.f32 %v5377_v48, %v4997_v0 }
0x1ecc   : > { %v6103_v50 = vpop.f32.mrf.mxu1 }
0x1ecd   : > { %5002 = vst.msk [vmem:[%s1253_s0] sm:$0xff] %vm5001_vm12, %v4998_v49 }
0x1ece PF: > { %s90_s7 = sadd.s32 1, %s6556_s7  }
0x1ecf   : > { %p87_p7 = scmp.ge.s32.totalorder %s90_s7, 4  }
0x1ed1   :  { %89 = sbr.rel (!%p87_p7) target bundleno = 69 (0x45), region = 289 }
0x1ed6   :  { %5022 = vsyncpa [#allocation4], 1 }
0x1ed7   :  { %5024 = vsyncpa [#allocation4 + $0x1], 1 }
0x1ed8   :  { %5025 = vsyncpa [#allocation6], 1 }
0x1ed9   :  { %5026 = vsyncpa [#allocation9], 1 }
0x1eda   :  { %5027 = vsyncpa [#allocation12], 1 }
0x1edb   :  { %5028 = vsyncpa [#allocation15], 1 }

</bundles_post_ra>
